<compile_context>
chip_gen: v5e
topology: v5e:2x2
jax: 0.10.0
libtpu: 0.0.40
codegen_flags: <defaults>
</compile_context>

<pallas_src>
import functools
import math

import jax
import jax.numpy as jnp
from jax import lax
from jax.experimental import pallas as pl
from jax.experimental.pallas import tpu as pltpu
import numpy as np

EPS = 1e-6


def llama_layer_kernel(x_ref, wqkv_ref, wo_ref, n1_ref, n2_ref,
                       w12_ref, w3_ref, cos_ref, sin_ref,
                       out_ref, kout_ref, vout_ref,
                       attn_slab, q_slab,
                       *, num_heads, head_dim, dim, hidden):
    f32 = jnp.float32
    bf16 = jnp.bfloat16
    half = head_dim // 2

    x = x_ref[0]                                        # (T, dim) f32
    T = x.shape[0]

    # ---------- RMSNorm 1 (f32, rsqrt on the EUP) ----------
    h = x * lax.rsqrt(jnp.mean(x * x, axis=-1, keepdims=True) + EPS) * n1_ref[...]
    h_bf = h.astype(bf16)

    # ---------- fused q/k/v projection (scale pre-folded into q columns) ----------
    qkv = jnp.dot(h_bf, wqkv_ref[...], preferred_element_type=f32)   # (T, 3*dim)

    # lane-dense bf16 "present" V cache: single full-width store.
    vout_ref[0] = qkv[:, 2 * dim:].astype(bf16)

    cos = cos_ref[...]                                  # (T, head_dim) = [cos | cos]
    sin = sin_ref[...]                                  # (T, head_dim) = [-sin | sin]

    def rope(t):                                        # (T, head_dim) f32
        # rotate-half via XLU roll; shift == half the rolled width -> direction agnostic.
        return t * cos + pltpu.roll(t, half, axis=1) * sin

    # ---------- RoPE for all heads, outside the score loop ----------
    # q -> bf16 scratch slab, post-RoPE k -> bf16 K-cache output (lane-dense layout).
    # TODO(synk): at num_heads >= 32 convert to lax.fori_loop + pl.ds(pl.multiple_of(...))
    # so live ranges stay bounded.
    for hd in range(num_heads):
        qsl = slice(hd * head_dim, (hd + 1) * head_dim)
        ksl = slice(dim + hd * head_dim, dim + (hd + 1) * head_dim)
        q_slab[:, qsl] = rope(qkv[:, qsl]).astype(bf16)
        kout_ref[0, :, qsl] = rope(qkv[:, ksl]).astype(bf16)

    # causal mask (every row has >=1 unmasked entry, so -inf is safe)
    row = lax.broadcasted_iota(jnp.int32, (T, T), 0)
    col = lax.broadcasted_iota(jnp.int32, (T, T), 1)
    causal = col <= row

    # ---------- per-head attention: scores + softmax + PV only ----------
    # attn_slab is fully overwritten (every head covers its 128-lane column slice),
    # so no zero-init is required.
    for hd in range(num_heads):
        sl = slice(hd * head_dim, (hd + 1) * head_dim)
        qh = q_slab[:, sl]                              # bf16
        kh = kout_ref[0, :, sl]                         # bf16 (post-RoPE K cache)
        s = lax.dot_general(qh, kh, (((1,), (1,)), ((), ())),
                            preferred_element_type=f32)  # (T, T) f32 accumulate
        s = jnp.where(causal, s, -jnp.inf)
        e = jnp.exp(s - jnp.max(s, axis=-1, keepdims=True))
        p = e * pl.reciprocal(jnp.sum(e, axis=-1, keepdims=True), approx=True)
        pv = jnp.dot(p.astype(bf16), vout_ref[0, :, sl],
                     preferred_element_type=f32)
        attn_slab[:, sl] = pv.astype(bf16)

    # single output projection over the assembled bf16 (T, dim) slab
    attn_out = jnp.dot(attn_slab[...], wo_ref[...], preferred_element_type=f32)
    x1 = x + attn_out                                   # residual 1 (f32)

    # ---------- RMSNorm 2 + SwiGLU MLP (fused w1|w2) ----------
    mnorm = x1 * lax.rsqrt(jnp.mean(x1 * x1, axis=-1, keepdims=True) + EPS) * n2_ref[...]
    gu = jnp.dot(mnorm.astype(bf16), w12_ref[...], preferred_element_type=f32)  # (T, 2*hidden)
    g = gu[:, :hidden]
    u = gu[:, hidden:]
    act = (g * jax.nn.sigmoid(g) * u).astype(bf16)      # gate in f32, cast once for MXU
    out_ref[0] = x1 + jnp.dot(act, w3_ref[...], preferred_element_type=f32)


def prepare_layer_params(params, num_heads, max_seq_len):
    """One-time parameter preparation (do NOT call per forward):
    bf16 casts, attention scale fold, q/k/v and w1/w2 fusion, RoPE tables."""
    dim = params["wq"].shape[0]
    head_dim = dim // num_heads
    assert dim % num_heads == 0 and head_dim % 2 == 0
    scale = 1.0 / math.sqrt(head_dim)
    bf16 = jnp.bfloat16

    # fused (dim, 3*dim) qkv weight; RoPE is linear so pre-scaling q is exact.
    wqkv = jnp.concatenate(
        [params["wq"] * scale, params["wk"], params["wv"]], axis=1).astype(bf16)
    w12 = jnp.concatenate([params["w1"], params["w2"]], axis=1).astype(bf16)

    # RoPE tables: rope(t) = t*[cos|cos] + roll(t, head_dim/2)*[-sin|sin]
    inv_freq = 1.0 / (10000.0 ** (jnp.arange(0, head_dim, 2, dtype=jnp.float32)
                                  / head_dim))
    freqs = jnp.arange(max_seq_len, dtype=jnp.float32)[:, None] * inv_freq[None, :]
    sin, cos = jnp.sin(freqs), jnp.cos(freqs)            # (S, head_dim // 2)
    cos_tab = jnp.concatenate([cos, cos], axis=-1)        # (S, head_dim)
    sin_tab = jnp.concatenate([-sin, sin], axis=-1)       # (S, head_dim)

    return {
        "wqkv": wqkv,
        "wo": params["wo"].astype(bf16),
        "w12": w12,
        "w3": params["w3"].astype(bf16),
        "n1": params["n1"].astype(jnp.float32).reshape(1, dim),
        "n2": params["n2"].astype(jnp.float32).reshape(1, dim),
        "cos": cos_tab,
        "sin": sin_tab,
    }


def _vmem_limit_bytes(T, dim, hidden, head_dim):
    """Explicit scoped-VMEM request with headroom, from the tiles actually allocated."""
    bf, f4 = 2, 4
    weights = (dim * 3 * dim + dim * dim + dim * 2 * hidden + hidden * dim) * bf  # Buffered(1)
    consts = 2 * dim * f4 + 2 * T * head_dim * f4                                 # norms + RoPE
    io = 2 * T * dim * f4                                                          # x (double-buffered)
    io += 2 * (T * dim * f4 + 2 * T * dim * bf)                                    # out f32 + bf16 K/V caches
    scratch = 2 * T * dim * bf                                                     # attn_slab + q_slab
    live = T * (3 * dim + 2 * hidden + 4 * dim) * f4 + 2 * T * T * f4              # rough f32 intermediates
    needed = weights + consts + io + scratch + live
    return int(min(2 * needed + (32 << 20), 100 << 20))


@functools.partial(jax.jit, static_argnames=("num_heads",))
def llama_layer_forward(x, prep, num_heads):
    B, T, dim = x.shape
    head_dim = dim // num_heads
    hidden = prep["w3"].shape[0]

    cos = prep["cos"][:T]
    sin = prep["sin"][:T]

    def const_spec(shape):
        nd = len(shape)
        # Grid-invariant operand: single-buffer it (no prefetch needed across steps).
        return pl.BlockSpec(shape, lambda b, _nd=nd: (0,) * _nd,
                            pipeline_mode=pl.Buffered(1))

    kernel = functools.partial(llama_layer_kernel, num_heads=num_heads,
                               head_dim=head_dim, dim=dim, hidden=hidden)

    out, k_cache, v_cache = pl.pallas_call(
        kernel,
        out_shape=(jax.ShapeDtypeStruct((B, T, dim), jnp.float32),
                   jax.ShapeDtypeStruct((B, T, dim), jnp.bfloat16),   # K cache (post-RoPE)
                   jax.ShapeDtypeStruct((B, T, dim), jnp.bfloat16)),  # V cache
        grid_spec=pltpu.PrefetchScalarGridSpec(
            num_scalar_prefetch=0,
            grid=(B,),
            in_specs=[
                pl.BlockSpec((1, T, dim), lambda b: (b, 0, 0)),
                const_spec((dim, 3 * dim)),
                const_spec((dim, dim)),
                const_spec((1, dim)), const_spec((1, dim)),
                const_spec((dim, 2 * hidden)),
                const_spec((hidden, dim)),
                const_spec((T, head_dim)), const_spec((T, head_dim)),
            ],
            out_specs=[
                pl.BlockSpec((1, T, dim), lambda b: (b, 0, 0)),
                pl.BlockSpec((1, T, dim), lambda b: (b, 0, 0)),
                pl.BlockSpec((1, T, dim), lambda b: (b, 0, 0)),
            ],
            scratch_shapes=[pltpu.VMEM((T, dim), jnp.bfloat16),   # attn output slab
                            pltpu.VMEM((T, dim), jnp.bfloat16)]), # post-RoPE q slab
        compiler_params=pltpu.CompilerParams(
            dimension_semantics=("parallel",),
            vmem_limit_bytes=_vmem_limit_bytes(T, dim, hidden, head_dim)),
    )(x, prep["wqkv"], prep["wo"], prep["n1"], prep["n2"],
      prep["w12"], prep["w3"], cos, sin)

    # Kernel emits lane-dense bf16 (B, T, dim) caches. The transpose below only exists to
    # match torch's (B, num_heads, T, head_dim) "present" layout.
    # TODO(synk): consumers that accept the (B, T, num_heads, head_dim) layout should skip it.
    k_out = k_cache.reshape(B, T, num_heads, head_dim).transpose(0, 2, 1, 3)
    v_out = v_cache.reshape(B, T, num_heads, head_dim).transpose(0, 2, 1, 3)
    return out, (k_out, v_out)


def reference_forward(x, params, num_heads):
    """Pure-JAX f32 mirror of the PyTorch Layer.forward (past_key_value=None, dropout=0)."""
    B, T, dim = x.shape
    head_dim = dim // num_heads

    def rmsnorm(t, w):
        rms = jnp.sqrt(jnp.mean(t ** 2, axis=-1, keepdims=True) + EPS)
        return t / rms * w.reshape(-1)

    h = rmsnorm(x, params["n1"])
    q = h @ params["wq"]
    k = h @ params["wk"]
    v = h @ params["wv"]

    def split(t):
        return t.reshape(B, T, num_heads, head_dim).transpose(0, 2, 1, 3)

    q, k, v = split(q), split(k), split(v)

    inv_freq = 1.0 / (10000.0 ** (jnp.arange(0, head_dim, 2, dtype=jnp.float32)
                                  / head_dim))
    freqs = jnp.arange(T, dtype=jnp.float32)[:, None] * inv_freq[None, :]
    sin = jnp.sin(freqs)[None, None]
    cos = jnp.cos(freqs)[None, None]

    def rope(t):
        t1, t2 = t[..., :head_dim // 2], t[..., head_dim // 2:]
        return jnp.concatenate([t1 * cos - t2 * sin, t1 * sin + t2 * cos], -1)

    q, k = rope(q), rope(k)
    scale = 1.0 / math.sqrt(head_dim)
    s = jnp.einsum('bhtd,bhsd->bhts', q, k) * scale
    mask = jnp.tril(jnp.ones((T, T)))
    s = jnp.where(mask == 0, -jnp.inf, s)
    attn = jax.nn.softmax(s, axis=-1)
    o = jnp.einsum('bhts,bhsd->bhtd', attn, v).transpose(0, 2, 1, 3).reshape(B, T, dim)
    x1 = x + o @ params["wo"]
    m = rmsnorm(x1, params["n2"])
    g = m @ params["w1"]
    u = m @ params["w2"]
    out = x1 + (jax.nn.silu(g) * u) @ params["w3"]
    return out, (k, v)


if __name__ == "__main__":
    # Small hardware-friendly shapes: head_dim = 128 (lane width), dim multiple of 128,
    # T multiple of 16 (bf16 sublane packing).
    B, T, dim, num_heads = 2, 16, 256, 2
    max_seq_len = 64
    hidden = dim * 4

    key = jax.random.PRNGKey(0)
    keys = jax.random.split(key, 8)
    # Weights stored as (in, out) so the kernel computes y = x @ W.
    params = {
        "wq": 0.05 * jax.random.normal(keys[0], (dim, dim), jnp.float32),
        "wk": 0.05 * jax.random.normal(keys[1], (dim, dim), jnp.float32),
        "wv": 0.05 * jax.random.normal(keys[2], (dim, dim), jnp.float32),
        "wo": 0.05 * jax.random.normal(keys[3], (dim, dim), jnp.float32),
        "w1": 0.05 * jax.random.normal(keys[4], (dim, hidden), jnp.float32),
        "w2": 0.05 * jax.random.normal(keys[5], (dim, hidden), jnp.float32),
        "w3": 0.05 * jax.random.normal(keys[6], (hidden, dim), jnp.float32),
        "n1": jnp.ones((dim,), jnp.float32),   # RMSNorm weights init to 1
        "n2": jnp.ones((dim,), jnp.float32),
    }
    x = jax.random.normal(keys[7], (B, T, dim), jnp.float32)

    # One-time parameter preparation (bf16 / fused / RoPE tables) -- not per call.
    prep = prepare_layer_params(params, num_heads, max_seq_len)

    out, (k_out, v_out) = llama_layer_forward(x, prep, num_heads=num_heads)
    jax.block_until_ready((out, k_out, v_out))

    # f32 reference; tolerance covers bf16 MXU operands, bf16 KV cache, approx reciprocal.
    ref_out, (ref_k, ref_v) = reference_forward(x, params, num_heads)
    np.testing.assert_allclose(np.asarray(out), np.asarray(ref_out),
                               rtol=5e-2, atol=5e-2)
    np.testing.assert_allclose(np.asarray(k_out.astype(jnp.float32)), np.asarray(ref_k),
                               rtol=5e-2, atol=5e-2)
    np.testing.assert_allclose(np.asarray(v_out.astype(jnp.float32)), np.asarray(ref_v),
                               rtol=5e-2, atol=5e-2)

    print("KERNEL_OK")
</pallas_src>

<mosaic_0001>
module attributes {stable_mosaic.version = 11 : i64} {
  func.func @llama_layer_kernel(%arg0: i32, %arg1: memref<1x16x256xf32, #tpu.memory_space<vmem>>, %arg2: memref<256x768xbf16, #tpu.memory_space<vmem>>, %arg3: memref<256x256xbf16, #tpu.memory_space<vmem>>, %arg4: memref<1x256xf32, #tpu.memory_space<vmem>>, %arg5: memref<1x256xf32, #tpu.memory_space<vmem>>, %arg6: memref<256x2048xbf16, #tpu.memory_space<vmem>>, %arg7: memref<1024x256xbf16, #tpu.memory_space<vmem>>, %arg8: memref<16x128xf32, #tpu.memory_space<vmem>>, %arg9: memref<16x128xf32, #tpu.memory_space<vmem>>, %arg10: memref<1x16x256xf32, #tpu.memory_space<vmem>>, %arg11: memref<1x16x256xbf16, #tpu.memory_space<vmem>>, %arg12: memref<1x16x256xbf16, #tpu.memory_space<vmem>>, %arg13: memref<16x256xbf16, #tpu.memory_space<vmem>>, %arg14: memref<16x256xbf16, #tpu.memory_space<vmem>>) attributes {dimension_semantics = [#tpu.dimension_semantics<parallel>], iteration_bounds = array<i64: 2>, scalar_prefetch = 0 : i64, scratch_operands = 2 : i64, tpu.core_type = #tpu.core_type<tc>, window_params = [{transform_indices = @transform_0, window_bounds = array<i64: 1, 16, 256>}, {pipeline_mode = #tpu.pipeline_mode<synchronous>, transform_indices = @transform_1, window_bounds = array<i64: 256, 768>}, {pipeline_mode = #tpu.pipeline_mode<synchronous>, transform_indices = @transform_2, window_bounds = array<i64: 256, 256>}, {pipeline_mode = #tpu.pipeline_mode<synchronous>, transform_indices = @transform_3, window_bounds = array<i64: 1, 256>}, {pipeline_mode = #tpu.pipeline_mode<synchronous>, transform_indices = @transform_4, window_bounds = array<i64: 1, 256>}, {pipeline_mode = #tpu.pipeline_mode<synchronous>, transform_indices = @transform_5, window_bounds = array<i64: 256, 2048>}, {pipeline_mode = #tpu.pipeline_mode<synchronous>, transform_indices = @transform_6, window_bounds = array<i64: 1024, 256>}, {pipeline_mode = #tpu.pipeline_mode<synchronous>, transform_indices = @transform_7, window_bounds = array<i64: 16, 128>}, {pipeline_mode = #tpu.pipeline_mode<synchronous>, transform_indices = @transform_8, window_bounds = array<i64: 16, 128>}, {transform_indices = @transform_9, window_bounds = array<i64: 1, 16, 256>}, {transform_indices = @transform_10, window_bounds = array<i64: 1, 16, 256>}, {transform_indices = @transform_11, window_bounds = array<i64: 1, 16, 256>}]} {
    %c0 = arith.constant 0 : index
    %c0_0 = arith.constant 0 : index
    %c0_1 = arith.constant 0 : index
    %0 = vector.load %arg1[%c0, %c0_0, %c0_1] : memref<1x16x256xf32, #tpu.memory_space<vmem>>, vector<1x16x256xf32>
    %1 = vector.shape_cast %0 : vector<1x16x256xf32> to vector<16x256xf32>
    %2 = arith.mulf %1, %1 : vector<16x256xf32>
    %cst = arith.constant dense<0.000000e+00> : vector<16xf32>
    %3 = vector.multi_reduction <add>, %2, %cst [1] : vector<16x256xf32> to vector<16xf32>
    %4 = vector.shape_cast %3 : vector<16xf32> to vector<16x1xf32>
    %cst_2 = arith.constant 2.560000e+02 : f32
    %5 = vector.broadcast %cst_2 : f32 to vector<16x1xf32>
    %6 = arith.divf %4, %5 : vector<16x1xf32>
    %cst_3 = arith.constant 9.99999997E-7 : f32
    %7 = vector.broadcast %cst_3 : f32 to vector<16x1xf32>
    %8 = arith.addf %6, %7 : vector<16x1xf32>
    %9 = math.rsqrt %8 : vector<16x1xf32>
    %10 = vector.broadcast %9 : vector<16x1xf32> to vector<16x256xf32>
    %11 = arith.mulf %1, %10 : vector<16x256xf32>
    %c0_4 = arith.constant 0 : index
    %c0_5 = arith.constant 0 : index
    %12 = vector.load %arg4[%c0_4, %c0_5] : memref<1x256xf32, #tpu.memory_space<vmem>>, vector<1x256xf32>
    %13 = vector.broadcast %12 : vector<1x256xf32> to vector<16x256xf32>
    %14 = arith.mulf %11, %13 : vector<16x256xf32>
    %15 = arith.truncf %14 : vector<16x256xf32> to vector<16x256xbf16>
    %c0_6 = arith.constant 0 : index
    %c0_7 = arith.constant 0 : index
    %16 = vector.load %arg2[%c0_6, %c0_7] : memref<256x768xbf16, #tpu.memory_space<vmem>>, vector<256x768xbf16>
    %cst_8 = arith.constant dense<0.000000e+00> : vector<16x768xf32>
    %17 = tpu.matmul %15, %16, %cst_8 {dimension_numbers = #tpu.dot_dimension_numbers<[1], [0], [0], [1], [0, 0, 1, 1], [], []>} : vector<16x256xbf16>, vector<256x768xbf16>, vector<16x768xf32> -> vector<16x768xf32>
    %18 = vector.extract_strided_slice %17 {offsets = [0, 512], sizes = [16, 256], strides = [1, 1]} : vector<16x768xf32> to vector<16x256xf32>
    %19 = arith.truncf %18 : vector<16x256xf32> to vector<16x256xbf16>
    %c0_9 = arith.constant 0 : index
    %c0_10 = arith.constant 0 : index
    %c0_11 = arith.constant 0 : index
    %20 = vector.load %arg12[%c0_9, %c0_10, %c0_11] : memref<1x16x256xbf16, #tpu.memory_space<vmem>>, vector<1x16x256xbf16>
    %21 = vector.shape_cast %20 : vector<1x16x256xbf16> to vector<16x256xbf16>
    %22 = vector.shape_cast %19 : vector<16x256xbf16> to vector<1x16x256xbf16>
    tpu.vector_store %arg12[%c0_9, %c0_10, %c0_11], %22 {strides = array<i32>} : memref<1x16x256xbf16, #tpu.memory_space<vmem>>, vector<1x16x256xbf16>,
    %c0_12 = arith.constant 0 : index
    %c0_13 = arith.constant 0 : index
    %23 = vector.load %arg8[%c0_12, %c0_13] : memref<16x128xf32, #tpu.memory_space<vmem>>, vector<16x128xf32>
    %c0_14 = arith.constant 0 : index
    %c0_15 = arith.constant 0 : index
    %24 = vector.load %arg9[%c0_14, %c0_15] : memref<16x128xf32, #tpu.memory_space<vmem>>, vector<16x128xf32>
    %25 = vector.extract_strided_slice %17 {offsets = [0, 0], sizes = [16, 128], strides = [1, 1]} : vector<16x768xf32> to vector<16x128xf32>
    %26 = arith.mulf %25, %23 : vector<16x128xf32>
    %c64_i32 = arith.constant 64 : i32
    %27 = tpu.dynamic_rotate %25 by %c64_i32 dim 1 : vector<16x128xf32>, i32 -> vector<16x128xf32>
    %28 = arith.mulf %27, %24 : vector<16x128xf32>
    %29 = arith.addf %26, %28 : vector<16x128xf32>
    %30 = arith.truncf %29 : vector<16x128xf32> to vector<16x128xbf16>
    %c0_16 = arith.constant 0 : index
    %c0_17 = arith.constant 0 : index
    %31 = vector.load %arg14[%c0_16, %c0_17] : memref<16x256xbf16, #tpu.memory_space<vmem>>, vector<16x128xbf16>
    tpu.vector_store %arg14[%c0_16, %c0_17], %30 {strides = array<i32>} : memref<16x256xbf16, #tpu.memory_space<vmem>>, vector<16x128xbf16>,
    %32 = vector.extract_strided_slice %17 {offsets = [0, 256], sizes = [16, 128], strides = [1, 1]} : vector<16x768xf32> to vector<16x128xf32>
    %33 = arith.mulf %32, %23 : vector<16x128xf32>
    %c64_i32_18 = arith.constant 64 : i32
    %34 = tpu.dynamic_rotate %32 by %c64_i32_18 dim 1 : vector<16x128xf32>, i32 -> vector<16x128xf32>
    %35 = arith.mulf %34, %24 : vector<16x128xf32>
    %36 = arith.addf %33, %35 : vector<16x128xf32>
    %37 = arith.truncf %36 : vector<16x128xf32> to vector<16x128xbf16>
    %c0_19 = arith.constant 0 : index
    %c0_20 = arith.constant 0 : index
    %c0_21 = arith.constant 0 : index
    %38 = vector.load %arg11[%c0_19, %c0_20, %c0_21] : memref<1x16x256xbf16, #tpu.memory_space<vmem>>, vector<1x16x128xbf16>
    %39 = vector.shape_cast %38 : vector<1x16x128xbf16> to vector<16x128xbf16>
    %40 = vector.shape_cast %37 : vector<16x128xbf16> to vector<1x16x128xbf16>
    tpu.vector_store %arg11[%c0_19, %c0_20, %c0_21], %40 {strides = array<i32>} : memref<1x16x256xbf16, #tpu.memory_space<vmem>>, vector<1x16x128xbf16>,
    %41 = vector.extract_strided_slice %17 {offsets = [0, 128], sizes = [16, 128], strides = [1, 1]} : vector<16x768xf32> to vector<16x128xf32>
    %42 = arith.mulf %41, %23 : vector<16x128xf32>
    %c64_i32_22 = arith.constant 64 : i32
    %43 = tpu.dynamic_rotate %41 by %c64_i32_22 dim 1 : vector<16x128xf32>, i32 -> vector<16x128xf32>
    %44 = arith.mulf %43, %24 : vector<16x128xf32>
    %45 = arith.addf %42, %44 : vector<16x128xf32>
    %46 = arith.truncf %45 : vector<16x128xf32> to vector<16x128xbf16>
    %c0_23 = arith.constant 0 : index
    %c128 = arith.constant 128 : index
    %47 = vector.load %arg14[%c0_23, %c128] : memref<16x256xbf16, #tpu.memory_space<vmem>>, vector<16x128xbf16>
    tpu.vector_store %arg14[%c0_23, %c128], %46 {strides = array<i32>} : memref<16x256xbf16, #tpu.memory_space<vmem>>, vector<16x128xbf16>,
    %48 = vector.extract_strided_slice %17 {offsets = [0, 384], sizes = [16, 128], strides = [1, 1]} : vector<16x768xf32> to vector<16x128xf32>
    %49 = arith.mulf %48, %23 : vector<16x128xf32>
    %c64_i32_24 = arith.constant 64 : i32
    %50 = tpu.dynamic_rotate %48 by %c64_i32_24 dim 1 : vector<16x128xf32>, i32 -> vector<16x128xf32>
    %51 = arith.mulf %50, %24 : vector<16x128xf32>
    %52 = arith.addf %49, %51 : vector<16x128xf32>
    %53 = arith.truncf %52 : vector<16x128xf32> to vector<16x128xbf16>
    %c0_25 = arith.constant 0 : index
    %c0_26 = arith.constant 0 : index
    %c128_27 = arith.constant 128 : index
    %54 = vector.load %arg11[%c0_25, %c0_26, %c128_27] : memref<1x16x256xbf16, #tpu.memory_space<vmem>>, vector<1x16x128xbf16>
    %55 = vector.shape_cast %54 : vector<1x16x128xbf16> to vector<16x128xbf16>
    %56 = vector.shape_cast %53 : vector<16x128xbf16> to vector<1x16x128xbf16>
    tpu.vector_store %arg11[%c0_25, %c0_26, %c128_27], %56 {strides = array<i32>} : memref<1x16x256xbf16, #tpu.memory_space<vmem>>, vector<1x16x128xbf16>,
    %57 = tpu.iota {dimensions = array<i32: 0>} : vector<16x16xi32>
    %58 = tpu.iota {dimensions = array<i32: 1>} : vector<16x16xi32>
    %59 = arith.cmpi sle, %58, %57 : vector<16x16xi32>
    %c0_28 = arith.constant 0 : index
    %c0_29 = arith.constant 0 : index
    %60 = vector.load %arg14[%c0_28, %c0_29] : memref<16x256xbf16, #tpu.memory_space<vmem>>, vector<16x128xbf16>
    %c0_30 = arith.constant 0 : index
    %c0_31 = arith.constant 0 : index
    %c0_32 = arith.constant 0 : index
    %61 = vector.load %arg11[%c0_30, %c0_31, %c0_32] : memref<1x16x256xbf16, #tpu.memory_space<vmem>>, vector<1x16x128xbf16>
    %62 = vector.shape_cast %61 : vector<1x16x128xbf16> to vector<16x128xbf16>
    %cst_33 = arith.constant dense<0.000000e+00> : vector<16x16xf32>
    %63 = tpu.matmul %60, %62, %cst_33 {dimension_numbers = #tpu.dot_dimension_numbers<[1], [1], [0], [0], [0, 0, 1, 0], [], []>} : vector<16x128xbf16>, vector<16x128xbf16>, vector<16x16xf32> -> vector<16x16xf32>
    %cst_34 = arith.constant 0xFF800000 : f32
    %64 = vector.broadcast %cst_34 : f32 to vector<16x16xf32>
    %65 = arith.select %59, %63, %64 : vector<16x16xi1>, vector<16x16xf32>
    %cst_35 = arith.constant dense<0xFF800000> : vector<16xf32>
    %66 = vector.multi_reduction <maximumf>, %65, %cst_35 [1] : vector<16x16xf32> to vector<16xf32>
    %67 = vector.shape_cast %66 : vector<16xf32> to vector<16x1xf32>
    %68 = vector.broadcast %67 : vector<16x1xf32> to vector<16x16xf32>
    %69 = arith.subf %65, %68 : vector<16x16xf32>
    %70 = math.exp %69 : vector<16x16xf32>
    %cst_36 = arith.constant dense<0.000000e+00> : vector<16xf32>
    %71 = vector.multi_reduction <add>, %70, %cst_36 [1] : vector<16x16xf32> to vector<16xf32>
    %72 = vector.shape_cast %71 : vector<16xf32> to vector<16x1xf32>
    %73 = tpu.reciprocal %72 {approx = true} : vector<16x1xf32> -> vector<16x1xf32>
    %74 = vector.broadcast %73 : vector<16x1xf32> to vector<16x16xf32>
    %75 = arith.mulf %70, %74 : vector<16x16xf32>
    %76 = arith.truncf %75 : vector<16x16xf32> to vector<16x16xbf16>
    %c0_37 = arith.constant 0 : index
    %c0_38 = arith.constant 0 : index
    %c0_39 = arith.constant 0 : index
    %77 = vector.load %arg12[%c0_37, %c0_38, %c0_39] : memref<1x16x256xbf16, #tpu.memory_space<vmem>>, vector<1x16x128xbf16>
    %78 = vector.shape_cast %77 : vector<1x16x128xbf16> to vector<16x128xbf16>
    %cst_40 = arith.constant dense<0.000000e+00> : vector<16x128xf32>
    %79 = tpu.matmul %76, %78, %cst_40 {dimension_numbers = #tpu.dot_dimension_numbers<[1], [0], [0], [1], [0, 0, 1, 1], [], []>} : vector<16x16xbf16>, vector<16x128xbf16>, vector<16x128xf32> -> vector<16x128xf32>
    %80 = arith.truncf %79 : vector<16x128xf32> to vector<16x128xbf16>
    %c0_41 = arith.constant 0 : index
    %c0_42 = arith.constant 0 : index
    %81 = vector.load %arg13[%c0_41, %c0_42] : memref<16x256xbf16, #tpu.memory_space<vmem>>, vector<16x128xbf16>
    tpu.vector_store %arg13[%c0_41, %c0_42], %80 {strides = array<i32>} : memref<16x256xbf16, #tpu.memory_space<vmem>>, vector<16x128xbf16>,
    %c0_43 = arith.constant 0 : index
    %c128_44 = arith.constant 128 : index
    %82 = vector.load %arg14[%c0_43, %c128_44] : memref<16x256xbf16, #tpu.memory_space<vmem>>, vector<16x128xbf16>
    %c0_45 = arith.constant 0 : index
    %c0_46 = arith.constant 0 : index
    %c128_47 = arith.constant 128 : index
    %83 = vector.load %arg11[%c0_45, %c0_46, %c128_47] : memref<1x16x256xbf16, #tpu.memory_space<vmem>>, vector<1x16x128xbf16>
    %84 = vector.shape_cast %83 : vector<1x16x128xbf16> to vector<16x128xbf16>
    %cst_48 = arith.constant dense<0.000000e+00> : vector<16x16xf32>
    %85 = tpu.matmul %82, %84, %cst_48 {dimension_numbers = #tpu.dot_dimension_numbers<[1], [1], [0], [0], [0, 0, 1, 0], [], []>} : vector<16x128xbf16>, vector<16x128xbf16>, vector<16x16xf32> -> vector<16x16xf32>
    %cst_49 = arith.constant 0xFF800000 : f32
    %86 = vector.broadcast %cst_49 : f32 to vector<16x16xf32>
    %87 = arith.select %59, %85, %86 : vector<16x16xi1>, vector<16x16xf32>
    %cst_50 = arith.constant dense<0xFF800000> : vector<16xf32>
    %88 = vector.multi_reduction <maximumf>, %87, %cst_50 [1] : vector<16x16xf32> to vector<16xf32>
    %89 = vector.shape_cast %88 : vector<16xf32> to vector<16x1xf32>
    %90 = vector.broadcast %89 : vector<16x1xf32> to vector<16x16xf32>
    %91 = arith.subf %87, %90 : vector<16x16xf32>
    %92 = math.exp %91 : vector<16x16xf32>
    %cst_51 = arith.constant dense<0.000000e+00> : vector<16xf32>
    %93 = vector.multi_reduction <add>, %92, %cst_51 [1] : vector<16x16xf32> to vector<16xf32>
    %94 = vector.shape_cast %93 : vector<16xf32> to vector<16x1xf32>
    %95 = tpu.reciprocal %94 {approx = true} : vector<16x1xf32> -> vector<16x1xf32>
    %96 = vector.broadcast %95 : vector<16x1xf32> to vector<16x16xf32>
    %97 = arith.mulf %92, %96 : vector<16x16xf32>
    %98 = arith.truncf %97 : vector<16x16xf32> to vector<16x16xbf16>
    %c0_52 = arith.constant 0 : index
    %c0_53 = arith.constant 0 : index
    %c128_54 = arith.constant 128 : index
    %99 = vector.load %arg12[%c0_52, %c0_53, %c128_54] : memref<1x16x256xbf16, #tpu.memory_space<vmem>>, vector<1x16x128xbf16>
    %100 = vector.shape_cast %99 : vector<1x16x128xbf16> to vector<16x128xbf16>
    %cst_55 = arith.constant dense<0.000000e+00> : vector<16x128xf32>
    %101 = tpu.matmul %98, %100, %cst_55 {dimension_numbers = #tpu.dot_dimension_numbers<[1], [0], [0], [1], [0, 0, 1, 1], [], []>} : vector<16x16xbf16>, vector<16x128xbf16>, vector<16x128xf32> -> vector<16x128xf32>
    %102 = arith.truncf %101 : vector<16x128xf32> to vector<16x128xbf16>
    %c0_56 = arith.constant 0 : index
    %c128_57 = arith.constant 128 : index
    %103 = vector.load %arg13[%c0_56, %c128_57] : memref<16x256xbf16, #tpu.memory_space<vmem>>, vector<16x128xbf16>
    tpu.vector_store %arg13[%c0_56, %c128_57], %102 {strides = array<i32>} : memref<16x256xbf16, #tpu.memory_space<vmem>>, vector<16x128xbf16>,
    %c0_58 = arith.constant 0 : index
    %c0_59 = arith.constant 0 : index
    %104 = vector.load %arg13[%c0_58, %c0_59] : memref<16x256xbf16, #tpu.memory_space<vmem>>, vector<16x256xbf16>
    %c0_60 = arith.constant 0 : index
    %c0_61 = arith.constant 0 : index
    %105 = vector.load %arg3[%c0_60, %c0_61] : memref<256x256xbf16, #tpu.memory_space<vmem>>, vector<256x256xbf16>
    %cst_62 = arith.constant dense<0.000000e+00> : vector<16x256xf32>
    %106 = tpu.matmul %104, %105, %cst_62 {dimension_numbers = #tpu.dot_dimension_numbers<[1], [0], [0], [1], [0, 0, 1, 1], [], []>} : vector<16x256xbf16>, vector<256x256xbf16>, vector<16x256xf32> -> vector<16x256xf32>
    %107 = arith.addf %1, %106 : vector<16x256xf32>
    %108 = arith.mulf %107, %107 : vector<16x256xf32>
    %cst_63 = arith.constant dense<0.000000e+00> : vector<16xf32>
    %109 = vector.multi_reduction <add>, %108, %cst_63 [1] : vector<16x256xf32> to vector<16xf32>
    %110 = vector.shape_cast %109 : vector<16xf32> to vector<16x1xf32>
    %cst_64 = arith.constant 2.560000e+02 : f32
    %111 = vector.broadcast %cst_64 : f32 to vector<16x1xf32>
    %112 = arith.divf %110, %111 : vector<16x1xf32>
    %cst_65 = arith.constant 9.99999997E-7 : f32
    %113 = vector.broadcast %cst_65 : f32 to vector<16x1xf32>
    %114 = arith.addf %112, %113 : vector<16x1xf32>
    %115 = math.rsqrt %114 : vector<16x1xf32>
    %116 = vector.broadcast %115 : vector<16x1xf32> to vector<16x256xf32>
    %117 = arith.mulf %107, %116 : vector<16x256xf32>
    %c0_66 = arith.constant 0 : index
    %c0_67 = arith.constant 0 : index
    %118 = vector.load %arg5[%c0_66, %c0_67] : memref<1x256xf32, #tpu.memory_space<vmem>>, vector<1x256xf32>
    %119 = vector.broadcast %118 : vector<1x256xf32> to vector<16x256xf32>
    %120 = arith.mulf %117, %119 : vector<16x256xf32>
    %121 = arith.truncf %120 : vector<16x256xf32> to vector<16x256xbf16>
    %c0_68 = arith.constant 0 : index
    %c0_69 = arith.constant 0 : index
    %122 = vector.load %arg6[%c0_68, %c0_69] : memref<256x2048xbf16, #tpu.memory_space<vmem>>, vector<256x2048xbf16>
    %cst_70 = arith.constant dense<0.000000e+00> : vector<16x2048xf32>
    %123 = tpu.matmul %121, %122, %cst_70 {dimension_numbers = #tpu.dot_dimension_numbers<[1], [0], [0], [1], [0, 0, 1, 1], [], []>} : vector<16x256xbf16>, vector<256x2048xbf16>, vector<16x2048xf32> -> vector<16x2048xf32>
    %124 = vector.extract_strided_slice %123 {offsets = [0, 0], sizes = [16, 1024], strides = [1, 1]} : vector<16x2048xf32> to vector<16x1024xf32>
    %125 = vector.extract_strided_slice %123 {offsets = [0, 1024], sizes = [16, 1024], strides = [1, 1]} : vector<16x2048xf32> to vector<16x1024xf32>
    %126 = arith.negf %124 : vector<16x1024xf32>
    %127 = math.exp %126 : vector<16x1024xf32>
    %cst_71 = arith.constant 1.000000e+00 : f32
    %128 = vector.broadcast %cst_71 : f32 to vector<16x1024xf32>
    %129 = arith.addf %128, %127 : vector<16x1024xf32>
    %130 = arith.divf %128, %129 : vector<16x1024xf32>
    %131 = arith.mulf %124, %130 : vector<16x1024xf32>
    %132 = arith.mulf %131, %125 : vector<16x1024xf32>
    %133 = arith.truncf %132 : vector<16x1024xf32> to vector<16x1024xbf16>
    %c0_72 = arith.constant 0 : index
    %c0_73 = arith.constant 0 : index
    %134 = vector.load %arg7[%c0_72, %c0_73] : memref<1024x256xbf16, #tpu.memory_space<vmem>>, vector<1024x256xbf16>
    %cst_74 = arith.constant dense<0.000000e+00> : vector<16x256xf32>
    %135 = tpu.matmul %133, %134, %cst_74 {dimension_numbers = #tpu.dot_dimension_numbers<[1], [0], [0], [1], [0, 0, 1, 1], [], []>} : vector<16x1024xbf16>, vector<1024x256xbf16>, vector<16x256xf32> -> vector<16x256xf32>
    %136 = arith.addf %107, %135 : vector<16x256xf32>
    %c0_75 = arith.constant 0 : index
    %c0_76 = arith.constant 0 : index
    %c0_77 = arith.constant 0 : index
    %137 = vector.load %arg10[%c0_75, %c0_76, %c0_77] : memref<1x16x256xf32, #tpu.memory_space<vmem>>, vector<1x16x256xf32>
    %138 = vector.shape_cast %137 : vector<1x16x256xf32> to vector<16x256xf32>
    %139 = vector.shape_cast %136 : vector<16x256xf32> to vector<1x16x256xf32>
    tpu.vector_store %arg10[%c0_75, %c0_76, %c0_77], %139 {strides = array<i32>} : memref<1x16x256xf32, #tpu.memory_space<vmem>>, vector<1x16x256xf32>,
    return
  }
  func.func @transform_0(%arg0: i32) -> (i32, i32, i32) {
    %c0_i32 = arith.constant 0 : i32
    %c0_i32_0 = arith.constant 0 : i32
    %c0_i32_1 = arith.constant 0 : i32
    return %arg0, %c0_i32, %c0_i32_0 : i32, i32, i32
  }
  func.func @transform_1(%arg0: i32) -> (i32, i32) {
    %c0_i32 = arith.constant 0 : i32
    %c0_i32_0 = arith.constant 0 : i32
    %c0_i32_1 = arith.constant 0 : i32
    return %c0_i32, %c0_i32_0 : i32, i32
  }
  func.func @transform_2(%arg0: i32) -> (i32, i32) {
    %c0_i32 = arith.constant 0 : i32
    %c0_i32_0 = arith.constant 0 : i32
    %c0_i32_1 = arith.constant 0 : i32
    return %c0_i32, %c0_i32_0 : i32, i32
  }
  func.func @transform_3(%arg0: i32) -> (i32, i32) {
    %c0_i32 = arith.constant 0 : i32
    %c0_i32_0 = arith.constant 0 : i32
    %c0_i32_1 = arith.constant 0 : i32
    return %c0_i32, %c0_i32_0 : i32, i32
  }
  func.func @transform_4(%arg0: i32) -> (i32, i32) {
    %c0_i32 = arith.constant 0 : i32
    %c0_i32_0 = arith.constant 0 : i32
    %c0_i32_1 = arith.constant 0 : i32
    return %c0_i32, %c0_i32_0 : i32, i32
  }
  func.func @transform_5(%arg0: i32) -> (i32, i32) {
    %c0_i32 = arith.constant 0 : i32
    %c0_i32_0 = arith.constant 0 : i32
    %c0_i32_1 = arith.constant 0 : i32
    return %c0_i32, %c0_i32_0 : i32, i32
  }
  func.func @transform_6(%arg0: i32) -> (i32, i32) {
    %c0_i32 = arith.constant 0 : i32
    %c0_i32_0 = arith.constant 0 : i32
    %c0_i32_1 = arith.constant 0 : i32
    return %c0_i32, %c0_i32_0 : i32, i32
  }
  func.func @transform_7(%arg0: i32) -> (i32, i32) {
    %c0_i32 = arith.constant 0 : i32
    %c0_i32_0 = arith.constant 0 : i32
    %c0_i32_1 = arith.constant 0 : i32
    return %c0_i32, %c0_i32_0 : i32, i32
  }
  func.func @transform_8(%arg0: i32) -> (i32, i32) {
    %c0_i32 = arith.constant 0 : i32
    %c0_i32_0 = arith.constant 0 : i32
    %c0_i32_1 = arith.constant 0 : i32
    return %c0_i32, %c0_i32_0 : i32, i32
  }
  func.func @transform_9(%arg0: i32) -> (i32, i32, i32) {
    %c0_i32 = arith.constant 0 : i32
    %c0_i32_0 = arith.constant 0 : i32
    %c0_i32_1 = arith.constant 0 : i32
    return %arg0, %c0_i32, %c0_i32_0 : i32, i32, i32
  }
  func.func @transform_10(%arg0: i32) -> (i32, i32, i32) {
    %c0_i32 = arith.constant 0 : i32
    %c0_i32_0 = arith.constant 0 : i32
    %c0_i32_1 = arith.constant 0 : i32
    return %arg0, %c0_i32, %c0_i32_0 : i32, i32, i32
  }
  func.func @transform_11(%arg0: i32) -> (i32, i32, i32) {
    %c0_i32 = arith.constant 0 : i32
    %c0_i32_0 = arith.constant 0 : i32
    %c0_i32_1 = arith.constant 0 : i32
    return %arg0, %c0_i32, %c0_i32_0 : i32, i32, i32
  }
}

</mosaic_0001>

<bundles_post_ra>
// kernel: llama_layer_forward.1
= control target key start
LH: loop header
LB: loop body
LE: loop exit
PB: predicated region body
PF: predicated region fallthrough
CT: control target
= control target key end

     0   :  { %s9510_s0 = inlined_call_operand.hbm [shape: f32[2,16,256], index: 0, kind: input, shape index: {}]   ;;  %s9511_s1 = inlined_call_operand.hbm [shape: bf16[256,768], index: 1, kind: input, shape index: {}]   ;;  %s9512_s2 = inlined_call_operand.hbm [shape: bf16[256,256], index: 2, kind: input, shape index: {}]   ;;  %s9513_s3 = inlined_call_operand.vmem [shape: f32[1,256], index: 3, kind: input, shape index: {}]   ;;  %s9514_s4 = inlined_call_operand.vmem [shape: f32[1,256], index: 4, kind: input, shape index: {}]   ;;  %s9515_s5 = inlined_call_operand.hbm [shape: bf16[256,2048], index: 5, kind: input, shape index: {}]   ;;  %s9516_s6 = inlined_call_operand.hbm [shape: bf16[1024,256], index: 6, kind: input, shape index: {}]   ;;  %s9517_s7 = inlined_call_operand.vmem [shape: f32[16,128], index: 7, kind: input, shape index: {}]   ;;  %s9518_s8 = inlined_call_operand.vmem [shape: f32[16,128], index: 8, kind: input, shape index: {}]   ;;  %s9519_s9 = inlined_call_operand.hbm [shape: f32[2,16,256], index: 9, kind: output, shape index: {0}]   ;;  %s9520_s10 = inlined_call_operand.vmem [shape: bf16[2,16,256], index: 10, kind: output, shape index: {1}]   ;;  %s9521_s11 = inlined_call_operand.vmem [shape: bf16[2,16,256], index: 11, kind: output, shape index: {2}]  }
   0x1   :  { %9524 = sst [smem:[#allocation20_spill]] %s9511_s1 }
   0x2   :  { %9525 = sst [smem:[#allocation21_spill]] %s9512_s2 }
   0x3   :  { %9526 = sst [smem:[#allocation22_spill]] %s9515_s5 }
   0x4   :  { %17 = vsyncpa [#allocation5], 0 }
   0x5   :  { %19 = vsyncpa [#allocation5 + $0x1], 0 }
   0x6   :  { %20 = vsyncpa [#allocation8], 0 }
   0x7   :  { %21 = vsyncpa [#allocation11], 0 }
   0x8   :  { %22 = vsyncpa [#allocation6], 0 }
   0x9   :  { %24 = vsyncpa [#allocation6 + $0x1], 0  ;;  %s8522_s17 = smov 0   ;;  %s8524_s18 = smov 0  }
   0xa   :  { %s8526_s19 = smov 0   ;;  %s8528_s20 = smov 0  }
   0xb LB: > { %9527 = sst [smem:[#allocation18_spill]] %s8432_s17  ;;  %s8543_s21 = sadd.s32 4294967295, %s8444_s20   ;;  %s8444_s20 = sphi %s8528_s20, %s9594_s20   ;;  %s8440_s19 = sphi %s8526_s19, %s9593_s19   ;;  %s8436_s18 = sphi %s8524_s18, %s9592_s18   ;;  %s8432_s17 = sphi %s8522_s17, %s9591_s17  }
   0xc   : > { %s5379_s22 = sadd.s32 4294967294, %s8444_s20   ;;  %p50_p0 = scmp.ne.s32.totalorder %s8436_s18, %s8432_s17 }
   0xd   : > { %p51_p1 = scmp.eq.s32.totalorder %s8543_s21, 0  ;;  %p242_p2 = scmp.eq.s32.totalorder %s8543_s21, 1 }
   0xe   : > { %p248_p3 = scmp.eq.s32.totalorder %s5379_s22, 1  ;;  %p5380_p5 = scmp.ge.s32.totalorder %s8444_s20, 1 }
   0xf   : > { %p8552_p4 = por %p51_p1, %p50_p0  ;;  %p307_p7 = scmp.lt.s32.totalorder %s8444_s20, 3 }
  0x10   : > { %p8557_p6 = por %p248_p3, %p50_p0  ;;  %s9531_s1 = sld [smem:[#allocation20_spill]] }
  0x11   : > { %p8565_p8 = pnand %p5380_p5, %p307_p7  ;;  %s8446_s29 = smov [#allocation7]  }
  0x12   : > { %s9529_s24 = scalar_select %p8557_p6, 1, 0 }
  0x13   : > { %p8047_p9 = pneg %p8565_p8  ;;  %s320_s30 = sshll.u32 %s8446_s29, 4  ;;  %s321_s30 = int_to_ptr.vmem [resolvable:$true] %s320_s30 }
  0x14   : > { %9530 = sst [smem:[#allocation19_spill]] %s9529_s24  ;;  %s8447_s16 = smov 384  }
  0x15   : > { %p8573_p10 = pnand %p8047_p9, %p51_p1  ;;  %s9534_s5 = sld [smem:[#allocation22_spill]] }
  0x16   : > { %s318_s27 = sshll.u32 %s9531_s1, 4  ;;  %s8448_s22 = smov 24   ;;  %s319_s27 = int_to_ptr.hbm [resolvable:$true] %s318_s27 }
  0x17   : > { %8050 = dma.hbm_to_vmem [thread:$0]  (!%p8573_p10), %s319_s27, 12288, %s321_s30, [#allocation8], %s8447_s16, %s8447_s16, %s8448_s22  }
  0x18   : > { %s8449_s25 = smov [#allocation10]   ;;  %s8450_s29 = smov 1024  }
  0x19   : > { %s354_s26 = sshll.u32 %s8449_s25, 4  ;;  %s8451_s1 = smov 64   ;;  %s355_s26 = int_to_ptr.vmem [resolvable:$true] %s354_s26 }
  0x1a   : > { %s9535_s2 = sld [smem:[#allocation21_spill]]  ;;  %s8452_s14 = smov [#allocation9]  }
  0x1b   : > { %s352_s15 = sshll.u32 %s9534_s5, 4  ;;  %s334_s27 = sshll.u32 %s8452_s14, 4  ;;  %s353_s15 = int_to_ptr.hbm [resolvable:$true] %s352_s15  ;;  %s335_s27 = int_to_ptr.vmem [resolvable:$true] %s334_s27 }
  0x1c   : > { %8056 = dma.hbm_to_vmem [thread:$0]  (!%p8573_p10), %s353_s15, 32768, %s355_s26, [#allocation11], %s8450_s29, %s8450_s29, %s8451_s1  }
  0x1d   : > { %s366_s22 = sshll.u32 %s9516_s6, 4  ;;  %s8453_s1 = smov 128   ;;  %s367_s22 = int_to_ptr.hbm [resolvable:$true] %s366_s22 }
  0x1e   : > { %s8454_s15 = smov 8   ;;  %s8455_s17 = smov [#allocation12]  }
  0x1f   : > { %s368_s24 = sshll.u32 %s8455_s17, 4  ;;  %s8596_s25 = sadd.s32 1, %s8444_s20   ;;  %s369_s24 = int_to_ptr.vmem [resolvable:$true] %s368_s24 }
  0x20   : > { %s332_s13 = sshll.u32 %s9535_s2, 4  ;;  %s37_s26 = sadd.s32 1, %s8440_s19  ;;  %s333_s13 = int_to_ptr.hbm [resolvable:$true] %s332_s13 }
  0x21   : > { %8053 = dma.hbm_to_vmem [thread:$0]  (!%p8573_p10), %s333_s13, 4096, %s335_s27, [#allocation8], %s8453_s1, %s8453_s1, %s8454_s15  }
  0x22   : > { %8059 = dma.hbm_to_vmem [thread:$0]  (!%p8573_p10), %s367_s22, 16384, %s369_s24, [#allocation11], %s8453_s1, %s8453_s1, %s8454_s15  }
  0x23   : > { %s34_s29 = ssub.s32 %s8444_s20, %s8596_s25  ;;  %p44_p12 = scmp.ne.s32.totalorder %s8440_s19, %s8436_s18 }
  0x24   : > { %p35_p13 = scmp.eq.s32.totalorder %s34_s29, 0  ;;  %p45_p0 = scmp.eq.s32.totalorder %s8444_s20, 0 }
  0x25   : > { %p8606_p3 = por %p242_p2, %p44_p12  ;;  %p8072_p5 = scmp.lt.s32.totalorder %s8444_s20, 2 }
  0x26   : > { %s8612_s13 = scalar_select %p35_p13, %s8440_s19, %s37_s26  }
  0x27   : > { %p46_p7 = por %p45_p0, %p44_p12  ;;  %s388_s27 = sand.u32 1, %s8440_s19  }
  0x28   : > { %s5386_s12 = sshll.u32 %s388_s27, 5  ;;  %s7503_s30 = sshll.u32 %s8444_s20, 5 }
  0x29   : > { %s397_s1 = scalar_lea.hbm %s9510_s0, %s7503_s30  ;;  %s392_s15 = scalar_lea.vmem [#allocation4], %s5386_s12 }
  0x2a   : > { %s400_s17 = sshll.u32 %s392_s15, 4  ;;  %s398_s24 = sshll.u32 %s397_s1, 4  ;;  %s401_s17 = int_to_ptr.vmem [resolvable:$true] %s400_s17  ;;  %s399_s24 = int_to_ptr.hbm [resolvable:$true] %s398_s24 }
  0x2b   : > { %p8619_p2 = pnand %p8072_p5, %p46_p7  ;;  %s389_s26 = scalar_lea.sflag [#allocation5], %s388_s27 }
  0x2c   : > { %s8340_s2 = sshra.s32 %s399_s24, 4  ;;  %s8347_s16 = scalar_lea.hbm %s9510_s0, 64  ;;  %s8341_s2 = int_to_ptr.hbm [resolvable:$true] %s8340_s2 }
  0x2d   : > { %s8342_s5 = scalar_lea.hbm %s8341_s2, 32  ;;  %p8344_p10 = pneg %p8619_p2 }
  0x2e   : > { %p8343_p9 = scmp.ne.s32.totalorder %s8341_s2, %s8342_s5  ;;  %p8348_p0 = scmp.lt.s32.totalorder %s8341_s2, %s9510_s0 }
  0x2f   : > { %p8349_p5 = scmp.lt.s32.totalorder %s8347_s16, %s8342_s5 }
  0x30   : > { %p8345_p12 = pnand %p8344_p10, %p8343_p9 }
  0x31   : > { %p8350_p7 = por %p8349_p5, %p8348_p0 }
  0x32   : > { %p8346_p13 = pneg %p8345_p12 }
  0x34   : > { %p8351_p11 = pnand %p8350_p7, %p8346_p13 }
  0x36   : > { %8354 = shalt.err (!%p8351_p11)
}
  0x37   : > { %s8456_s27 = smov 256   ;;  %s8457_s15 = smov 16  }
  0x38   : > { %8063 = dma.hbm_to_vmem [thread:$0]  (!%p8619_p2), %s399_s24, 512, %s401_s17, %s389_s26, %s8456_s27, %s8456_s27, %s8457_s15  }
  0x39   : > { %412 = sbr.rel (%p8565_p8) target bundleno = 1883 (0x75b), region = 56  ;;  %s8636_s30 = sand.u32 (!%p8565_p8), 1, %s8436_s18  }
  0x3a   : > { %s5390_s2 = sshll.u32 (!%p8565_p8), %s8636_s30, 5  ;;  %s415_s5 = scalar_lea.sflag (!%p8565_p8), [#allocation5], %s8636_s30 }
  0x3b   : > { %s8642_s12 = scalar_lea.vmem (!%p8565_p8), [#allocation4], %s5390_s2 }
  0x3e   : > { %8415 = dma.done.wait (%p8552_p4), %s415_s5, 512  }
  0x3f   : > { %8417 = vsyncadd (%p8552_p4), %s415_s5, 4294966784 }
  0x40   : > { %8419 = dma.done.wait (%p51_p1), [#allocation8], 16384  }
  0x41   : > { %8421 = vsyncadd (%p51_p1), [#allocation8], 4294950912 }
  0x42   : > { %8423 = dma.done.wait (%p51_p1), [#allocation11], 49152  }
  0x43   : > { %8425 = vsyncadd (%p51_p1), [#allocation11], 4294918144  ;;  %v8657_v0 = vld [vmem:[%s8642_s12] sm:$0xff]  ;;  %v8660_v1 = vld [vmem:[%s8642_s12 + $0x8] sm:$0xff]  ;;  %s8459_s17 = smov 64   ;;  %p488_p1 = scmp.lt.s32.totalorder %s8543_s21, 1 }
  0x44   : > { %v8663_v2 = vld [vmem:[%s8642_s12 + $0x10] sm:$0xff]  ;;  %v503_v3 = vmul.f32 %v8657_v0, %v8657_v0  ;;  %v504_v4 = vmul.f32 %v8660_v1, %v8660_v1  ;;  %v8670_v5 = vld [vmem:[%s8642_s12 + $0x18] sm:$0xff]  ;;  %v7551_v7 = vld [vmem:[#allocation7 + $0x164] sm:$0xf0]  ;;  %vm1407_vm8 = vcmask 130048  }
  0x45   : > { %v5570_v6 = vld [vmem:[#allocation7 + $0x150] sm:$0xf]  ;;  %v7599_v10 = vld [vmem:[#allocation7 + $0x2e4] sm:$0xf0]  ;;  %v7548_v11 = vld [vmem:[#allocation7 + $0x154] sm:$0xf]  ;;  %v505_v22 = vmul.f32 %v8663_v2, %v8663_v2  ;;  %v506_v23 = vmul.f32 %v8670_v5, %v8670_v5 }
  0x46   : > { %v5571_v8 = vor.u32 %v7551_v7, %v5570_v6  ;;  %v5762_v9 = vld [vmem:[#allocation7 + $0x2d0] sm:$0xf]  ;;  %v507_v12 = vadd.f32 %v504_v4, %v503_v3  ;;  %v5572_v14 = vld [vmem:[#allocation7 + $0x168] sm:$0xf0]  ;;  %v7596_v15 = vld [vmem:[#allocation7 + $0x2d4] sm:$0xf] }
  0x47   : > { %v5763_v13 = vor.u32 %v7599_v10, %v5762_v9  ;;  %v5764_v16 = vld [vmem:[#allocation7 + $0x2e8] sm:$0xf0]  ;;  %v5575_v17 = vor.u32 %v7548_v11, %v5572_v14  ;;  %v5546_v19 = vld [vmem:[#allocation7 + $0x120] sm:$0xf]  ;;  %v7545_v20 = vld [vmem:[#allocation7 + $0x134] sm:$0xf0]  ;;  %v510_v41 = vadd.f32 %v506_v23, %v505_v22 }
  0x48   : > { %1136 = vmatpush.bf16.msra.mxu0 %v5571_v8  ;;  %v5767_v18 = vor.u32 %v7596_v15, %v5764_v16  ;;  %v5738_v21 = vld [vmem:[#allocation7 + $0x2a0] sm:$0xf]  ;;  %508 = vadd.xlane.f32.xlu0 %v507_v12  ;;  %v5547_v24 = vor.u32 %v7545_v20, %v5546_v19  ;;  %v7593_v25 = vld [vmem:[#allocation7 + $0x2b4] sm:$0xf0]  ;;  %v7542_v26 = vld [vmem:[#allocation7 + $0x124] sm:$0xf] }
  0x49   : > { %1150 = vmatpush.bf16.msra.mxu1 %v5763_v13  ;;  %v5548_v27 = vld [vmem:[#allocation7 + $0x138] sm:$0xf0]  ;;  %1164 = vmatpush.bf16.msra.mxu2 %v5575_v17  ;;  %v5739_v28 = vor.u32 %v7593_v25, %v5738_v21  ;;  %v7590_v30 = vld [vmem:[#allocation7 + $0x2a4] sm:$0xf]  ;;  %v5522_v32 = vld [vmem:[#allocation7 + $0xf0] sm:$0xf] }
  0x4a   : > { %1178 = vmatpush.bf16.msra.mxu3 %v5767_v18  ;;  %v5551_v29 = vor.u32 %v7542_v26, %v5548_v27  ;;  %v5740_v31 = vld [vmem:[#allocation7 + $0x2b8] sm:$0xf0]  ;;  %v7539_v34 = vld [vmem:[#allocation7 + $0x104] sm:$0xf0]  ;;  %v5714_v35 = vld [vmem:[#allocation7 + $0x270] sm:$0xf] }
  0x4b   : > { %v5743_v33 = vor.u32 %v7590_v30, %v5740_v31  ;;  %v7587_v36 = vld [vmem:[#allocation7 + $0x284] sm:$0xf0]  ;;  %v5523_v37 = vor.u32 %v7539_v34, %v5522_v32  ;;  %v7536_v38 = vld [vmem:[#allocation7 + $0xf4] sm:$0xf]  ;;  %v5524_v39 = vld [vmem:[#allocation7 + $0x108] sm:$0xf0] }
  0x4c   : > { %1137 = vmatpush.bf16.msra.mxu0 %v5547_v24  ;;  %v7584_v40 = vld [vmem:[#allocation7 + $0x274] sm:$0xf]  ;;  %v5715_v42 = vor.u32 %v7587_v36, %v5714_v35  ;;  %v5716_v43 = vld [vmem:[#allocation7 + $0x288] sm:$0xf0]  ;;  %v5498_v44 = vld [vmem:[#allocation7 + $0xc0] sm:$0xf]  ;;  %v5527_v46 = vor.u32 %v7536_v38, %v5524_v39 }
  0x4d   : > { %1151 = vmatpush.bf16.msra.mxu1 %v5739_v28  ;;  %v7533_v45 = vld [vmem:[#allocation7 + $0xd4] sm:$0xf0]  ;;  %1165 = vmatpush.bf16.msra.mxu2 %v5551_v29  ;;  %v5719_v47 = vor.u32 %v7584_v40, %v5716_v43  ;;  %v5690_v48 = vld [vmem:[#allocation7 + $0x240] sm:$0xf]  ;;  %v7530_v50 = vld [vmem:[#allocation7 + $0xc4] sm:$0xf] }
  0x4e   : > { %1179 = vmatpush.bf16.msra.mxu3 %v5743_v33  ;;  %v7581_v49 = vld [vmem:[#allocation7 + $0x254] sm:$0xf0]  ;;  %v5500_v51 = vld [vmem:[#allocation7 + $0xd8] sm:$0xf0]  ;;  %v7578_v52 = vld [vmem:[#allocation7 + $0x244] sm:$0xf]  ;;  %v5499_v54 = vor.u32 %v7533_v45, %v5498_v44 }
  0x4f   : > { %v5692_v53 = vld [vmem:[#allocation7 + $0x258] sm:$0xf0]  ;;  %v5691_v55 = vor.u32 %v7581_v49, %v5690_v48  ;;  %v5474_v56 = vld [vmem:[#allocation7 + $0x90] sm:$0xf]  ;;  %v7527_v57 = vld [vmem:[#allocation7 + $0xa4] sm:$0xf0]  ;;  %v5503_v58 = vor.u32 %v7530_v50, %v5500_v51 }
  0x50   : > { %1138 = vmatpush.bf16.msra.mxu0 %v5523_v37  ;;  %511 = vadd.xlane.f32.xlu0 %v510_v41  ;;  %v5695_v59 = vor.u32 %v7578_v52, %v5692_v53  ;;  %v5666_v60 = vld [vmem:[#allocation7 + $0x210] sm:$0xf]  ;;  %v7575_v61 = vld [vmem:[#allocation7 + $0x224] sm:$0xf0]  ;;  %v7524_v62 = vld [vmem:[#allocation7 + $0x94] sm:$0xf]  ;;  %v5475_v6 = vor.u32 %v7527_v57, %v5474_v56 }
  0x51   : > { %1152 = vmatpush.bf16.msra.mxu1 %v5715_v42  ;;  %1166 = vmatpush.bf16.msra.mxu2 %v5527_v46  ;;  %v5476_v63 = vld [vmem:[#allocation7 + $0xa8] sm:$0xf0]  ;;  %v7572_v3 = vld [vmem:[#allocation7 + $0x214] sm:$0xf]  ;;  %v5667_v7 = vor.u32 %v7575_v61, %v5666_v60  ;;  %v5450_v8 = vld [vmem:[#allocation7 + $0x60] sm:$0xf] }
  0x52   : > { %1180 = vmatpush.bf16.msra.mxu3 %v5719_v47  ;;  %v5668_v4 = vld [vmem:[#allocation7 + $0x228] sm:$0xf0]  ;;  %v7521_v9 = vld [vmem:[#allocation7 + $0x74] sm:$0xf0]  ;;  %v5479_v10 = vor.u32 %v7524_v62, %v5476_v63  ;;  %v5642_v12 = vld [vmem:[#allocation7 + $0x1e0] sm:$0xf] }
  0x53   : > { %v5671_v11 = vor.u32 %v7572_v3, %v5668_v4  ;;  %v7569_v13 = vld [vmem:[#allocation7 + $0x1f4] sm:$0xf0]  ;;  %v7518_v14 = vld [vmem:[#allocation7 + $0x64] sm:$0xf]  ;;  %v5452_v15 = vld [vmem:[#allocation7 + $0x78] sm:$0xf0]  ;;  %v5451_v18 = vor.u32 %v7521_v9, %v5450_v8 }
  0x54   : > { %1139 = vmatpush.bf16.msra.mxu0 %v5499_v54  ;;  %v7566_v16 = vld [vmem:[#allocation7 + $0x1e4] sm:$0xf]  ;;  %v5644_v17 = vld [vmem:[#allocation7 + $0x1f8] sm:$0xf0]  ;;  %v5643_v19 = vor.u32 %v7569_v13, %v5642_v12  ;;  %v5455_v20 = vor.u32 %v7518_v14, %v5452_v15  ;;  %v5426_v22 = vld [vmem:[#allocation7 + $0x30] sm:$0xf] }
  0x55   : > { %1153 = vmatpush.bf16.msra.mxu1 %v5691_v55  ;;  %1167 = vmatpush.bf16.msra.mxu2 %v5503_v58  ;;  %v5647_v21 = vor.u32 %v7566_v16, %v5644_v17  ;;  %v7515_v23 = vld [vmem:[#allocation7 + $0x44] sm:$0xf0]  ;;  %v5618_v24 = vld [vmem:[#allocation7 + $0x1b0] sm:$0xf]  ;;  %v7512_v27 = vld [vmem:[#allocation7 + $0x34] sm:$0xf] }
  0x56   : > { %1181 = vmatpush.bf16.msra.mxu3 %v5695_v59  ;;  %v5427_v25 = vor.u32 %v7515_v23, %v5426_v22  ;;  %v7563_v26 = vld [vmem:[#allocation7 + $0x1c4] sm:$0xf0]  ;;  %v5428_v28 = vld [vmem:[#allocation7 + $0x48] sm:$0xf0]  ;;  %v7560_v31 = vld [vmem:[#allocation7 + $0x1b4] sm:$0xf] }
  0x57   : > { %v5619_v29 = vor.u32 %v7563_v26, %v5618_v24  ;;  %v5431_v30 = vor.u32 %v7512_v27, %v5428_v28  ;;  %v5620_v32 = vld [vmem:[#allocation7 + $0x1c8] sm:$0xf0]  ;;  %v8458_v33 = vmov 256.0   ;;  %v5402_v35 = vld [vmem:[#allocation7] sm:$0xf]  ;;  %s8727_s24 = scalar_select %p488_p1, %s8543_s21, 1 }
  0x58   : > { %1140 = vmatpush.bf16.msra.mxu0 %v5475_v6  ;;  %8126 = vrcp.f32 %v8458_v33  ;;  %v5623_v34 = vor.u32 %v7560_v31, %v5620_v32  ;;  %v7509_v36 = vld [vmem:[#allocation7 + $0x14] sm:$0xf0]  ;;  %v5594_v37 = vld [vmem:[#allocation7 + $0x180] sm:$0xf]  ;;  %v7506_v40 = vld [vmem:[#allocation7 + $0x4] sm:$0xf] }
  0x59   : > { %1154 = vmatpush.bf16.msra.mxu1 %v5667_v7  ;;  %1168 = vmatpush.bf16.msra.mxu2 %v5479_v10  ;;  %v5403_v38 = vor.u32 %v7509_v36, %v5402_v35  ;;  %v7557_v39 = vld [vmem:[#allocation7 + $0x194] sm:$0xf0]  ;;  %v5404_v41 = vld [vmem:[#allocation7 + $0x18] sm:$0xf0]  ;;  %v7554_v44 = vld [vmem:[#allocation7 + $0x184] sm:$0xf] }
  0x5a   : > { %1182 = vmatpush.bf16.msra.mxu3 %v5671_v11  ;;  %v5595_v42 = vor.u32 %v7557_v39, %v5594_v37  ;;  %v5407_v43 = vor.u32 %v7506_v40, %v5404_v41  ;;  %v5596_v45 = vld [vmem:[#allocation7 + $0x198] sm:$0xf0]  ;;  %v5578_v46 = vld [vmem:[#allocation7 + $0x158] sm:$0xf]  ;;  %v7552_v48 = vld [vmem:[#allocation7 + $0x16c] sm:$0xf0] }
  0x5b   : > { %v5599_v47 = vor.u32 %v7554_v44, %v5596_v45  ;;  %v5770_v49 = vld [vmem:[#allocation7 + $0x2d8] sm:$0xf]  ;;  %v7600_v50 = vld [vmem:[#allocation7 + $0x2ec] sm:$0xf0]  ;;  %v5579_v51 = vor.u32 %v7552_v48, %v5578_v46  ;;  %v7549_v53 = vld [vmem:[#allocation7 + $0x15c] sm:$0xf] }
  0x5c   : > { %1141 = vmatpush.bf16.msra.mxu0 %v5451_v18  ;;  %v5771_v52 = vor.u32 %v7600_v50, %v5770_v49  ;;  %v5580_v54 = vld [vmem:[#allocation7 + $0x170] sm:$0xf0]  ;;  %v7597_v55 = vld [vmem:[#allocation7 + $0x2dc] sm:$0xf]  ;;  %v5554_v59 = vld [vmem:[#allocation7 + $0x128] sm:$0xf] }
  0x5d   : > { %1155 = vmatpush.bf16.msra.mxu1 %v5643_v19  ;;  %1169 = vmatpush.bf16.msra.mxu2 %v5455_v20  ;;  %v5583_v57 = vor.u32 %v7549_v53, %v5580_v54  ;;  %v5772_v58 = vld [vmem:[#allocation7 + $0x2f0] sm:$0xf0]  ;;  %v7546_v60 = vld [vmem:[#allocation7 + $0x13c] sm:$0xf0]  ;;  %v5746_v63 = vld [vmem:[#allocation7 + $0x2a8] sm:$0xf] }
  0x5e   : > { %1183 = vmatpush.bf16.msra.mxu3 %v5647_v21  ;;  %v8676_v56 = vpop.eup %8126  ;;  %v5775_v61 = vor.u32 %v7597_v55, %v5772_v58  ;;  %v5555_v62 = vor.u32 %v7546_v60, %v5554_v59  ;;  %v7594_v3 = vld [vmem:[#allocation7 + $0x2bc] sm:$0xf0]  ;;  %v7543_v4 = vld [vmem:[#allocation7 + $0x12c] sm:$0xf]  ;;  %v5556_v7 = vld [vmem:[#allocation7 + $0x140] sm:$0xf0] }
  0x5f   : > { %v5747_v6 = vor.u32 %v7594_v3, %v5746_v63  ;;  %v7591_v8 = vld [vmem:[#allocation7 + $0x2ac] sm:$0xf]  ;;  %v5748_v9 = vld [vmem:[#allocation7 + $0x2c0] sm:$0xf0]  ;;  %v514_v10 = vmul.f32 256.0, %v8676_v56  ;;  %v5559_v11 = vor.u32 %v7543_v4, %v5556_v7  ;;  %vm518_vm0 = vweird.f32 %v8676_v56  ;;  %s7504_s29 = sshll.u32 %s8727_s24, 4 }
  0x60   : > { %1142 = vmatpush.bf16.msra.mxu0 %v5427_v25  ;;  %v5751_v12 = vor.u32 %v7591_v8, %v5748_v9  ;;  %v5530_v13 = vld [vmem:[#allocation7 + $0xf8] sm:$0xf]  ;;  %v7540_v14 = vld [vmem:[#allocation7 + $0x10c] sm:$0xf0]  ;;  %v7537_v18 = vld [vmem:[#allocation7 + $0xfc] sm:$0xf]  ;;  %s497_s22 = scalar_lea.vmem %s9521_s11, %s7504_s29  ;;  %s8761_s1 = scalar_lea.vmem %s9520_s10, %s7504_s29 }
  0x61   : > { %1156 = vmatpush.bf16.msra.mxu1 %v5619_v29  ;;  %1170 = vmatpush.bf16.msra.mxu2 %v5431_v30  ;;  %v5722_v15 = vld [vmem:[#allocation7 + $0x278] sm:$0xf]  ;;  %v5531_v16 = vor.u32 %v7540_v14, %v5530_v13  ;;  %v7588_v17 = vld [vmem:[#allocation7 + $0x28c] sm:$0xf0]  ;;  %v5532_v19 = vld [vmem:[#allocation7 + $0x110] sm:$0xf0] }
  0x62   : > { %1184 = vmatpush.bf16.msra.mxu3 %v5623_v34  ;;  %v5723_v20 = vor.u32 %v7588_v17, %v5722_v15  ;;  %v5535_v21 = vor.u32 %v7537_v18, %v5532_v19  ;;  %v7585_v22 = vld [vmem:[#allocation7 + $0x27c] sm:$0xf]  ;;  %v5724_v23 = vld [vmem:[#allocation7 + $0x290] sm:$0xf0]  ;;  %v515_v24 = vsub.f32 1.0, %v514_v10  ;;  %s9467_s29 = scalar_lea.vmem [#allocation13], %s5390_s2 }
  0x63   : > { %v5727_v25 = vor.u32 %v7585_v22, %v5724_v23  ;;  %v5506_v26 = vld [vmem:[#allocation7 + $0xc8] sm:$0xf]  ;;  %v7534_v27 = vld [vmem:[#allocation7 + $0xdc] sm:$0xf0]  ;;  %v7531_v31 = vld [vmem:[#allocation7 + $0xcc] sm:$0xf] }
  0x64   : > { %1143 = vmatpush.bf16.msra.mxu0 %v5403_v38  ;;  %v5698_v28 = vld [vmem:[#allocation7 + $0x248] sm:$0xf]  ;;  %v5507_v29 = vor.u32 %v7534_v27, %v5506_v26  ;;  %v7582_v30 = vld [vmem:[#allocation7 + $0x25c] sm:$0xf0]  ;;  %v5508_v32 = vld [vmem:[#allocation7 + $0xe0] sm:$0xf0]  ;;  %v516_v38 = vmul.f32 %v8676_v56, %v515_v24 }
  0x65   : > { %1157 = vmatpush.bf16.msra.mxu1 %v5595_v42  ;;  %1171 = vmatpush.bf16.msra.mxu2 %v5407_v43  ;;  %v5699_v33 = vor.u32 %v7582_v30, %v5698_v28  ;;  %v5511_v34 = vor.u32 %v7531_v31, %v5508_v32  ;;  %v7579_v35 = vld [vmem:[#allocation7 + $0x24c] sm:$0xf]  ;;  %v5700_v36 = vld [vmem:[#allocation7 + $0x260] sm:$0xf0]  ;;  %v5482_v39 = vld [vmem:[#allocation7 + $0x98] sm:$0xf] }
  0x66   : > { %1185 = vmatpush.bf16.msra.mxu3 %v5599_v47  ;;  %v5703_v37 = vor.u32 %v7579_v35, %v5700_v36  ;;  %v7528_v40 = vld [vmem:[#allocation7 + $0xac] sm:$0xf0]  ;;  %v5674_v41 = vld [vmem:[#allocation7 + $0x218] sm:$0xf]  ;;  %v7525_v44 = vld [vmem:[#allocation7 + $0x9c] sm:$0xf] }
  0x67   : > { %v5483_v42 = vor.u32 %v7528_v40, %v5482_v39  ;;  %v7576_v43 = vld [vmem:[#allocation7 + $0x22c] sm:$0xf0]  ;;  %v5484_v45 = vld [vmem:[#allocation7 + $0xb0] sm:$0xf0]  ;;  %v7573_v48 = vld [vmem:[#allocation7 + $0x21c] sm:$0xf] }
  0x68   : > { %1192 = vmatpush.bf16.msrb.mxu0 %v5579_v51  ;;  %v5675_v46 = vor.u32 %v7576_v43, %v5674_v41  ;;  %v5487_v47 = vor.u32 %v7525_v44, %v5484_v45  ;;  %v5676_v49 = vld [vmem:[#allocation7 + $0x230] sm:$0xf0]  ;;  %v517_v51 = vadd.f32 %v8676_v56, %v516_v38  ;;  %v7522_v53 = vld [vmem:[#allocation7 + $0x7c] sm:$0xf0]  ;;  %v5650_v54 = vld [vmem:[#allocation7 + $0x1e8] sm:$0xf] }
  0x69   : > { %1206 = vmatpush.bf16.msrb.mxu1 %v5771_v52  ;;  %1220 = vmatpush.bf16.msrb.mxu2 %v5583_v57  ;;  %v5679_v50 = vor.u32 %v7573_v48, %v5676_v49  ;;  %v5458_v52 = vld [vmem:[#allocation7 + $0x68] sm:$0xf]  ;;  %v7570_v57 = vld [vmem:[#allocation7 + $0x1fc] sm:$0xf0]  ;;  %v7519_v58 = vld [vmem:[#allocation7 + $0x6c] sm:$0xf] }
  0x6a   : > { %1234 = vmatpush.bf16.msrb.mxu3 %v5775_v61  ;;  %v5459_v55 = vor.u32 %v7522_v53, %v5458_v52  ;;  %v5460_v59 = vld [vmem:[#allocation7 + $0x80] sm:$0xf0]  ;;  %v5651_v60 = vor.u32 %v7570_v57, %v5650_v54  ;;  %v8683_v4 = vsel %vm518_vm0, %v8676_v56, %v517_v51  ;;  %v7516_v7 = vld [vmem:[#allocation7 + $0x4c] sm:$0xf0]  ;;  %v5626_v8 = vld [vmem:[#allocation7 + $0x1b8] sm:$0xf] }
  0x6b   : > { %v5463_v61 = vor.u32 %v7519_v58, %v5460_v59  ;;  %v5652_v63 = vld [vmem:[#allocation7 + $0x200] sm:$0xf0]  ;;  %v7564_v10 = vld [vmem:[#allocation7 + $0x1cc] sm:$0xf0]  ;;  %v5628_v17 = vld [vmem:[#allocation7 + $0x1d0] sm:$0xf0] }
  0x6c   : > { %1193 = vmatpush.bf16.msrb.mxu0 %v5555_v62  ;;  %v7567_v62 = vld [vmem:[#allocation7 + $0x1ec] sm:$0xf]  ;;  %v5627_v14 = vor.u32 %v7564_v10, %v5626_v8  ;;  %v5602_v23 = vld [vmem:[#allocation7 + $0x188] sm:$0xf]  ;;  %v7558_v24 = vld [vmem:[#allocation7 + $0x19c] sm:$0xf0] }
  0x6d   : > { %1207 = vmatpush.bf16.msrb.mxu1 %v5747_v6  ;;  %1221 = vmatpush.bf16.msrb.mxu2 %v5559_v11  ;;  %v5655_v3 = vor.u32 %v7567_v62, %v5652_v63  ;;  %v5434_v6 = vld [vmem:[#allocation7 + $0x38] sm:$0xf]  ;;  %v7513_v11 = vld [vmem:[#allocation7 + $0x3c] sm:$0xf]  ;;  %v5603_v26 = vor.u32 %v7558_v24, %v5602_v23  ;;  %v5412_v27 = vld [vmem:[#allocation7 + $0x20] sm:$0xf0] }
  0x6e   : > { %1235 = vmatpush.bf16.msrb.mxu3 %v5751_v12  ;;  %v5435_v9 = vor.u32 %v7516_v7, %v5434_v6  ;;  %v5436_v12 = vld [vmem:[#allocation7 + $0x50] sm:$0xf0]  ;;  %v7555_v28 = vld [vmem:[#allocation7 + $0x18c] sm:$0xf]  ;;  %v548_v45 = vld [vmem:[%s9513_s3] sm:$0x3] }
  0x6f   : > { %v5439_v15 = vor.u32 %v7513_v11, %v5436_v12  ;;  %v550_v49 = vperm.slane %v548_v45, 0  ;;  %v5586_v57 = vld [vmem:[#allocation7 + $0x160] sm:$0xf]  ;;  %v7553_v58 = vld [vmem:[#allocation7 + $0x174] sm:$0xf0]  ;;  %s8026_s2 = sshll.u32 %s8543_s21, 5 }
  0x70   : > { %1194 = vmatpush.bf16.msrb.mxu0 %v5531_v16  ;;  %v7561_v16 = vld [vmem:[#allocation7 + $0x1bc] sm:$0xf]  ;;  %v5778_v59 = vld [vmem:[#allocation7 + $0x2e0] sm:$0xf]  ;;  %v7598_v8 = vld [vmem:[#allocation7 + $0x2e4] sm:$0xf]  ;;  %v5587_v10 = vor.u32 %v7553_v58, %v5586_v57  ;;  %s5208_s5 = scalar_lea.hbm %s9519_s9, %s8026_s2 }
  0x71   : > { %1208 = vmatpush.bf16.msrb.mxu1 %v5723_v20  ;;  %1222 = vmatpush.bf16.msrb.mxu2 %v5535_v21  ;;  %v5631_v56 = vor.u32 %v7561_v16, %v5628_v17  ;;  %v5410_v20 = vld [vmem:[#allocation7 + $0x8] sm:$0xf]  ;;  %v7510_v21 = vld [vmem:[#allocation7 + $0x1c] sm:$0xf0]  ;;  %v5588_v7 = vld [vmem:[#allocation7 + $0x178] sm:$0xf0] }
  0x72   : > { %1236 = vmatpush.bf16.msrb.mxu3 %v5727_v25  ;;  %v5411_v22 = vor.u32 %v7510_v21, %v5410_v20  ;;  %v7507_v25 = vld [vmem:[#allocation7 + $0xc] sm:$0xf]  ;;  %v5562_v11 = vld [vmem:[#allocation7 + $0x130] sm:$0xf]  ;;  %v7544_v16 = vld [vmem:[#allocation7 + $0x134] sm:$0xf] }
  0x73   : > { %v5415_v30 = vor.u32 %v7507_v25, %v5412_v27  ;;  %v5564_v17 = vld [vmem:[#allocation7 + $0x148] sm:$0xf0]  ;;  %v5538_v21 = vld [vmem:[#allocation7 + $0x100] sm:$0xf]  ;;  %v7538_v27 = vld [vmem:[#allocation7 + $0x104] sm:$0xf] }
  0x74   : > { %1195 = vmatpush.bf16.msrb.mxu0 %v5507_v29  ;;  %v5604_v29 = vld [vmem:[#allocation7 + $0x1a0] sm:$0xf0]  ;;  %v5567_v23 = vor.u32 %v7544_v16, %v5564_v17  ;;  %v5730_v25 = vld [vmem:[#allocation7 + $0x280] sm:$0xf]  ;;  %v5466_v58 = vld [vmem:[#allocation7 + $0x70] sm:$0xf] }
  0x75   : > { %1209 = vmatpush.bf16.msrb.mxu1 %v5699_v33  ;;  %1223 = vmatpush.bf16.msrb.mxu2 %v5511_v34  ;;  %v5607_v31 = vor.u32 %v7555_v28, %v5604_v29  ;;  %v5540_v28 = vld [vmem:[#allocation7 + $0x118] sm:$0xf0]  ;;  %v7586_v29 = vld [vmem:[#allocation7 + $0x284] sm:$0xf]  ;;  %s5209_s23 = sshll.u32 %s9467_s29, 4  ;;  %s5211_s28 = sshll.u32 %s5208_s5, 4  ;;  %s5210_s23 = int_to_ptr.vmem [resolvable:$true] %s5209_s23  ;;  %s5212_s28 = int_to_ptr.hbm [resolvable:$true] %s5211_s28 }
  0x76   : > { %1237 = vmatpush.bf16.msrb.mxu3 %v5703_v37  ;;  %v5444_v16 = vld [vmem:[#allocation7 + $0x58] sm:$0xf0]  ;;  %v7562_v17 = vld [vmem:[#allocation7 + $0x1c4] sm:$0xf]  ;;  %s5187_s21 = scalar_lea.sflag [#allocation6], %s8636_s30 }
  0x78   : > { %1196 = vmatpush.bf16.msrb.mxu0 %v5483_v42 }
  0x79   : > { %1210 = vmatpush.bf16.msrb.mxu1 %v5675_v46  ;;  %1224 = vmatpush.bf16.msrb.mxu2 %v5487_v47 }
  0x7a   : > { %1238 = vmatpush.bf16.msrb.mxu3 %v5679_v50  ;;  %v551_v50 = vperm.slane %v548_v45, 1  ;;  %v5490_v45 = vld [vmem:[#allocation7 + $0xa0] sm:$0xf] }
  0x7c   : > { %1197 = vmatpush.bf16.msrb.mxu0 %v5459_v55 }
  0x7d   : > { %1211 = vmatpush.bf16.msrb.mxu1 %v5651_v60  ;;  %1225 = vmatpush.bf16.msrb.mxu2 %v5463_v61  ;;  %v7601_v60 = vld [vmem:[#allocation7 + $0x2f4] sm:$0xf0]  ;;  %v7550_v61 = vld [vmem:[#allocation7 + $0x164] sm:$0xf] }
  0x7e   : > { %1239 = vmatpush.bf16.msrb.mxu3 %v5655_v3  ;;  %v5591_v12 = vor.u32 %v7550_v61, %v5588_v7  ;;  %v7568_v7 = vld [vmem:[#allocation7 + $0x1f4] sm:$0xf] }
  0x80   : > { %1198 = vmatpush.bf16.msrb.mxu0 %v5435_v9 }
  0x81   : > { %1212 = vmatpush.bf16.msrb.mxu1 %v5627_v14  ;;  %1226 = vmatpush.bf16.msrb.mxu2 %v5439_v15  ;;  %v5754_v14 = vld [vmem:[#allocation7 + $0x2b0] sm:$0xf]  ;;  %v7595_v15 = vld [vmem:[#allocation7 + $0x2c4] sm:$0xf0] }
  0x82   : > { %1240 = vmatpush.bf16.msrb.mxu3 %v5631_v56  ;;  %v5756_v56 = vld [vmem:[#allocation7 + $0x2c8] sm:$0xf0]  ;;  %v5755_v20 = vor.u32 %v7595_v15, %v5754_v14  ;;  %v7565_v14 = vld [vmem:[#allocation7 + $0x1d4] sm:$0xf0]  ;;  %v7514_v15 = vld [vmem:[#allocation7 + $0x44] sm:$0xf] }
  0x84   : > { %1199 = vmatpush.bf16.msrb.mxu0 %v5411_v22  ;;  %v7541_v22 = vld [vmem:[#allocation7 + $0x114] sm:$0xf0] }
  0x85   : > { %1213 = vmatpush.bf16.msrb.mxu1 %v5603_v26  ;;  %1227 = vmatpush.bf16.msrb.mxu2 %v5415_v30  ;;  %v7589_v26 = vld [vmem:[#allocation7 + $0x294] sm:$0xf0]  ;;  %v5732_v30 = vld [vmem:[#allocation7 + $0x298] sm:$0xf0] }
  0x86   : > { %1241 = vmatpush.bf16.msrb.mxu3 %v5607_v31  ;;  %v5539_v31 = vor.u32 %v7541_v22, %v5538_v21  ;;  %v7511_v21 = vld [vmem:[#allocation7 + $0x24] sm:$0xf0]  ;;  %v5447_v22 = vor.u32 %v7514_v15, %v5444_v16  ;;  %v1310_v16 = vld [vmem:[%s9518_s8] sm:$0xff] }
  0xbb   : > { %v509_v13 = vpop.xlane.xlu0 %508 }
  0xbc   : > { %v520_v18 = vmul.f32 %v8683_v4, %v509_v13 }
  0xbe   : > { %v522_v19 = vadd.f32 1e-06, %v520_v18  ;;  %v7592_v18 = vld [vmem:[#allocation7 + $0x2b4] sm:$0xf] }
  0xbf   : > { %v5759_v24 = vor.u32 %v7592_v18, %v5756_v56  ;;  %v5636_v18 = vld [vmem:[#allocation7 + $0x1d8] sm:$0xf0] }
  0xc0   : > { %8128 = vrsqrt.f32 %v522_v19  ;;  %vm530_vm2 = vweird.f32 %v522_v19 }
  0xc3   : > { %v512_v32 = vpop.xlane.xlu0 %511 }
  0xc4   : > { %v521_v33 = vmul.f32 %v8683_v4, %v512_v32  ;;  %v5731_v32 = vor.u32 %v7589_v26, %v5730_v25  ;;  %v7559_v25 = vld [vmem:[#allocation7 + $0x1a4] sm:$0xf0]  ;;  %v7508_v26 = vld [vmem:[#allocation7 + $0x14] sm:$0xf] }
  0xc6   : > { %v8129_v34 = vpop.eup %8128  ;;  %v523_v35 = vadd.f32 1e-06, %v521_v33  ;;  %v5514_v33 = vld [vmem:[#allocation7 + $0xd0] sm:$0xf] }
  0xc7   : > { %v525_v36 = vmul.f32 %v8129_v34, %v522_v19  ;;  %vm531_vm1 = vweird.f32 %v8129_v34 }
  0xc8   : > { %8130 = vrsqrt.f32 %v523_v35  ;;  %vm532_vm3 = vmor %vm530_vm2, %vm531_vm1  ;;  %vm540_vm5 = vweird.f32 %v523_v35 }
  0xc9   : > { %v526_v37 = vmul.f32 %v8129_v34, %v525_v36  ;;  %v5735_v36 = vor.u32 %v7586_v29, %v5732_v30  ;;  %v5612_v29 = vld [vmem:[#allocation7 + $0x1a8] sm:$0xf0] }
  0xcb   : > { %v527_v38 = vmul.f32 0.5, %v526_v37  ;;  %v5706_v37 = vld [vmem:[#allocation7 + $0x250] sm:$0xf] }
  0xcd   : > { %v528_v39 = vsub.f32 1.5, %v527_v38  ;;  %v7583_v38 = vld [vmem:[#allocation7 + $0x264] sm:$0xf0] }
  0xce   : > { %v8131_v40 = vpop.eup %8130 }
  0xcf   : > { %v535_v41 = vmul.f32 %v8131_v40, %v523_v35  ;;  %v529_v42 = vmul.f32 %v8129_v34, %v528_v39  ;;  %vm541_vm4 = vweird.f32 %v8131_v40  ;;  %v5543_v35 = vor.u32 %v7538_v27, %v5540_v28  ;;  %v7532_v39 = vld [vmem:[#allocation7 + $0xd4] sm:$0xf]  ;;  %v5420_v27 = vld [vmem:[#allocation7 + $0x28] sm:$0xf0] }
  0xd0   : > { %vm542_vm6 = vmor %vm540_vm5, %vm541_vm4  ;;  %v7556_v28 = vld [vmem:[#allocation7 + $0x194] sm:$0xf] }
  0xd1   : > { %v536_v43 = vmul.f32 %v8131_v40, %v535_v41  ;;  %v533_v46 = vsel %vm532_vm3, %v8129_v34, %v529_v42  ;;  %v7535_v34 = vld [vmem:[#allocation7 + $0xe4] sm:$0xf0]  ;;  %v7580_v41 = vld [vmem:[#allocation7 + $0x254] sm:$0xf]  ;;  %v5708_v42 = vld [vmem:[#allocation7 + $0x268] sm:$0xf0] }
  0xd2   : > { %v544_v51 = vmul.f32 %v533_v46, %v8657_v0  ;;  %v545_v52 = vmul.f32 %v533_v46, %v8660_v1  ;;  %v5780_v0 = vld [vmem:[#allocation7 + $0x2f8] sm:$0xf0]  ;;  %v7529_v46 = vld [vmem:[#allocation7 + $0xb4] sm:$0xf0] }
  0xd3   : > { %v537_v44 = vmul.f32 0.5, %v536_v43  ;;  %v5783_v13 = vor.u32 %v7598_v8, %v5780_v0  ;;  %v5515_v43 = vor.u32 %v7535_v34, %v5514_v33  ;;  %v5660_v8 = vld [vmem:[#allocation7 + $0x208] sm:$0xf0]  ;;  %v5615_v33 = vor.u32 %v7556_v28, %v5612_v29 }
  0xd4   : > { %v554_v62 = vmul.f32 %v550_v49, %v544_v51  ;;  %v555_v63 = vmul.f32 %v551_v50, %v545_v52  ;;  %v7526_v51 = vld [vmem:[#allocation7 + $0xa4] sm:$0xf]  ;;  %v5492_v52 = vld [vmem:[#allocation7 + $0xb8] sm:$0xf0] }
  0xd5   : > { %v538_v47 = vsub.f32 1.5, %v537_v44  ;;  %v5707_v44 = vor.u32 %v7583_v38, %v5706_v37 }
  0xd7   : > { %v539_v48 = vmul.f32 %v8131_v40, %v538_v47 }
  0xd9   : > { %v543_v53 = vsel %vm542_vm6, %v8131_v40, %v539_v48  ;;  %v5516_v40 = vld [vmem:[#allocation7 + $0xe8] sm:$0xf0]  ;;  %v5711_v48 = vor.u32 %v7580_v41, %v5708_v42 }
  0xda   : > { %v546_v54 = vmul.f32 %v543_v53, %v8663_v2  ;;  %v547_v55 = vmul.f32 %v543_v53, %v8670_v5  ;;  %v5779_v2 = vor.u32 %v7601_v60, %v5778_v59  ;;  %v7547_v5 = vld [vmem:[#allocation7 + $0x144] sm:$0xf0]  ;;  %v5519_v47 = vor.u32 %v7532_v39, %v5516_v40  ;;  %v7574_v53 = vld [vmem:[#allocation7 + $0x224] sm:$0xf] }
  0xdb   : > { %v5563_v19 = vor.u32 %v7547_v5, %v5562_v11  ;;  %v7523_v59 = vld [vmem:[#allocation7 + $0x84] sm:$0xf0]  ;;  %v5495_v60 = vor.u32 %v7526_v51, %v5492_v52  ;;  %v7517_v11 = vld [vmem:[#allocation7 + $0x54] sm:$0xf0] }
  0xdc   : > { %v556_v3 = vmul.f32 %v550_v49, %v546_v54  ;;  %v557_v6 = vmul.f32 %v551_v50, %v547_v55  ;;  %v5682_v49 = vld [vmem:[#allocation7 + $0x220] sm:$0xf]  ;;  %v7577_v50 = vld [vmem:[#allocation7 + $0x234] sm:$0xf0]  ;;  %v5684_v54 = vld [vmem:[#allocation7 + $0x238] sm:$0xf0]  ;;  %v5491_v55 = vor.u32 %v7529_v46, %v5490_v45  ;;  %v5467_v0 = vor.u32 %v7523_v59, %v5466_v58 }
  0xdd   : > { %v5683_v57 = vor.u32 %v7577_v50, %v5682_v49  ;;  %v5687_v61 = vor.u32 %v7574_v53, %v5684_v54 }
  0xde   : > { %v8694_v9 = vpack.c.bf16 %v556_v3, %v554_v62  ;;  %v8696_v1 = vpack.c.bf16 %v557_v6, %v555_v63  ;;  %v5658_v62 = vld [vmem:[#allocation7 + $0x1f0] sm:$0xf]  ;;  %v7571_v63 = vld [vmem:[#allocation7 + $0x204] sm:$0xf0]  ;;  %v7520_v3 = vld [vmem:[#allocation7 + $0x74] sm:$0xf] }
  0xdf   : > { %v5468_v6 = vld [vmem:[#allocation7 + $0x88] sm:$0xf0] }
  0xe0   : > { %1144 = vmatmul.bf16.vlgmr.msra.gmra.mxu0 %v8694_v9  ;;  %1158 = vmatmul.bf16.vlgmr.msra.gmra.mxu1 %v8696_v1  ;;  %v5471_v5 = vor.u32 %v7520_v3, %v5468_v6 }
  0xe1   : > { %1172 = vmatmul.bf16.vlgmr.msra.gmra.mxu2 %v8694_v9  ;;  %1186 = vmatmul.bf16.vlgmr.msra.gmra.mxu3 %v8696_v1 }
  0xe2   : > { %1248 = vmatpush.bf16.msra.mxu0 %v5587_v10  ;;  %1262 = vmatpush.bf16.msra.mxu1 %v5779_v2  ;;  %v5659_v10 = vor.u32 %v7571_v63, %v5658_v62  ;;  %v5442_v2 = vld [vmem:[#allocation7 + $0x40] sm:$0xf] }
  0xe3   : > { %1276 = vmatpush.bf16.msra.mxu2 %v5591_v12  ;;  %1290 = vmatpush.bf16.msra.mxu3 %v5783_v13  ;;  %v5663_v12 = vor.u32 %v7568_v7, %v5660_v8  ;;  %v5634_v13 = vld [vmem:[#allocation7 + $0x1c0] sm:$0xf]  ;;  %v5443_v56 = vor.u32 %v7517_v11, %v5442_v2 }
  0xe6   : > { %1249 = vmatpush.bf16.msra.mxu0 %v5563_v19  ;;  %1263 = vmatpush.bf16.msra.mxu1 %v5755_v20  ;;  %v5635_v19 = vor.u32 %v7565_v14, %v5634_v13  ;;  %v5418_v20 = vld [vmem:[#allocation7 + $0x10] sm:$0xf] }
  0xe7   : > { %1277 = vmatpush.bf16.msra.mxu2 %v5567_v23  ;;  %1291 = vmatpush.bf16.msra.mxu3 %v5759_v24  ;;  %v5639_v23 = vor.u32 %v7562_v17, %v5636_v18  ;;  %v5610_v24 = vld [vmem:[#allocation7 + $0x190] sm:$0xf]  ;;  %v5419_v30 = vor.u32 %v7511_v21, %v5418_v20  ;;  %v1308_v17 = vld [vmem:[%s9517_s7] sm:$0xff] }
  0xea   : > { %1250 = vmatpush.bf16.msra.mxu0 %v5539_v31  ;;  %1264 = vmatpush.bf16.msra.mxu1 %v5731_v32  ;;  %v5611_v31 = vor.u32 %v7559_v25, %v5610_v24  ;;  %v5423_v32 = vor.u32 %v7508_v26, %v5420_v27 }
  0xeb   : > { %1278 = vmatpush.bf16.msra.mxu2 %v5543_v35  ;;  %1292 = vmatpush.bf16.msra.mxu3 %v5735_v36 }
  0xee   : > { %1251 = vmatpush.bf16.msra.mxu0 %v5515_v43  ;;  %1265 = vmatpush.bf16.msra.mxu1 %v5707_v44 }
  0xef   : > { %1279 = vmatpush.bf16.msra.mxu2 %v5519_v47  ;;  %1293 = vmatpush.bf16.msra.mxu3 %v5711_v48 }
  0xf0   : > { %1200 = vmatmul.bf16.vlgmr.msrb.gmra.mxu0 %v8694_v9  ;;  %1214 = vmatmul.bf16.vlgmr.msrb.gmra.mxu1 %v8696_v1 }
  0xf1   : > { %1228 = vmatmul.bf16.vlgmr.msrb.gmra.mxu2 %v8694_v9  ;;  %1242 = vmatmul.bf16.vlgmr.msrb.gmra.mxu3 %v8696_v1 }
  0xf2   : > { %1252 = vmatpush.bf16.msra.mxu0 %v5491_v55  ;;  %1266 = vmatpush.bf16.msra.mxu1 %v5683_v57 }
  0xf3   : > { %1280 = vmatpush.bf16.msra.mxu2 %v5495_v60  ;;  %1294 = vmatpush.bf16.msra.mxu3 %v5687_v61 }
  0xf6   : > { %1253 = vmatpush.bf16.msra.mxu0 %v5467_v0  ;;  %1267 = vmatpush.bf16.msra.mxu1 %v5659_v10 }
  0xf7   : > { %1281 = vmatpush.bf16.msra.mxu2 %v5471_v5  ;;  %1295 = vmatpush.bf16.msra.mxu3 %v5663_v12 }
  0xfa   : > { %1254 = vmatpush.bf16.msra.mxu0 %v5443_v56  ;;  %1268 = vmatpush.bf16.msra.mxu1 %v5635_v19 }
  0xfb   : > { %1282 = vmatpush.bf16.msra.mxu2 %v5447_v22  ;;  %1296 = vmatpush.bf16.msra.mxu3 %v5639_v23  ;;  %v1311_v22 = vld [vmem:[%s9518_s8 + $0x8] sm:$0xff] }
  0xfc   : > { %v1309_v23 = vld [vmem:[%s9517_s7 + $0x8] sm:$0xff] }
  0xfe   : > { %1255 = vmatpush.bf16.msra.mxu0 %v5419_v30  ;;  %1269 = vmatpush.bf16.msra.mxu1 %v5611_v31 }
  0xff   : > { %1283 = vmatpush.bf16.msra.mxu2 %v5423_v32  ;;  %1297 = vmatpush.bf16.msra.mxu3 %v5615_v33 }
 0x101   : > { %1256 = vmatmul.bf16.vlgmr.msra.gmra.mxu0 %v8694_v9  ;;  %1270 = vmatmul.bf16.vlgmr.msra.gmra.mxu1 %v8696_v1 }
 0x102   : > { %1284 = vmatmul.bf16.vlgmr.msra.gmra.mxu2 %v8694_v9  ;;  %1298 = vmatmul.bf16.vlgmr.msra.gmra.mxu3 %v8696_v1 }
 0x15d   : > { %v1145_v34 = vpop.f32.mrf.mxu0  ;;  %v1159_v35 = vpop.f32.mrf.mxu1 }
 0x15e   : > { %v1160_v47 = vadd.f32 %v1159_v35, %v1145_v34 }
 0x160   : > { %v1312_v30 = vmul.f32 %v1308_v17, %v1160_v47 }
 0x164   : > { %v1173_v36 = vpop.f32.mrf.mxu2  ;;  %v1187_v37 = vpop.f32.mrf.mxu3 }
 0x165   : > { %v1188_v38 = vadd.f32 %v1187_v37, %v1173_v36  ;;  %v1147_v39 = vpop.f32.mrf.mxu0  ;;  %v1161_v40 = vpop.f32.mrf.mxu1 }
 0x166   : > { %v8739_v6 = vadd.f32 %v1161_v40, %v1147_v39 }
 0x167   : > { %1342 = vrot.lane.b32.xlu2 %v1188_v38, %s8459_s17  ;;  %v1340_v56 = vmul.f32 %v1308_v17, %v1188_v38 }
 0x16c   : > { %v1175_v41 = vpop.f32.mrf.mxu2  ;;  %v1189_v42 = vpop.f32.mrf.mxu3 }
 0x16d   : > { %v1190_v43 = vadd.f32 %v1189_v42, %v1175_v41  ;;  %v1201_v44 = vpop.f32.mrf.mxu0  ;;  %v1215_v45 = vpop.f32.mrf.mxu1 }
 0x16e   : > { %v8711_v46 = vadd.f32 %v1215_v45, %v1201_v44 }
 0x16f   : > { %1344 = vrot.lane.b32.xlu2 %v1190_v43, %s8459_s17  ;;  %v1341_v25 = vmul.f32 %v1309_v23, %v1190_v43 }
 0x170   : > { %1328 = vrot.lane.b32.xlu0 %v8711_v46, %s8459_s17  ;;  %v1326_v35 = vmul.f32 %v1308_v17, %v8711_v46 }
 0x174   : > { %v1229_v9 = vpop.f32.mrf.mxu2  ;;  %v1243_v1 = vpop.f32.mrf.mxu3 }
 0x175   : > { %v8716_v48 = vadd.f32 %v1243_v1, %v1229_v9  ;;  %v1203_v49 = vpop.f32.mrf.mxu0  ;;  %v1217_v50 = vpop.f32.mrf.mxu1 }
 0x176   : > { %v8730_v57 = vadd.f32 %v1217_v50, %v1203_v49 }
 0x177   : > { %1356 = vrot.lane.b32.xlu1 %v8716_v48, %s8459_s17  ;;  %1314 = vrot.lane.b32.xlu2 %v1160_v47, %s8459_s17  ;;  %v1354_v40 = vmul.f32 %v1308_v17, %v8716_v48 }
 0x178   : > { %v1327_v49 = vmul.f32 %v1309_v23, %v8730_v57 }
 0x17c   : > { %v1231_v51 = vpop.f32.mrf.mxu2  ;;  %v1245_v52 = vpop.f32.mrf.mxu3 }
 0x17d   : > { %v8722_v53 = vadd.f32 %v1245_v52, %v1231_v51 }
 0x17e   : > { %v1257_v54 = vpop.f32.mrf.mxu0  ;;  %v1271_v55 = vpop.f32.mrf.mxu1 }
 0x17f   : > { %1358 = vrot.lane.b32.xlu1 %v8722_v53, %s8459_s17  ;;  %v1272_v60 = vadd.f32 %v1271_v55, %v1257_v54  ;;  %v1355_v45 = vmul.f32 %v1309_v23, %v8722_v53 }
 0x185   : > { %v1285_v58 = vpop.f32.mrf.mxu2  ;;  %v1299_v59 = vpop.f32.mrf.mxu3 }
 0x186   : > { %v1300_v61 = vadd.f32 %v1299_v59, %v1285_v58  ;;  %v1259_v63 = vpop.f32.mrf.mxu0  ;;  %v1273_v3 = vpop.f32.mrf.mxu1  ;;  %v1313_v59 = vmul.f32 %v1309_v23, %v8739_v6 }
 0x187   : > { %1330 = vrot.lane.b32.xlu1 %v8730_v57, %s8459_s17  ;;  %v1274_v0 = vadd.f32 %v1273_v3, %v1259_v63 }
 0x188   : > { %v1304_v62 = vpack.c.bf16 %v1300_v61, %v1272_v60 }
 0x18a   : > { %1306 = vst [vmem:[%s497_s22] sm:$0xff] %v1304_v62 }
 0x18d   : > { %v1287_v7 = vpop.f32.mrf.mxu2  ;;  %v1301_v8 = vpop.f32.mrf.mxu3 }
 0x18e   : > { %v1302_v10 = vadd.f32 %v1301_v8, %v1287_v7 }
 0x18f   : > { %1316 = vrot.lane.b32.xlu1 %v8739_v6, %s8459_s17  ;;  %s8384_s17 = sshra.s32 %s5212_s28, 4  ;;  %s8385_s17 = int_to_ptr.hbm [resolvable:$true] %s8384_s17 }
 0x190   : > { %v1305_v2 = vpack.c.bf16 %v1302_v10, %v1274_v0  ;;  %s8386_s26 = scalar_lea.hbm %s8385_s17, 32  ;;  %p8391_p2 = scmp.lt.s32.totalorder %s8385_s17, %s9519_s9 }
 0x191   : > { %v5794_v11 = vld [vmem:[%s497_s22] sm:$0xf]  ;;  %v5807_v12 = vld [vmem:[%s497_s22 + $0x4] sm:$0xf]  ;;  %p8387_p4 = scmp.ne.s32.totalorder %s8385_s17, %s8386_s26 }
 0x192   : > { %1307 = vst [vmem:[%s497_s22 + $0x8] sm:$0xff] %v1305_v2 }
 0x193   : > { %p8388_p8 = pnand %p8387_p4, %p8606_p3 }
 0x195   : > { %p8389_p11 = pneg %p8388_p8 }
 0x199   : > { %v7604_v5 = vld [vmem:[%s497_s22 + $0x4] sm:$0xf0]  ;;  %v7607_v13 = vld [vmem:[%s497_s22 + $0x8] sm:$0xf0] }
 0x19a   : > { %v5795_v14 = vor.u32 %v7604_v5, %v5794_v11  ;;  %v5808_v15 = vor.u32 %v7607_v13, %v5807_v12  ;;  %v1368_v11 = vlaneseq }
 0x19c   : > { %1449 = vmatpush.bf16.msrb.mxu1 %v5795_v14  ;;  %1533 = vmatpush.bf16.msrb.mxu3 %v5808_v15  ;;  %v1369_v5 = vshrl.u32 %v1368_v11, 7  ;;  %v1372_v6 = vand.u32 127, %v1368_v11  ;;  %v5862_v11 = vld [vmem:[#allocation9 + $0x58] sm:$0xf0] }
 0x19e   : > { %vm1373_vm7 = vcmp.le.s32.totalorder %v1372_v6, %v1369_v5  ;;  %v1370_v15 = vadd.s32 8, %v1369_v5 }
 0x1a0   : > { %vm1374_vm9 = vcmp.le.s32.totalorder %v1372_v6, %v1370_v15 }
 0x1c1   : > { %v1343_v18 = vpop.permute.xlu2 %1342 }
 0x1c2   : > { %v1346_v19 = vmul.f32 %v1343_v18, %v1310_v16 }
 0x1c4   : > { %v1348_v20 = vadd.f32 %v1346_v19, %v1340_v56 }
 0x1c6   : > { %v1350_v21 = vpack.c.bf16 %v1348_v20, %v1348_v20 }
 0x1c8   : > { %1352 = vst [vmem:[#allocation3 + $0x4] sm:$0xf] %v1350_v21 }
 0x1c9   : > { %v1345_v24 = vpop.permute.xlu2 %1344 }
 0x1ca   : > { %v1347_v26 = vmul.f32 %v1345_v24, %v1311_v22 }
 0x1cc   : > { %v1349_v27 = vadd.f32 %v1347_v26, %v1341_v25 }
 0x1ce   : > { %v1351_v28 = vpack.c.bf16 %v1349_v27, %v1349_v27 }
 0x1cf   : > { %v5799_v63 = vld [vmem:[#allocation3 + $0x4] sm:$0xf] }
 0x1d0   : > { %1353 = vst [vmem:[#allocation3 + $0xc] sm:$0xf] %v1351_v28 }
 0x1d1   : > { %v1315_v29 = vpop.permute.xlu2 %1314 }
 0x1d2   : > { %v1318_v31 = vmul.f32 %v1315_v29, %v1310_v16 }
 0x1d4   : > { %v1320_v32 = vadd.f32 %v1318_v31, %v1312_v30 }
 0x1d6   : > { %v1322_v33 = vpack.c.bf16 %v1320_v32, %v1320_v32 }
 0x1d7   : > { %v7605_v61 = vld [vmem:[#allocation3 + $0x8] sm:$0xf0] }
 0x1d8   : > { %1324 = vst [vmem:[#allocation3] sm:$0xf] %v1322_v33  ;;  %v5800_v3 = vor.u32 %v7605_v61, %v5799_v63  ;;  %v7639_v63 = vld [vmem:[#allocation9 + $0xe4] sm:$0xf0] }
 0x1df   : > { %v5786_v0 = vld [vmem:[#allocation3] sm:$0xf] }
 0x1e2   : > { %v1329_v34 = vpop.permute.xlu0 %1328 }
 0x1e3   : > { %v1332_v36 = vmul.f32 %v1329_v34, %v1310_v16 }
 0x1e5   : > { %v1334_v37 = vadd.f32 %v1332_v36, %v1326_v35 }
 0x1e7   : > { %v1336_v38 = vpack.c.bf16 %v1334_v37, %v1334_v37 }
 0x1e9   : > { %1338 = vst [vmem:[%s8761_s1] sm:$0xf] %v1336_v38  ;;  %v1357_v39 = vpop.permute.xlu1 %1356 }
 0x1ea   : > { %v1360_v41 = vmul.f32 %v1357_v39, %v1310_v16 }
 0x1ec   : > { %v1362_v42 = vadd.f32 %v1360_v41, %v1354_v40 }
 0x1ee   : > { %v1364_v43 = vpack.c.bf16 %v1362_v42, %v1362_v42 }
 0x1f0   : > { %1366 = vst [vmem:[%s8761_s1 + $0x4] sm:$0xf] %v1364_v43  ;;  %v5790_v57 = vld [vmem:[%s8761_s1] sm:$0xf] }
 0x1f1   : > { %v1359_v44 = vpop.permute.xlu1 %1358 }
 0x1f2   : > { %v1361_v46 = vmul.f32 %v1359_v44, %v1311_v22  ;;  %v5876_v44 = vld [vmem:[#allocation9 + $0x70] sm:$0xf] }
 0x1f4   : > { %v1363_v9 = vadd.f32 %v1361_v46, %v1355_v45  ;;  %v7625_v45 = vld [vmem:[#allocation9 + $0x74] sm:$0xf0]  ;;  %v7624_v46 = vld [vmem:[#allocation9 + $0x74] sm:$0xf] }
 0x1f6   : > { %v1365_v1 = vpack.c.bf16 %v1363_v9, %v1363_v9  ;;  %v5877_v9 = vor.u32 %v7625_v45, %v5876_v44 }
 0x1f7   : > { %v5803_v52 = vld [vmem:[%s8761_s1 + $0x4] sm:$0xf] }
 0x1f8   : > { %1367 = vst [vmem:[%s8761_s1 + $0xc] sm:$0xf] %v1365_v1  ;;  %v5878_v1 = vld [vmem:[#allocation9 + $0x78] sm:$0xf0] }
 0x1f9   : > { %v1331_v47 = vpop.permute.xlu1 %1330 }
 0x1fa   : > { %v1333_v50 = vmul.f32 %v1331_v47, %v1311_v22  ;;  %v5940_v47 = vld [vmem:[#allocation9 + $0xf0] sm:$0xf] }
 0x1fc   : > { %v1335_v48 = vadd.f32 %v1333_v50, %v1327_v49  ;;  %v7641_v49 = vld [vmem:[#allocation9 + $0xf4] sm:$0xf0]  ;;  %v5881_v50 = vor.u32 %v7624_v46, %v5878_v1  ;;  %v7616_v46 = vld [vmem:[#allocation9 + $0x34] sm:$0xf] }
 0x1fe   : > { %v1337_v51 = vpack.c.bf16 %v1335_v48, %v1335_v48  ;;  %v5941_v48 = vor.u32 %v7641_v49, %v5940_v47  ;;  %v5908_v47 = vld [vmem:[#allocation9 + $0xb0] sm:$0xf]  ;;  %v7633_v49 = vld [vmem:[#allocation9 + $0xb4] sm:$0xf0] }
 0x1ff   : > { %v7606_v54 = vld [vmem:[%s8761_s1 + $0x8] sm:$0xf0] }
 0x200   : > { %1339 = vst [vmem:[%s8761_s1 + $0x8] sm:$0xf] %v1337_v51  ;;  %v5804_v55 = vor.u32 %v7606_v54, %v5803_v52  ;;  %v7640_v51 = vld [vmem:[#allocation9 + $0xf4] sm:$0xf]  ;;  %v5942_v52 = vld [vmem:[#allocation9 + $0xf8] sm:$0xf0]  ;;  %1762 = vmatpush.bf16.msra.mxu1 %v5941_v48  ;;  %v5909_v48 = vor.u32 %v7633_v49, %v5908_v47 }
 0x201   : > { %v1317_v58 = vpop.permute.xlu1 %1316  ;;  %v5868_v54 = vld [vmem:[#allocation9 + $0x60] sm:$0xf] }
 0x202   : > { %v1319_v53 = vmul.f32 %v1317_v58, %v1311_v22  ;;  %1483 = vmatpush.bf16.xpose.msrb.mxu2 %v5804_v55  ;;  %v5945_v55 = vor.u32 %v7640_v51, %v5942_v52  ;;  %v7623_v58 = vld [vmem:[#allocation9 + $0x64] sm:$0xf0]  ;;  %v5910_v51 = vld [vmem:[#allocation9 + $0xb8] sm:$0xf0]  ;;  %v5836_v52 = vld [vmem:[#allocation9 + $0x20] sm:$0xf] }
 0x204   : > { %v1321_v60 = vadd.f32 %v1319_v53, %v1313_v59  ;;  %v7622_v59 = vld [vmem:[#allocation9 + $0x64] sm:$0xf]  ;;  %v5870_v53 = vld [vmem:[#allocation9 + $0x68] sm:$0xf0]  ;;  %1790 = vmatpush.bf16.msra.mxu3 %v5945_v55 }
 0x205   : > { %v5873_v61 = vor.u32 %v7622_v59, %v5870_v53  ;;  %v7614_v59 = vld [vmem:[#allocation9 + $0x24] sm:$0xf]  ;;  %v5838_v53 = vld [vmem:[#allocation9 + $0x28] sm:$0xf0] }
 0x206   : > { %v1323_v62 = vpack.c.bf16 %v1321_v60, %v1321_v60  ;;  %v5869_v60 = vor.u32 %v7623_v58, %v5868_v54  ;;  %v7615_v54 = vld [vmem:[#allocation9 + $0x24] sm:$0xf0] }
 0x207   : > { %v7603_v7 = vld [vmem:[%s8761_s1 + $0x4] sm:$0xf0]  ;;  %v5837_v58 = vor.u32 %v7615_v54, %v5836_v52  ;;  %v7746_v54 = vld [vmem:[#allocation10 + $0x33c] sm:$0xf0]  ;;  %s8390_s1 = scalar_lea.hbm %s9519_s9, 64 }
 0x208   : > { %1325 = vst [vmem:[#allocation3 + $0x8] sm:$0xf] %v1323_v62  ;;  %v5791_v8 = vor.u32 %v7603_v7, %v5790_v57  ;;  %v5932_v62 = vld [vmem:[#allocation9 + $0xe0] sm:$0xf]  ;;  %v5934_v7 = vld [vmem:[#allocation9 + $0xe8] sm:$0xf0]  ;;  %p8392_p9 = scmp.lt.s32.totalorder %s8390_s1, %s8386_s26 }
 0x209   : > { %1484 = vmatmul.bf16.vlgmr.msrb.gmra.mxu2 %v5800_v3  ;;  %v7638_v3 = vld [vmem:[#allocation9 + $0xe4] sm:$0xf]  ;;  %v5933_v57 = vor.u32 %v7639_v63, %v5932_v62  ;;  %v7631_v62 = vld [vmem:[#allocation9 + $0xa4] sm:$0xf0] }
 0x20a   : > { %1398 = vmatpush.bf16.xpose.msrb.mxu0 %v5791_v8  ;;  %1776 = vmatpush.bf16.msra.mxu2 %v5881_v50  ;;  %v5860_v8 = vld [vmem:[#allocation9 + $0x50] sm:$0xf]  ;;  %v7632_v50 = vld [vmem:[#allocation9 + $0xb4] sm:$0xf]  ;;  %v7630_v63 = vld [vmem:[#allocation9 + $0xa4] sm:$0xf]  ;;  %p8393_p10 = por %p8392_p9, %p8391_p2 }
 0x20b   : > { %1763 = vmatpush.bf16.msra.mxu1 %v5933_v57  ;;  %v5913_v55 = vor.u32 %v7632_v50, %v5910_v51  ;;  %v5902_v57 = vld [vmem:[#allocation9 + $0xa8] sm:$0xf0]  ;;  %v7882_v50 = vld [vmem:[#allocation10 + $0x784] sm:$0xf]  ;;  %v6332_v51 = vld [vmem:[#allocation10 + $0x300] sm:$0xf] }
 0x20c   : > { %p8394_p12 = pnand %p8393_p10, %p8389_p11 }
 0x20e   : > { %1777 = vmatpush.bf16.msra.mxu2 %v5873_v61  ;;  %v5900_v61 = vld [vmem:[#allocation9 + $0xa0] sm:$0xf] }
 0x20f   : > { %v7602_v10 = vld [vmem:[#allocation3 + $0x4] sm:$0xf0] }
 0x210   : > { %v5787_v2 = vor.u32 %v7602_v10, %v5786_v0  ;;  %v7621_v0 = vld [vmem:[#allocation9 + $0x54] sm:$0xf0]  ;;  %v5937_v10 = vor.u32 %v7638_v3, %v5934_v7  ;;  %v5901_v3 = vor.u32 %v7631_v62, %v5900_v61  ;;  %v5828_v7 = vld [vmem:[#allocation9 + $0x10] sm:$0xf]  ;;  %v6334_v61 = vld [vmem:[#allocation10 + $0x340] sm:$0xf0] }
 0x211   : > { %v5861_v5 = vor.u32 %v7621_v0, %v5860_v8  ;;  %v7613_v8 = vld [vmem:[#allocation9 + $0x14] sm:$0xf0]  ;;  %v5905_v0 = vor.u32 %v7630_v63, %v5902_v57  ;;  %v7866_v62 = vld [vmem:[#allocation10 + $0x704] sm:$0xf]  ;;  %v6268_v57 = vld [vmem:[#allocation10 + $0x280] sm:$0xf] }
 0x212   : > { %1399 = vmatmul.bf16.vlgmr.msrb.gmra.mxu0 %v5787_v2  ;;  %v7620_v2 = vld [vmem:[#allocation9 + $0x54] sm:$0xf]  ;;  %1791 = vmatpush.bf16.msra.mxu3 %v5937_v10  ;;  %v5829_v10 = vor.u32 %v7613_v8, %v5828_v7  ;;  %v7730_v7 = vld [vmem:[#allocation10 + $0x2bc] sm:$0xf0] }
 0x213   : > { %1748 = vmatpush.bf16.msra.mxu0 %v5877_v9  ;;  %v5865_v6 = vor.u32 %v7620_v2, %v5862_v11  ;;  %v5846_v9 = vld [vmem:[#allocation9 + $0x38] sm:$0xf0]  ;;  %v7612_v2 = vld [vmem:[#allocation9 + $0x14] sm:$0xf] }
 0x214   : > { %v5849_v1 = vor.u32 %v7616_v46, %v5846_v9  ;;  %v5830_v11 = vld [vmem:[#allocation9 + $0x18] sm:$0xf0]  ;;  %v7890_v46 = vld [vmem:[#allocation10 + $0x7bc] sm:$0xf0]  ;;  %v7754_v9 = vld [vmem:[#allocation10 + $0x384] sm:$0xf] }
 0x215   : > { %1778 = vmatpush.bf16.msra.mxu2 %v5865_v6  ;;  %v5892_v6 = vld [vmem:[#allocation9 + $0x90] sm:$0xf] }
 0x217   : > { %1749 = vmatpush.bf16.msra.mxu0 %v5869_v60  ;;  %v5841_v60 = vor.u32 %v7614_v59, %v5838_v53  ;;  %v6333_v59 = vor.u32 %v7746_v54, %v6332_v51  ;;  %v8217_v51 = vld [vmem:[%s8642_s12 + $0x8] sm:$0xff]  ;;  %v6078_v54 = vld [vmem:[#allocation10 + $0x140] sm:$0xf0] }
 0x21b   : > { %1750 = vmatpush.bf16.msra.mxu0 %v5861_v5  ;;  %v5833_v5 = vor.u32 %v7612_v2, %v5830_v11  ;;  %v7722_v2 = vld [vmem:[#allocation10 + $0x284] sm:$0xf]  ;;  %v6269_v11 = vor.u32 %v7730_v7, %v6268_v57 }
 0x28c   : > { %v1485_v12 = vpop.f32.mrf.mxu2 }
 0x28d   : > { %v1490_v13 = vsel %vm1373_vm7, %v1485_v12, -inf }
 0x28e   : > { %v1492_v14 = vsel %vm1407_vm8, %v1490_v13, -inf }
 0x28f   : > { %1493 = vmax.xlane.f32.xlu2 %v1492_v14  ;;  %v1400_v16 = vpop.f32.mrf.mxu0 }
 0x290   : > { %v1405_v17 = vsel %vm1373_vm7, %v1400_v16, -inf }
 0x291   : > { %v1408_v18 = vsel %vm1407_vm8, %v1405_v17, -inf }
 0x292   : > { %1409 = vmax.xlane.f32.xlu0 %v1408_v18 }
 0x294   : > { %v1487_v56 = vpop.f32.mrf.mxu2 }
 0x295   : > { %v1491_v19 = vsel %vm1374_vm9, %v1487_v56, -inf }
 0x296   : > { %v1495_v20 = vsel %vm1407_vm8, %v1491_v19, -inf }
 0x297   : > { %1496 = vmax.xlane.f32.xlu1 %v1495_v20  ;;  %v1402_v21 = vpop.f32.mrf.mxu0 }
 0x298   : > { %v1406_v22 = vsel %vm1374_vm9, %v1402_v21, -inf }
 0x299   : > { %v1411_v23 = vsel %vm1407_vm8, %v1406_v22, -inf }
 0x29a   : > { %1412 = vmax.xlane.f32.xlu2 %v1411_v23 }
 0x302   : > { %v1494_v24 = vpop.xlane.xlu2 %1493 }
 0x303   : > { %v1498_v25 = vsub.f32 %v1490_v13, %v1494_v24 }
 0x305   : > { %v1500_v26 = vmul.f32 1.442695, %v1498_v25  ;;  %v1410_v27 = vpop.xlane.xlu0 %1409  ;;  %v5924_v25 = vld [vmem:[#allocation9 + $0xd0] sm:$0xf] }
 0x306   : > { %v1414_v28 = vsub.f32 %v1405_v17, %v1410_v27  ;;  %v7636_v27 = vld [vmem:[#allocation9 + $0xd4] sm:$0xf] }
 0x307   : > { %8132 = vpow2.f32 %v1500_v26  ;;  %v7637_v26 = vld [vmem:[#allocation9 + $0xd4] sm:$0xf0] }
 0x308   : > { %v1416_v29 = vmul.f32 1.442695, %v1414_v28  ;;  %v5925_v28 = vor.u32 %v7637_v26, %v5924_v25  ;;  %v5886_v26 = vld [vmem:[#allocation9 + $0x88] sm:$0xf0] }
 0x30a   : > { %8134 = vpow2.f32 %v1416_v29  ;;  %v1497_v30 = vpop.xlane.xlu1 %1496  ;;  %v5926_v29 = vld [vmem:[#allocation9 + $0xd8] sm:$0xf0]  ;;  %1764 = vmatpush.bf16.msra.mxu1 %v5925_v28 }
 0x30b   : > { %v1499_v31 = vsub.f32 %v1491_v19, %v1497_v30  ;;  %v5852_v30 = vld [vmem:[#allocation9 + $0x40] sm:$0xf] }
 0x30d   : > { %v8779_v32 = vpop.eup %8132  ;;  %v1502_v33 = vmul.f32 1.442695, %v1499_v31  ;;  %v1413_v34 = vpop.xlane.xlu2 %1412  ;;  %v7619_v31 = vld [vmem:[#allocation9 + $0x44] sm:$0xf0] }
 0x30e   : > { %v1415_v35 = vsub.f32 %v1406_v22, %v1413_v34  ;;  %v1504_v36 = vsel %vm1407_vm8, %v8779_v32, 0.0  ;;  %v7618_v34 = vld [vmem:[#allocation9 + $0x44] sm:$0xf] }
 0x30f   : > { %8136 = vpow2.f32 %v1502_v33  ;;  %1505 = vadd.xlane.f32.xlu2 %v1504_v36  ;;  %v5929_v33 = vor.u32 %v7636_v27, %v5926_v29 }
 0x310   : > { %v8783_v37 = vpop.eup %8134  ;;  %v1418_v38 = vmul.f32 1.442695, %v1415_v35  ;;  %v5854_v35 = vld [vmem:[#allocation9 + $0x48] sm:$0xf0] }
 0x311   : > { %v1420_v39 = vsel %vm1407_vm8, %v8783_v37, 0.0  ;;  %v5857_v36 = vor.u32 %v7618_v34, %v5854_v35  ;;  %1792 = vmatpush.bf16.msra.mxu3 %v5929_v33 }
 0x312   : > { %8138 = vpow2.f32 %v1418_v38  ;;  %1421 = vadd.xlane.f32.xlu0 %v1420_v39  ;;  %v7635_v38 = vld [vmem:[#allocation9 + $0xc4] sm:$0xf0]  ;;  %v7634_v39 = vld [vmem:[#allocation9 + $0xc4] sm:$0xf] }
 0x313   : > { %1779 = vmatpush.bf16.msra.mxu2 %v5857_v36 }
 0x315   : > { %v8137_v40 = vpop.eup %8136 }
 0x316   : > { %v1507_v41 = vsel %vm1407_vm8, %v8137_v40, 0.0 }
 0x317   : > { %1508 = vadd.xlane.f32.xlu1 %v1507_v41  ;;  %v5918_v41 = vld [vmem:[#allocation9 + $0xc8] sm:$0xf0]  ;;  %1780 = vmatpush.bf16.msra.mxu2 %v5849_v1  ;;  %v6398_v1 = vld [vmem:[#allocation10 + $0x3c0] sm:$0xf0] }
 0x318   : > { %v8139_v42 = vpop.eup %8138  ;;  %v5921_v44 = vor.u32 %v7634_v39, %v5918_v41  ;;  %v6401_v49 = vor.u32 %v7754_v9, %v6398_v1  ;;  %v7682_v9 = vld [vmem:[#allocation10 + $0x13c] sm:$0xf0] }
 0x319   : > { %v1423_v43 = vsel %vm1407_vm8, %v8139_v42, 0.0 }
 0x31a   : > { %1424 = vadd.xlane.f32.xlu2 %v1423_v43  ;;  %v7617_v43 = vld [vmem:[#allocation9 + $0x34] sm:$0xf0]  ;;  %1793 = vmatpush.bf16.msra.mxu3 %v5921_v44  ;;  %v6908_v44 = vld [vmem:[#allocation10 + $0x780] sm:$0xf] }
 0x31b   : > { %1781 = vmatpush.bf16.msra.mxu2 %v5841_v60  ;;  %v6909_v47 = vor.u32 %v7890_v46, %v6908_v44  ;;  %v7738_v60 = vld [vmem:[#allocation10 + $0x304] sm:$0xf]  ;;  %v6076_v46 = vld [vmem:[#allocation10 + $0x100] sm:$0xf] }
 0x31c   : > { %v6337_v63 = vor.u32 %v7738_v60, %v6334_v61  ;;  %v6077_v60 = vor.u32 %v7682_v9, %v6076_v46  ;;  %v6406_v46 = vld [vmem:[#allocation10 + $0x3c8] sm:$0xf0] }
 0x31d   : > { %v7883_v9 = vld [vmem:[#allocation10 + $0x78c] sm:$0xf] }
 0x31e   : > { %1794 = vmatpush.bf16.msra.mxu3 %v5913_v55  ;;  %v6844_v55 = vld [vmem:[#allocation10 + $0x700] sm:$0xf] }
 0x31f   : > { %1782 = vmatpush.bf16.msra.mxu2 %v5833_v5  ;;  %v6270_v5 = vld [vmem:[#allocation10 + $0x2c0] sm:$0xf0] }
 0x322   : > { %1795 = vmatpush.bf16.msra.mxu3 %v5905_v0  ;;  %v6780_v0 = vld [vmem:[#allocation10 + $0x680] sm:$0xf] }
 0x382   : > { %v1506_v12 = vpop.xlane.xlu2 %1505 }
 0x383   : > { %8140 = vrcp.f32 %v1506_v12  ;;  %v7629_v12 = vld [vmem:[#allocation9 + $0x94] sm:$0xf0] }
 0x385   : > { %v1422_v13 = vpop.xlane.xlu0 %1421 }
 0x389   : > { %v8141_v16 = vpop.eup %8140 }
 0x38a   : > { %v1509_v14 = vpop.xlane.xlu1 %1508  ;;  %v1512_v56 = vmul.f32 %v8141_v16, %v8779_v32  ;;  %v5853_v32 = vor.u32 %v7619_v31, %v5852_v30  ;;  %v5820_v16 = vld [vmem:[#allocation9] sm:$0xf] }
 0x38b   : > { %8142 = vrcp.f32 %v1509_v14  ;;  %v5893_v14 = vor.u32 %v7629_v12, %v5892_v6  ;;  %v7850_v6 = vld [vmem:[#allocation10 + $0x684] sm:$0xf] }
 0x38c   : > { %8144 = vrcp.f32 %v1422_v13  ;;  %1751 = vmatpush.bf16.msra.mxu0 %v5853_v32  ;;  %v7628_v13 = vld [vmem:[#allocation9 + $0x94] sm:$0xf]  ;;  %v6782_v12 = vld [vmem:[#allocation10 + $0x6c0] sm:$0xf0] }
 0x38d   : > { %v1425_v15 = vpop.xlane.xlu2 %1424 }
 0x38e   : > { %8146 = vrcp.f32 %v1425_v15  ;;  %v5894_v15 = vld [vmem:[#allocation9 + $0x98] sm:$0xf0] }
 0x391   : > { %v8143_v17 = vpop.eup %8142 }
 0x392   : > { %v8145_v18 = vpop.eup %8144  ;;  %v1513_v19 = vmul.f32 %v8143_v17, %v8137_v40  ;;  %v7611_v17 = vld [vmem:[#allocation9 + $0x4] sm:$0xf0] }
 0x393   : > { %v1428_v22 = vmul.f32 %v8145_v18, %v8783_v37  ;;  %v5916_v37 = vld [vmem:[#allocation9 + $0xc0] sm:$0xf]  ;;  %v5897_v18 = vor.u32 %v7628_v13, %v5894_v15 }
 0x394   : > { %v8147_v20 = vpop.eup %8146  ;;  %v1514_v21 = vpack.c.bf16 %v1513_v19, %v1512_v56  ;;  %v5917_v40 = vor.u32 %v7635_v38, %v5916_v37  ;;  %v5821_v56 = vor.u32 %v7611_v17, %v5820_v16  ;;  %v7610_v19 = vld [vmem:[#allocation9 + $0x4] sm:$0xf]  ;;  %v6204_v15 = vld [vmem:[#allocation10 + $0x200] sm:$0xf] }
 0x395   : > { %v1429_v23 = vmul.f32 %v8147_v20, %v8139_v42  ;;  %v5844_v42 = vld [vmem:[#allocation9 + $0x30] sm:$0xf]  ;;  %v5822_v20 = vld [vmem:[#allocation9 + $0x8] sm:$0xf0]  ;;  %1796 = vmatpush.bf16.msra.mxu3 %v5897_v18  ;;  %v7714_v16 = vld [vmem:[#allocation10 + $0x23c] sm:$0xf0] }
 0x396   : > { %5809 = vmatmul.msk.bf16.vlgmr.msrb.gmra.mxu3 %vm1407_vm8, %v1514_v21  ;;  %v5845_v45 = vor.u32 %v7617_v43, %v5844_v42  ;;  %1765 = vmatpush.bf16.msra.mxu1 %v5917_v40  ;;  %v5825_v21 = vor.u32 %v7610_v19, %v5822_v20  ;;  %v6396_v42 = vld [vmem:[#allocation10 + $0x380] sm:$0xf]  ;;  %v6785_v19 = vor.u32 %v7850_v6, %v6782_v12 }
 0x397   : > { %v1430_v24 = vpack.c.bf16 %v1429_v23, %v1428_v22  ;;  %v5884_v22 = vld [vmem:[#allocation9 + $0x80] sm:$0xf]  ;;  %v7627_v23 = vld [vmem:[#allocation9 + $0x84] sm:$0xf0] }
 0x398   : > { %1752 = vmatpush.bf16.msra.mxu0 %v5845_v45  ;;  %1783 = vmatpush.bf16.msra.mxu2 %v5825_v21  ;;  %v5885_v25 = vor.u32 %v7627_v23, %v5884_v22  ;;  %v7762_v43 = vld [vmem:[#allocation10 + $0x3bc] sm:$0xf0]  ;;  %v7706_v21 = vld [vmem:[#allocation10 + $0x204] sm:$0xf] }
 0x399   : > { %5796 = vmatmul.msk.bf16.vlgmr.msrb.gmra.mxu1 %vm1407_vm8, %v1430_v24  ;;  %v7626_v24 = vld [vmem:[#allocation9 + $0x84] sm:$0xf]  ;;  %v6397_v45 = vor.u32 %v7762_v43, %v6396_v42  ;;  %v6716_v17 = vld [vmem:[#allocation10 + $0x600] sm:$0xf] }
 0x39a   : > { %1766 = vmatpush.bf16.msra.mxu1 %v5909_v48  ;;  %v5889_v27 = vor.u32 %v7626_v24, %v5886_v26  ;;  %v6910_v48 = vld [vmem:[#allocation10 + $0x7c0] sm:$0xf0]  ;;  %v7842_v20 = vld [vmem:[#allocation10 + $0x63c] sm:$0xf0]  ;;  %v6205_v26 = vor.u32 %v7714_v16, %v6204_v15 }
 0x39b   : > { %v6913_v52 = vor.u32 %v7882_v50, %v6910_v48  ;;  %v6206_v22 = vld [vmem:[#allocation10 + $0x240] sm:$0xf0]  ;;  %v7810_v50 = vld [vmem:[#allocation10 + $0x53c] sm:$0xf0] }
 0x39c   : > { %1753 = vmatpush.bf16.msra.mxu0 %v5837_v58  ;;  %1797 = vmatpush.bf16.msra.mxu3 %v5889_v27  ;;  %v7874_v58 = vld [vmem:[#allocation10 + $0x73c] sm:$0xf0]  ;;  %v7834_v23 = vld [vmem:[#allocation10 + $0x604] sm:$0xf]  ;;  %v6717_v27 = vor.u32 %v7842_v20, %v6716_v17 }
 0x39d   : > { %3422 = vmatpush.bf16.msrb.mxu2 %v6401_v49  ;;  %v6845_v53 = vor.u32 %v7874_v58, %v6844_v55  ;;  %v6718_v24 = vld [vmem:[#allocation10 + $0x640] sm:$0xf0]  ;;  %v6588_v49 = vld [vmem:[#allocation10 + $0x500] sm:$0xf] }
 0x39e   : > { %1767 = vmatpush.bf16.msra.mxu1 %v5901_v3  ;;  %v6846_v3 = vld [vmem:[#allocation10 + $0x740] sm:$0xf0]  ;;  %v6012_v15 = vld [vmem:[#allocation10 + $0x80] sm:$0xf] }
 0x39f   : > { %v6849_v8 = vor.u32 %v7866_v62, %v6846_v3  ;;  %v7674_v48 = vld [vmem:[#allocation10 + $0x104] sm:$0xf]  ;;  %v7666_v16 = vld [vmem:[#allocation10 + $0xbc] sm:$0xf0] }
 0x3a0   : > { %1754 = vmatpush.bf16.msra.mxu0 %v5829_v10  ;;  %3436 = vmatpush.bf16.msrb.mxu3 %v6913_v52  ;;  %v7858_v10 = vld [vmem:[#allocation10 + $0x6bc] sm:$0xf0]  ;;  %v7802_v55 = vld [vmem:[#allocation10 + $0x504] sm:$0xf]  ;;  %v6081_v3 = vor.u32 %v7674_v48, %v6078_v54  ;;  %v6852_v54 = vld [vmem:[#allocation10 + $0x708] sm:$0xf] }
 0x3a1   : > { %3423 = vmatpush.bf16.msrb.mxu2 %v6337_v63  ;;  %v6781_v13 = vor.u32 %v7858_v10, %v6780_v0  ;;  %v6590_v58 = vld [vmem:[#allocation10 + $0x540] sm:$0xf0]  ;;  %v6589_v63 = vor.u32 %v7810_v50, %v6588_v49  ;;  %v8218_v10 = vld [vmem:[%s8642_s12 + $0x10] sm:$0xff]  ;;  %v6524_v17 = vld [vmem:[#allocation10 + $0x480] sm:$0xf] }
 0x3a2   : > { %1768 = vmatpush.bf16.msra.mxu1 %v5893_v14  ;;  %v6273_v14 = vor.u32 %v7722_v2, %v6270_v5  ;;  %v6593_v57 = vor.u32 %v7802_v55, %v6590_v58  ;;  %v8219_v5 = vld [vmem:[%s8642_s12 + $0x18] sm:$0xff]  ;;  %v6014_v20 = vld [vmem:[#allocation10 + $0xc0] sm:$0xf0]  ;;  %v6340_v49 = vld [vmem:[#allocation10 + $0x308] sm:$0xf] }
 0x3a3   : > { %v7747_v50 = vld [vmem:[#allocation10 + $0x344] sm:$0xf0]  ;;  %v7739_v58 = vld [vmem:[#allocation10 + $0x30c] sm:$0xf] }
 0x3a4   : > { %1755 = vmatpush.bf16.msra.mxu0 %v5821_v56  ;;  %3437 = vmatpush.bf16.msrb.mxu3 %v6849_v8  ;;  %v7875_v55 = vld [vmem:[#allocation10 + $0x744] sm:$0xf0] }
 0x3a5   : > { %3424 = vmatpush.bf16.msrb.mxu2 %v6273_v14 }
 0x3a6   : > { %1769 = vmatpush.bf16.msra.mxu1 %v5885_v25 }
 0x3a8   : > { %3394 = vmatpush.bf16.msrb.mxu0 %v6397_v45  ;;  %3438 = vmatpush.bf16.msrb.mxu3 %v6785_v19  ;;  %v7658_v19 = vld [vmem:[#allocation10 + $0x84] sm:$0xf] }
 0x3aa   : > { %3408 = vmatpush.bf16.msrb.mxu1 %v6909_v47 }
 0x3ac   : > { %3395 = vmatpush.bf16.msrb.mxu0 %v6333_v59 }
 0x3ae   : > { %3409 = vmatpush.bf16.msrb.mxu1 %v6845_v53 }
 0x3b0   : > { %3396 = vmatpush.bf16.msrb.mxu0 %v6269_v11 }
 0x3b2   : > { %3410 = vmatpush.bf16.msrb.mxu1 %v6781_v13 }
 0x3b4   : > { %3397 = vmatpush.bf16.msrb.mxu0 %v6205_v26  ;;  %v5948_v26 = vld [vmem:[#allocation10] sm:$0xf] }
 0x3b6   : > { %3411 = vmatpush.bf16.msrb.mxu1 %v6717_v27  ;;  %v7650_v27 = vld [vmem:[#allocation10 + $0x3c] sm:$0xf0] }
 0x416   : > { %v1451_v28 = vpop.f32.mrf.mxu1 }
 0x417   : > { %v1456_v29 = vpack.c.bf16 %v1451_v28, %v1451_v28  ;;  %v6209_v28 = vor.u32 %v7706_v21, %v6206_v22  ;;  %v6017_v22 = vor.u32 %v7658_v19, %v6014_v20  ;;  %v7843_v19 = vld [vmem:[#allocation10 + $0x644] sm:$0xf0]  ;;  %v7707_v20 = vld [vmem:[#allocation10 + $0x20c] sm:$0xf] }
 0x419   : > { %1458 = vst [vmem:[#allocation2] sm:$0xf] %v1456_v29  ;;  %v1535_v30 = vpop.f32.mrf.mxu3  ;;  %v6140_v29 = vld [vmem:[#allocation10 + $0x180] sm:$0xf]  ;;  %3425 = vmatpush.bf16.msrb.mxu2 %v6209_v28 }
 0x41a   : > { %v1540_v31 = vpack.c.bf16 %v1535_v30, %v1535_v30  ;;  %v7698_v30 = vld [vmem:[#allocation10 + $0x1bc] sm:$0xf0] }
 0x41b   : > { %v6141_v42 = vor.u32 %v7698_v30, %v6140_v29  ;;  %v6460_v28 = vld [vmem:[#allocation10 + $0x400] sm:$0xf]  ;;  %v5949_v29 = vor.u32 %v7650_v27, %v5948_v26  ;;  %v6148_v27 = vld [vmem:[#allocation10 + $0x188] sm:$0xf] }
 0x41c   : > { %1542 = vst [vmem:[#allocation2 + $0x4] sm:$0xf] %v1540_v31  ;;  %v6652_v31 = vld [vmem:[#allocation10 + $0x580] sm:$0xf] }
 0x41d   : > { %3398 = vmatpush.bf16.msrb.mxu0 %v6141_v42  ;;  %v7778_v30 = vld [vmem:[#allocation10 + $0x43c] sm:$0xf0]  ;;  %v7891_v42 = vld [vmem:[#allocation10 + $0x7c4] sm:$0xf0] }
 0x41e   : > { %v1453_v33 = vpop.f32.mrf.mxu1 }
 0x41f   : > { %v1457_v32 = vpack.c.bf16 %v1453_v33, %v1453_v33 }
 0x420   : > { %v5812_v36 = vld [vmem:[#allocation2] sm:$0xf] }
 0x421   : > { %1459 = vst [vmem:[#allocation2 + $0x8] sm:$0xf] %v1457_v32  ;;  %v1537_v34 = vpop.f32.mrf.mxu3  ;;  %v6721_v32 = vor.u32 %v7834_v23, %v6718_v24  ;;  %3399 = vmatpush.bf16.msrb.mxu0 %v6077_v60  ;;  %v7786_v23 = vld [vmem:[#allocation10 + $0x484] sm:$0xf]  ;;  %v7867_v60 = vld [vmem:[#allocation10 + $0x70c] sm:$0xf] }
 0x422   : > { %v1541_v35 = vpack.c.bf16 %v1537_v34, %v1537_v34  ;;  %v7826_v34 = vld [vmem:[#allocation10 + $0x5bc] sm:$0xf0]  ;;  %v6526_v24 = vld [vmem:[#allocation10 + $0x4c0] sm:$0xf0] }
 0x423   : > { %v7608_v39 = vld [vmem:[#allocation2 + $0x4] sm:$0xf]  ;;  %v6653_v44 = vor.u32 %v7826_v34, %v6652_v31  ;;  %3439 = vmatpush.bf16.msrb.mxu3 %v6721_v32  ;;  %v6461_v32 = vor.u32 %v7778_v30, %v6460_v28  ;;  %v7699_v28 = vld [vmem:[#allocation10 + $0x1c4] sm:$0xf0] }
 0x424   : > { %1543 = vst [vmem:[#allocation2 + $0xc] sm:$0xf] %v1541_v35  ;;  %v7690_v35 = vld [vmem:[#allocation10 + $0x184] sm:$0xf]  ;;  %v6149_v30 = vor.u32 %v7699_v28, %v6148_v27 }
 0x425   : > { %3412 = vmatpush.bf16.msrb.mxu1 %v6653_v44  ;;  %v7642_v31 = vld [vmem:[#allocation10 + $0x4] sm:$0xf] }
 0x428   : > { %v7609_v37 = vld [vmem:[#allocation2 + $0x4] sm:$0xf0] }
 0x429   : > { %v5813_v38 = vor.u32 %v7609_v37, %v5812_v36  ;;  %v6142_v36 = vld [vmem:[#allocation10 + $0x1c0] sm:$0xf0]  ;;  %3413 = vmatpush.bf16.msrb.mxu1 %v6589_v63 }
 0x42a   : > { %v7818_v37 = vld [vmem:[#allocation10 + $0x584] sm:$0xf]  ;;  %v6145_v45 = vor.u32 %v7690_v35, %v6142_v36 }
 0x42b   : > { %1756 = vmatmul.bf16.vlgmr.msra.gmra.mxu0 %v5813_v38  ;;  %1784 = vmatmul.bf16.vlgmr.msra.gmra.mxu2 %v5813_v38  ;;  %v5814_v40 = vld [vmem:[#allocation2 + $0x8] sm:$0xf0]  ;;  %v6654_v38 = vld [vmem:[#allocation10 + $0x5c0] sm:$0xf0] }
 0x42c   : > { %v5817_v41 = vor.u32 %v7608_v39, %v5814_v40  ;;  %v8216_v39 = vld [vmem:[%s8642_s12] sm:$0xff]  ;;  %v6657_v47 = vor.u32 %v7818_v37, %v6654_v38  ;;  %3426 = vmatpush.bf16.msrb.mxu2 %v6145_v45  ;;  %v6404_v37 = vld [vmem:[#allocation10 + $0x388] sm:$0xf]  ;;  %v7755_v45 = vld [vmem:[#allocation10 + $0x38c] sm:$0xf] }
 0x42d   : > { %v7770_v35 = vld [vmem:[#allocation10 + $0x404] sm:$0xf] }
 0x42e   : > { %1770 = vmatmul.bf16.vlgmr.msra.gmra.mxu1 %v5817_v41  ;;  %1798 = vmatmul.bf16.vlgmr.msra.gmra.mxu3 %v5817_v41  ;;  %v6462_v36 = vld [vmem:[#allocation10 + $0x440] sm:$0xf0] }
 0x42f   : > { %3440 = vmatpush.bf16.msrb.mxu3 %v6657_v47  ;;  %v6465_v38 = vor.u32 %v7770_v35, %v6462_v36  ;;  %v6918_v47 = vld [vmem:[#allocation10 + $0x7c8] sm:$0xf0] }
 0x430   : > { %3427 = vmatpush.bf16.msrb.mxu2 %v6081_v3  ;;  %v6921_v48 = vor.u32 %v7883_v9, %v6918_v47  ;;  %v6276_v3 = vld [vmem:[#allocation10 + $0x288] sm:$0xf]  ;;  %v7819_v36 = vld [vmem:[#allocation10 + $0x58c] sm:$0xf] }
 0x431   : > { %v7803_v47 = vld [vmem:[#allocation10 + $0x50c] sm:$0xf] }
 0x433   : > { %3441 = vmatpush.bf16.msrb.mxu3 %v6593_v57  ;;  %v7731_v57 = vld [vmem:[#allocation10 + $0x2c4] sm:$0xf0] }
 0x434   : > { %3428 = vmatpush.bf16.msrb.mxu2 %v6017_v22 }
 0x4a8   : > { %v1757_v18 = vpop.f32.mrf.mxu0 }
 0x4ab   : > { %v1771_v56 = vpop.f32.mrf.mxu1 }
 0x4ac   : > { %v1772_v25 = vadd.f32 %v1771_v56, %v1757_v18  ;;  %v6013_v18 = vor.u32 %v7666_v16, %v6012_v15  ;;  %v7794_v56 = vld [vmem:[#allocation10 + $0x4bc] sm:$0xf0]  ;;  %v6212_v16 = vld [vmem:[#allocation10 + $0x208] sm:$0xf] }
 0x4ad   : > { %v6525_v21 = vor.u32 %v7794_v56, %v6524_v17  ;;  %v7715_v17 = vld [vmem:[#allocation10 + $0x244] sm:$0xf0] }
 0x4ae   : > { %v1785_v33 = vpop.f32.mrf.mxu2  ;;  %v8794_v40 = vadd.f32 %v8216_v39, %v1772_v25  ;;  %3400 = vmatpush.bf16.msrb.mxu0 %v6013_v18  ;;  %v6529_v25 = vor.u32 %v7786_v23, %v6526_v24  ;;  %v7763_v39 = vld [vmem:[#allocation10 + $0x3c4] sm:$0xf0]  ;;  %v6213_v56 = vor.u32 %v7715_v17, %v6212_v16  ;;  %v7835_v24 = vld [vmem:[#allocation10 + $0x60c] sm:$0xf] }
 0x4af   : > { %3414 = vmatpush.bf16.msrb.mxu1 %v6525_v21  ;;  %v6724_v18 = vld [vmem:[#allocation10 + $0x608] sm:$0xf]  ;;  %v6214_v21 = vld [vmem:[#allocation10 + $0x248] sm:$0xf0] }
 0x4b0   : > { %v1759_v59 = vpop.f32.mrf.mxu0  ;;  %v1808_v53 = vmul.f32 %v8794_v40, %v8794_v40  ;;  %3442 = vmatpush.bf16.msrb.mxu3 %v6529_v25  ;;  %v6725_v22 = vor.u32 %v7843_v19, %v6724_v18  ;;  %v6217_v23 = vor.u32 %v7707_v20, %v6214_v21  ;;  %v6726_v25 = vld [vmem:[#allocation10 + $0x648] sm:$0xf0] }
 0x4b1   : > { %v1799_v41 = vpop.f32.mrf.mxu3  ;;  %v6729_v26 = vor.u32 %v7835_v24, %v6726_v25  ;;  %v7771_v16 = vld [vmem:[#allocation10 + $0x40c] sm:$0xf] }
 0x4b2   : > { %v1800_v43 = vadd.f32 %v1799_v41, %v1785_v33  ;;  %v5950_v33 = vld [vmem:[#allocation10 + $0x40] sm:$0xf0]  ;;  %3401 = vmatpush.bf16.msrb.mxu0 %v5949_v29  ;;  %v6916_v41 = vld [vmem:[#allocation10 + $0x788] sm:$0xf]  ;;  %v6470_v17 = vld [vmem:[#allocation10 + $0x448] sm:$0xf0] }
 0x4b3   : > { %v1773_v1 = vpop.f32.mrf.mxu1  ;;  %v5953_v34 = vor.u32 %v7642_v31, %v5950_v33  ;;  %3415 = vmatpush.bf16.msrb.mxu1 %v6461_v32  ;;  %v6917_v44 = vor.u32 %v7891_v42, %v6916_v41  ;;  %v6660_v29 = vld [vmem:[#allocation10 + $0x588] sm:$0xf]  ;;  %v7691_v33 = vld [vmem:[#allocation10 + $0x18c] sm:$0xf] }
 0x4b4   : > { %v8797_v52 = vadd.f32 %v8217_v51, %v1800_v43  ;;  %v1774_v61 = vadd.f32 %v1773_v1, %v1759_v59  ;;  %v6405_v43 = vor.u32 %v7763_v39, %v6404_v37  ;;  %3443 = vmatpush.bf16.msrb.mxu3 %v6465_v38  ;;  %v6409_v1 = vor.u32 %v7755_v45, %v6406_v46  ;;  %v7827_v31 = vld [vmem:[#allocation10 + $0x5c4] sm:$0xf0]  ;;  %v6150_v32 = vld [vmem:[#allocation10 + $0x1c8] sm:$0xf0] }
 0x4b5   : > { %3429 = vmatpush.bf16.msrb.mxu2 %v5953_v34  ;;  %v6341_v51 = vor.u32 %v7747_v50, %v6340_v49  ;;  %v6853_v59 = vor.u32 %v7875_v55, %v6852_v54  ;;  %v6661_v34 = vor.u32 %v7827_v31, %v6660_v29  ;;  %v6153_v35 = vor.u32 %v7691_v33, %v6150_v32  ;;  %v6662_v37 = vld [vmem:[#allocation10 + $0x5c8] sm:$0xf0]  ;;  %v6084_v39 = vld [vmem:[#allocation10 + $0x108] sm:$0xf] }
 0x4b6   : > { %v1809_v62 = vmul.f32 %v8797_v52, %v8797_v52  ;;  %v1787_v8 = vpop.f32.mrf.mxu2  ;;  %v8804_v2 = vadd.f32 %v8218_v10, %v1774_v61  ;;  %3450 = vmatpush.bf16.msra.mxu0 %v6405_v43  ;;  %v6854_v61 = vld [vmem:[#allocation10 + $0x748] sm:$0xf0]  ;;  %v6665_v38 = vor.u32 %v7819_v36, %v6662_v37  ;;  %v7683_v41 = vld [vmem:[#allocation10 + $0x144] sm:$0xf0] }
 0x4b7   : > { %3464 = vmatpush.bf16.msra.mxu1 %v6917_v44  ;;  %v6857_v63 = vor.u32 %v7867_v60, %v6854_v61  ;;  %v7723_v10 = vld [vmem:[#allocation10 + $0x28c] sm:$0xf]  ;;  %v6596_v42 = vld [vmem:[#allocation10 + $0x508] sm:$0xf]  ;;  %v6085_v43 = vor.u32 %v7683_v41, %v6084_v39 }
 0x4b8   : > { %v1812_v7 = vadd.f32 %v1809_v62, %v1808_v53  ;;  %v1810_v12 = vmul.f32 %v8804_v2, %v8804_v2  ;;  %v6342_v53 = vld [vmem:[#allocation10 + $0x348] sm:$0xf0]  ;;  %3492 = vmatpush.bf16.msra.mxu3 %v6921_v48  ;;  %v7811_v44 = vld [vmem:[#allocation10 + $0x544] sm:$0xf0] }
 0x4b9   : > { %v1801_v0 = vpop.f32.mrf.mxu3  ;;  %3478 = vmatpush.bf16.msra.mxu2 %v6409_v1  ;;  %v6345_v62 = vor.u32 %v7739_v58, %v6342_v53  ;;  %v7675_v45 = vld [vmem:[#allocation10 + $0x10c] sm:$0xf]  ;;  %v6597_v9 = vor.u32 %v7811_v44, %v6596_v42  ;;  %v6020_v48 = vld [vmem:[#allocation10 + $0x88] sm:$0xf]  ;;  %v7764_v44 = vld [vmem:[#allocation10 + $0x3cc] sm:$0xf0] }
 0x4ba   : > { %v1802_v11 = vadd.f32 %v1801_v0, %v1787_v8  ;;  %1813 = vadd.xlane.f32.xlu1 %v1812_v7  ;;  %v6788_v7 = vld [vmem:[#allocation10 + $0x688] sm:$0xf]  ;;  %3451 = vmatpush.bf16.msra.mxu0 %v6341_v51  ;;  %v6277_v8 = vor.u32 %v7731_v57, %v6276_v3  ;;  %v6086_v46 = vld [vmem:[#allocation10 + $0x148] sm:$0xf0] }
 0x4bb   : > { %3465 = vmatpush.bf16.msra.mxu1 %v6853_v59  ;;  %v7859_v0 = vld [vmem:[#allocation10 + $0x6c4] sm:$0xf0]  ;;  %v6089_v1 = vor.u32 %v7675_v45, %v6086_v46  ;;  %v6598_v49 = vld [vmem:[#allocation10 + $0x548] sm:$0xf0]  ;;  %v6924_v45 = vld [vmem:[#allocation10 + $0x790] sm:$0xf] }
 0x4bc   : > { %v8807_v6 = vadd.f32 %v8219_v5, %v1802_v11  ;;  %v6278_v11 = vld [vmem:[#allocation10 + $0x2c8] sm:$0xf0]  ;;  %v6789_v5 = vor.u32 %v7859_v0, %v6788_v7  ;;  %3493 = vmatpush.bf16.msra.mxu3 %v6857_v63  ;;  %v6601_v50 = vor.u32 %v7803_v47, %v6598_v49  ;;  %v7667_v51 = vld [vmem:[#allocation10 + $0xc4] sm:$0xf0]  ;;  %v7892_v46 = vld [vmem:[#allocation10 + $0x7cc] sm:$0xf0] }
 0x4bd   : > { %3479 = vmatpush.bf16.msra.mxu2 %v6345_v62  ;;  %v6532_v54 = vld [vmem:[#allocation10 + $0x488] sm:$0xf]  ;;  %v6021_v55 = vor.u32 %v7667_v51, %v6020_v48  ;;  %v7659_v59 = vld [vmem:[#allocation10 + $0x8c] sm:$0xf]  ;;  %v6414_v48 = vld [vmem:[#allocation10 + $0x3d0] sm:$0xf0] }
 0x4be   : > { %v1811_v13 = vmul.f32 %v8807_v6, %v8807_v6  ;;  %3452 = vmatpush.bf16.msra.mxu0 %v6277_v8  ;;  %v7795_v58 = vld [vmem:[#allocation10 + $0x4c4] sm:$0xf0]  ;;  %v6022_v53 = vld [vmem:[#allocation10 + $0xc8] sm:$0xf0]  ;;  %v7884_v51 = vld [vmem:[#allocation10 + $0x794] sm:$0xf] }
 0x4bf   : > { %3466 = vmatpush.bf16.msra.mxu1 %v6789_v5  ;;  %v6533_v61 = vor.u32 %v7795_v58, %v6532_v54  ;;  %v6025_v62 = vor.u32 %v7659_v59, %v6022_v53  ;;  %v7787_v63 = vld [vmem:[#allocation10 + $0x48c] sm:$0xf]  ;;  %v5956_v8 = vld [vmem:[#allocation10 + $0x8] sm:$0xf]  ;;  %v6926_v54 = vld [vmem:[#allocation10 + $0x7d0] sm:$0xf0]  ;;  %v6925_v53 = vor.u32 %v7892_v46, %v6924_v45 }
 0x4c0   : > { %v1815_v14 = vadd.f32 %v1811_v13, %v1810_v12  ;;  %v6281_v12 = vor.u32 %v7723_v10, %v6278_v11  ;;  %v7851_v13 = vld [vmem:[#allocation10 + $0x68c] sm:$0xf]  ;;  %v7651_v0 = vld [vmem:[#allocation10 + $0x44] sm:$0xf0] }
 0x4c1   : > { %v6534_v3 = vld [vmem:[#allocation10 + $0x4c8] sm:$0xf0]  ;;  %v6468_v10 = vld [vmem:[#allocation10 + $0x408] sm:$0xf]  ;;  %v5957_v5 = vor.u32 %v7651_v0, %v5956_v8  ;;  %v6350_v8 = vld [vmem:[#allocation10 + $0x350] sm:$0xf0] }
 0x4c2   : > { %1816 = vadd.xlane.f32.xlu0 %v1815_v14  ;;  %v6790_v14 = vld [vmem:[#allocation10 + $0x6c8] sm:$0xf0]  ;;  %3480 = vmatpush.bf16.msra.mxu2 %v6281_v12  ;;  %v6537_v7 = vor.u32 %v7787_v63, %v6534_v3  ;;  %v7779_v12 = vld [vmem:[#allocation10 + $0x444] sm:$0xf0]  ;;  %v6929_v63 = vor.u32 %v7884_v51, %v6926_v54  ;;  %v6860_v3 = vld [vmem:[#allocation10 + $0x710] sm:$0xf] }
 0x4c3   : > { %v6793_v15 = vor.u32 %v7851_v13, %v6790_v14  ;;  %3453 = vmatpush.bf16.msra.mxu0 %v6213_v56  ;;  %3467 = vmatpush.bf16.msra.mxu1 %v6725_v22  ;;  %v7643_v13 = vld [vmem:[#allocation10 + $0xc] sm:$0xf]  ;;  %v6469_v14 = vor.u32 %v7779_v12, %v6468_v10  ;;  %v6473_v56 = vor.u32 %v7771_v16, %v6470_v17  ;;  %v7868_v0 = vld [vmem:[#allocation10 + $0x714] sm:$0xf]  ;;  %v6284_v12 = vld [vmem:[#allocation10 + $0x290] sm:$0xf] }
 0x4c4   : > { %v6862_v10 = vld [vmem:[#allocation10 + $0x750] sm:$0xf0]  ;;  %v6796_v16 = vld [vmem:[#allocation10 + $0x690] sm:$0xf] }
 0x4c5   : > { %3494 = vmatpush.bf16.msra.mxu3 %v6793_v15  ;;  %v5958_v15 = vld [vmem:[#allocation10 + $0x48] sm:$0xf0]  ;;  %v7860_v17 = vld [vmem:[#allocation10 + $0x6cc] sm:$0xf0]  ;;  %v7676_v51 = vld [vmem:[#allocation10 + $0x114] sm:$0xf] }
 0x4c6   : > { %3481 = vmatpush.bf16.msra.mxu2 %v6217_v23  ;;  %v5961_v18 = vor.u32 %v7643_v13, %v5958_v15  ;;  %v7732_v13 = vld [vmem:[#allocation10 + $0x2cc] sm:$0xf0]  ;;  %v6865_v15 = vor.u32 %v7868_v0, %v6862_v10  ;;  %v6094_v54 = vld [vmem:[#allocation10 + $0x150] sm:$0xf0] }
 0x4c7   : > { %3454 = vmatpush.bf16.msra.mxu0 %v6149_v30  ;;  %3468 = vmatpush.bf16.msra.mxu1 %v6661_v34  ;;  %v7660_v0 = vld [vmem:[#allocation10 + $0x94] sm:$0xf] }
 0x4c8   : > { %v6030_v10 = vld [vmem:[#allocation10 + $0xd0] sm:$0xf0] }
 0x4c9   : > { %3495 = vmatpush.bf16.msra.mxu3 %v6729_v26 }
 0x4ca   : > { %3482 = vmatpush.bf16.msra.mxu2 %v6153_v35 }
 0x4cb   : > { %3455 = vmatpush.bf16.msra.mxu0 %v6085_v43  ;;  %3469 = vmatpush.bf16.msra.mxu1 %v6597_v9  ;;  %v6412_v43 = vld [vmem:[#allocation10 + $0x390] sm:$0xf]  ;;  %v7756_v9 = vld [vmem:[#allocation10 + $0x394] sm:$0xf] }
 0x4cc   : > { %v6413_v59 = vor.u32 %v7764_v44, %v6412_v43  ;;  %v7820_v43 = vld [vmem:[#allocation10 + $0x594] sm:$0xf] }
 0x4cd   : > { %3496 = vmatpush.bf16.msra.mxu3 %v6665_v38  ;;  %v6670_v44 = vld [vmem:[#allocation10 + $0x5d0] sm:$0xf0] }
 0x4ce   : > { %3483 = vmatpush.bf16.msra.mxu2 %v6089_v1 }
 0x4cf   : > { %3456 = vmatpush.bf16.msra.mxu0 %v6021_v55  ;;  %3470 = vmatpush.bf16.msra.mxu1 %v6533_v61  ;;  %v7748_v61 = vld [vmem:[#allocation10 + $0x34c] sm:$0xf0] }
 0x4d1   : > { %3497 = vmatpush.bf16.msra.mxu3 %v6601_v50 }
 0x4d2   : > { %3484 = vmatpush.bf16.msra.mxu2 %v6025_v62  ;;  %v6417_v62 = vor.u32 %v7756_v9, %v6414_v48  ;;  %v6092_v9 = vld [vmem:[#allocation10 + $0x110] sm:$0xf] }
 0x4d3   : > { %3457 = vmatpush.bf16.msra.mxu0 %v5957_v5  ;;  %3471 = vmatpush.bf16.msra.mxu1 %v6469_v14  ;;  %v7812_v48 = vld [vmem:[#allocation10 + $0x54c] sm:$0xf0] }
 0x4d5   : > { %3498 = vmatpush.bf16.msra.mxu3 %v6537_v7  ;;  %v7740_v7 = vld [vmem:[#allocation10 + $0x314] sm:$0xf] }
 0x4d6   : > { %3485 = vmatpush.bf16.msra.mxu2 %v5961_v18  ;;  %v6353_v14 = vor.u32 %v7740_v7, %v6350_v8  ;;  %v7724_v18 = vld [vmem:[#allocation10 + $0x294] sm:$0xf]  ;;  %v6540_v7 = vld [vmem:[#allocation10 + $0x490] sm:$0xf] }
 0x4d7   : > { %v7796_v8 = vld [vmem:[#allocation10 + $0x4cc] sm:$0xf0] }
 0x4d9   : > { %3499 = vmatpush.bf16.msra.mxu3 %v6473_v56  ;;  %v6286_v56 = vld [vmem:[#allocation10 + $0x2d0] sm:$0xf0] }
 0x52d   : > { %v1814_v60 = vpop.xlane.xlu1 %1813 }
 0x52e   : > { %v1818_v57 = vmul.f32 %v1814_v60, %v8683_v4  ;;  %v6348_v60 = vld [vmem:[#allocation10 + $0x310] sm:$0xf] }
 0x530   : > { %v1820_v11 = vadd.f32 1e-06, %v1818_v57  ;;  %v7876_v57 = vld [vmem:[#allocation10 + $0x74c] sm:$0xf0] }
 0x531   : > { %v6861_v5 = vor.u32 %v7876_v57, %v6860_v3  ;;  %v6097_v3 = vor.u32 %v7676_v51, %v6094_v54  ;;  %v6804_v51 = vld [vmem:[#allocation10 + $0x698] sm:$0xf] }
 0x532   : > { %8148 = vrsqrt.f32 %v1820_v11  ;;  %vm1828_vm11 = vweird.f32 %v1820_v11  ;;  %v7861_v54 = vld [vmem:[#allocation10 + $0x6d4] sm:$0xf0] }
 0x535   : > { %v1817_v19 = vpop.xlane.xlu0 %1816 }
 0x536   : > { %v1819_v20 = vmul.f32 %v1817_v19, %v8683_v4  ;;  %v1846_v4 = vld [vmem:[%s9514_s4] sm:$0x3]  ;;  %v7852_v19 = vld [vmem:[#allocation10 + $0x694] sm:$0xf] }
 0x537   : > { %v1848_v35 = vperm.slane %v1846_v4, 0  ;;  %v1849_v36 = vperm.slane %v1846_v4, 1  ;;  %v6734_v4 = vld [vmem:[#allocation10 + $0x650] sm:$0xf0] }
 0x538   : > { %v8149_v21 = vpop.eup %8148  ;;  %v1821_v22 = vadd.f32 1e-06, %v1819_v20  ;;  %v6798_v20 = vld [vmem:[#allocation10 + $0x6d0] sm:$0xf0] }
 0x539   : > { %v1823_v23 = vmul.f32 %v8149_v21, %v1820_v11  ;;  %vm1829_vm10 = vweird.f32 %v8149_v21  ;;  %v6349_v11 = vor.u32 %v7748_v61, %v6348_v60 }
 0x53a   : > { %8150 = vrsqrt.f32 %v1821_v22  ;;  %vm1830_vm12 = vmor %vm1828_vm11, %vm1829_vm10  ;;  %vm1838_vm14 = vweird.f32 %v1821_v22 }
 0x53b   : > { %v1824_v24 = vmul.f32 %v8149_v21, %v1823_v23  ;;  %v6220_v23 = vld [vmem:[#allocation10 + $0x210] sm:$0xf] }
 0x53d   : > { %v1825_v25 = vmul.f32 0.5, %v1824_v24  ;;  %v7716_v24 = vld [vmem:[#allocation10 + $0x24c] sm:$0xf0] }
 0x53f   : > { %v1826_v26 = vsub.f32 1.5, %v1825_v25  ;;  %v6289_v25 = vor.u32 %v7724_v18, %v6286_v56  ;;  %v6033_v18 = vor.u32 %v7660_v0, %v6030_v10  ;;  %v6740_v0 = vld [vmem:[#allocation10 + $0x618] sm:$0xf] }
 0x540   : > { %v8151_v27 = vpop.eup %8150  ;;  %v7845_v10 = vld [vmem:[#allocation10 + $0x654] sm:$0xf0] }
 0x541   : > { %v1833_v28 = vmul.f32 %v8151_v27, %v1821_v22  ;;  %v1827_v29 = vmul.f32 %v8149_v21, %v1826_v26  ;;  %vm1839_vm13 = vweird.f32 %v8151_v27  ;;  %v6797_v22 = vor.u32 %v7860_v17, %v6796_v16  ;;  %v6476_v16 = vld [vmem:[#allocation10 + $0x410] sm:$0xf] }
 0x542   : > { %vm1840_vm15 = vmor %vm1838_vm14, %vm1839_vm13  ;;  %v6801_v26 = vor.u32 %v7852_v19, %v6798_v20  ;;  %v7780_v17 = vld [vmem:[#allocation10 + $0x44c] sm:$0xf0]  ;;  %v7644_v19 = vld [vmem:[#allocation10 + $0x14] sm:$0xf] }
 0x543   : > { %v1834_v30 = vmul.f32 %v8151_v27, %v1833_v28  ;;  %v1831_v33 = vsel %vm1830_vm12, %v8149_v21, %v1827_v29  ;;  %v6285_v21 = vor.u32 %v7732_v13, %v6284_v12  ;;  %v7844_v28 = vld [vmem:[#allocation10 + $0x64c] sm:$0xf0]  ;;  %v7708_v29 = vld [vmem:[#allocation10 + $0x214] sm:$0xf] }
 0x544   : > { %v1842_v37 = vmul.f32 %v1831_v33, %v8794_v40  ;;  %v1843_v38 = vmul.f32 %v1831_v33, %v8797_v52  ;;  %v6221_v33 = vor.u32 %v7716_v24, %v6220_v23  ;;  %v5964_v12 = vld [vmem:[#allocation10 + $0x10] sm:$0xf]  ;;  %v5966_v20 = vld [vmem:[#allocation10 + $0x50] sm:$0xf0]  ;;  %v6420_v23 = vld [vmem:[#allocation10 + $0x398] sm:$0xf] }
 0x545   : > { %v1835_v31 = vmul.f32 0.5, %v1834_v30  ;;  %v6222_v30 = vld [vmem:[#allocation10 + $0x250] sm:$0xf0]  ;;  %v7765_v24 = vld [vmem:[#allocation10 + $0x3d4] sm:$0xf0] }
 0x546   : > { %v1852_v1 = vmul.f32 %v1848_v35, %v1842_v37  ;;  %v1853_v47 = vmul.f32 %v1849_v36, %v1843_v38  ;;  %v6668_v38 = vld [vmem:[#allocation10 + $0x590] sm:$0xf] }
 0x547   : > { %v1836_v32 = vsub.f32 1.5, %v1835_v31  ;;  %v7836_v31 = vld [vmem:[#allocation10 + $0x614] sm:$0xf] }
 0x548   : > { %v6737_v37 = vor.u32 %v7836_v31, %v6734_v4  ;;  %v7885_v31 = vld [vmem:[#allocation10 + $0x79c] sm:$0xf] }
 0x549   : > { %v1837_v34 = vmul.f32 %v8151_v27, %v1836_v32  ;;  %v6934_v4 = vld [vmem:[#allocation10 + $0x7d8] sm:$0xf0] }
 0x54b   : > { %v1841_v39 = vsel %vm1840_vm15, %v8151_v27, %v1837_v34  ;;  %v6732_v27 = vld [vmem:[#allocation10 + $0x610] sm:$0xf] }
 0x54c   : > { %v1844_v41 = vmul.f32 %v1841_v39, %v8804_v2  ;;  %v1845_v42 = vmul.f32 %v1841_v39, %v8807_v6  ;;  %v6733_v32 = vor.u32 %v7844_v28, %v6732_v27  ;;  %v6156_v34 = vld [vmem:[#allocation10 + $0x190] sm:$0xf]  ;;  %v7757_v27 = vld [vmem:[#allocation10 + $0x39c] sm:$0xf] }
 0x54d   : > { %v7828_v39 = vld [vmem:[#allocation10 + $0x5cc] sm:$0xf0] }
 0x54e   : > { %v1854_v49 = vmul.f32 %v1848_v35, %v1844_v41  ;;  %v1855_v50 = vmul.f32 %v1849_v36, %v1845_v42  ;;  %v7700_v35 = vld [vmem:[#allocation10 + $0x1cc] sm:$0xf0]  ;;  %v6225_v36 = vor.u32 %v7708_v29, %v6222_v30  ;;  %v7692_v41 = vld [vmem:[#allocation10 + $0x194] sm:$0xf]  ;;  %v6669_v46 = vor.u32 %v7828_v39, %v6668_v38  ;;  %v6422_v30 = vld [vmem:[#allocation10 + $0x3d8] sm:$0xf0] }
 0x54f   : > { %v6158_v42 = vld [vmem:[#allocation10 + $0x1d0] sm:$0xf0]  ;;  %v6157_v45 = vor.u32 %v7700_v35, %v6156_v34  ;;  %v6477_v29 = vor.u32 %v7780_v17, %v6476_v16  ;;  %v6421_v34 = vor.u32 %v7765_v24, %v6420_v23  ;;  %v6425_v38 = vor.u32 %v7757_v27, %v6422_v30  ;;  %v6164_v16 = vld [vmem:[#allocation10 + $0x198] sm:$0xf]  ;;  %v7821_v23 = vld [vmem:[#allocation10 + $0x59c] sm:$0xf] }
 0x550   : > { %v8822_v55 = vpack.c.bf16 %v1854_v49, %v1852_v1  ;;  %v8824_v58 = vpack.c.bf16 %v1855_v50, %v1853_v47  ;;  %v7684_v1 = vld [vmem:[#allocation10 + $0x14c] sm:$0xf0]  ;;  %v6161_v47 = vor.u32 %v7692_v41, %v6158_v42  ;;  %v6673_v49 = vor.u32 %v7820_v43, %v6670_v44  ;;  %v6868_v41 = vld [vmem:[#allocation10 + $0x718] sm:$0xf]  ;;  %v7741_v43 = vld [vmem:[#allocation10 + $0x31c] sm:$0xf] }
 0x551   : > { %v6604_v50 = vld [vmem:[#allocation10 + $0x510] sm:$0xf]  ;;  %v6093_v60 = vor.u32 %v7684_v1, %v6092_v9  ;;  %v6937_v39 = vor.u32 %v7885_v31, %v6934_v4  ;;  %v7877_v42 = vld [vmem:[#allocation10 + $0x754] sm:$0xf0]  ;;  %v6358_v44 = vld [vmem:[#allocation10 + $0x358] sm:$0xf0] }
 0x552   : > { %3402 = vmatmul.bf16.vlgmr.msrb.gmra.mxu0 %v8822_v55  ;;  %3416 = vmatmul.bf16.vlgmr.msrb.gmra.mxu1 %v8824_v58  ;;  %v6605_v61 = vor.u32 %v7812_v48, %v6604_v50  ;;  %v6869_v1 = vor.u32 %v7877_v42, %v6868_v41  ;;  %v6361_v50 = vor.u32 %v7741_v43, %v6358_v44  ;;  %v7701_v17 = vld [vmem:[#allocation10 + $0x1d4] sm:$0xf0]  ;;  %v6678_v24 = vld [vmem:[#allocation10 + $0x5d8] sm:$0xf0] }
 0x553   : > { %3430 = vmatmul.bf16.vlgmr.msrb.gmra.mxu2 %v8822_v55  ;;  %3444 = vmatmul.bf16.vlgmr.msrb.gmra.mxu3 %v8824_v58  ;;  %v6100_v27 = vld [vmem:[#allocation10 + $0x118] sm:$0xf]  ;;  %v6681_v30 = vor.u32 %v7821_v23, %v6678_v24  ;;  %v7742_v23 = vld [vmem:[#allocation10 + $0x324] sm:$0xf] }
 0x554   : > { %3506 = vmatpush.bf16.msrb.mxu0 %v6413_v59  ;;  %3520 = vmatpush.bf16.msrb.mxu1 %v6925_v53  ;;  %v7804_v59 = vld [vmem:[#allocation10 + $0x514] sm:$0xf]  ;;  %v6612_v31 = vld [vmem:[#allocation10 + $0x518] sm:$0xf]  ;;  %v6366_v24 = vld [vmem:[#allocation10 + $0x360] sm:$0xf0] }
 0x555   : > { %3534 = vmatpush.bf16.msrb.mxu2 %v6417_v62  ;;  %3548 = vmatpush.bf16.msrb.mxu3 %v6929_v63  ;;  %v6606_v53 = vld [vmem:[#allocation10 + $0x550] sm:$0xf0]  ;;  %v6028_v62 = vld [vmem:[#allocation10 + $0x90] sm:$0xf]  ;;  %v7813_v4 = vld [vmem:[#allocation10 + $0x554] sm:$0xf0] }
 0x556   : > { %v7668_v63 = vld [vmem:[#allocation10 + $0xcc] sm:$0xf0]  ;;  %v6609_v57 = vor.u32 %v7804_v59, %v6606_v53  ;;  %v7725_v59 = vld [vmem:[#allocation10 + $0x29c] sm:$0xf]  ;;  %v6548_v43 = vld [vmem:[#allocation10 + $0x498] sm:$0xf] }
 0x557   : > { %v6029_v13 = vor.u32 %v7668_v63, %v6028_v62  ;;  %v6294_v53 = vld [vmem:[#allocation10 + $0x2d8] sm:$0xf0]  ;;  %v6805_v63 = vor.u32 %v7861_v54, %v6804_v51  ;;  %v7797_v44 = vld [vmem:[#allocation10 + $0x4d4] sm:$0xf0] }
 0x558   : > { %3507 = vmatpush.bf16.msrb.mxu0 %v6349_v11  ;;  %3521 = vmatpush.bf16.msrb.mxu1 %v6861_v5  ;;  %v7788_v11 = vld [vmem:[#allocation10 + $0x494] sm:$0xf]  ;;  %v6484_v51 = vld [vmem:[#allocation10 + $0x418] sm:$0xf] }
 0x559   : > { %3535 = vmatpush.bf16.msrb.mxu2 %v6353_v14  ;;  %3549 = vmatpush.bf16.msrb.mxu3 %v6865_v15  ;;  %v6542_v5 = vld [vmem:[#allocation10 + $0x4d0] sm:$0xf0]  ;;  %v6541_v14 = vor.u32 %v7796_v8, %v6540_v7  ;;  %v7652_v15 = vld [vmem:[#allocation10 + $0x4c] sm:$0xf0]  ;;  %v6297_v7 = vor.u32 %v7725_v59, %v6294_v53  ;;  %v7781_v54 = vld [vmem:[#allocation10 + $0x454] sm:$0xf0] }
 0x55a   : > { %v6545_v56 = vor.u32 %v7788_v11, %v6542_v5  ;;  %v5965_v28 = vor.u32 %v7652_v15, %v5964_v12  ;;  %v7709_v11 = vld [vmem:[#allocation10 + $0x21c] sm:$0xf]  ;;  %v6741_v15 = vor.u32 %v7845_v10, %v6740_v0  ;;  %v7758_v0 = vld [vmem:[#allocation10 + $0x3a4] sm:$0xf] }
 0x55b   : > { %v6230_v5 = vld [vmem:[#allocation10 + $0x258] sm:$0xf0] }
 0x55c   : > { %3508 = vmatpush.bf16.msrb.mxu0 %v6285_v21  ;;  %3522 = vmatpush.bf16.msrb.mxu1 %v6797_v22  ;;  %v7772_v21 = vld [vmem:[#allocation10 + $0x414] sm:$0xf]  ;;  %v7837_v12 = vld [vmem:[#allocation10 + $0x61c] sm:$0xf] }
 0x55d   : > { %3536 = vmatpush.bf16.msrb.mxu2 %v6289_v25  ;;  %3550 = vmatpush.bf16.msrb.mxu3 %v6801_v26  ;;  %v6478_v22 = vld [vmem:[#allocation10 + $0x450] sm:$0xf0]  ;;  %v6932_v25 = vld [vmem:[#allocation10 + $0x798] sm:$0xf] }
 0x55e   : > { %v7893_v26 = vld [vmem:[#allocation10 + $0x7d4] sm:$0xf0] }
 0x55f   : > { %v6933_v35 = vor.u32 %v7893_v26, %v6932_v25  ;;  %v6165_v25 = vor.u32 %v7701_v17, %v6164_v16 }
 0x560   : > { %3509 = vmatpush.bf16.msrb.mxu0 %v6221_v33  ;;  %3523 = vmatpush.bf16.msrb.mxu1 %v6733_v32  ;;  %v5969_v33 = vor.u32 %v7644_v19, %v5966_v20  ;;  %v6481_v32 = vor.u32 %v7772_v21, %v6478_v22  ;;  %v6676_v19 = vld [vmem:[#allocation10 + $0x598] sm:$0xf]  ;;  %v7693_v21 = vld [vmem:[#allocation10 + $0x19c] sm:$0xf] }
 0x561   : > { %3537 = vmatpush.bf16.msrb.mxu2 %v6225_v36  ;;  %3551 = vmatpush.bf16.msrb.mxu3 %v6737_v37  ;;  %v6356_v36 = vld [vmem:[#allocation10 + $0x318] sm:$0xf]  ;;  %v6166_v22 = vld [vmem:[#allocation10 + $0x1d8] sm:$0xf0] }
 0x562   : > { %3458 = vmatmul.bf16.vlgmr.msra.gmra.mxu0 %v8822_v55  ;;  %3472 = vmatmul.bf16.vlgmr.msra.gmra.mxu1 %v8824_v58  ;;  %v7749_v37 = vld [vmem:[#allocation10 + $0x354] sm:$0xf0] }
 0x563   : > { %3486 = vmatmul.bf16.vlgmr.msra.gmra.mxu2 %v8822_v55  ;;  %3500 = vmatmul.bf16.vlgmr.msra.gmra.mxu3 %v8824_v58  ;;  %v6357_v9 = vor.u32 %v7749_v37, %v6356_v36  ;;  %v7829_v20 = vld [vmem:[#allocation10 + $0x5d4] sm:$0xf0]  ;;  %v6613_v37 = vor.u32 %v7813_v4, %v6612_v31  ;;  %v6369_v31 = vor.u32 %v7742_v23, %v6366_v24  ;;  %v6556_v23 = vld [vmem:[#allocation10 + $0x4a0] sm:$0xf] }
 0x564   : > { %3510 = vmatpush.bf16.msrb.mxu0 %v6157_v45  ;;  %3524 = vmatpush.bf16.msrb.mxu1 %v6669_v46  ;;  %v7869_v45 = vld [vmem:[#allocation10 + $0x71c] sm:$0xf]  ;;  %v6677_v26 = vor.u32 %v7829_v20, %v6676_v19  ;;  %v7798_v24 = vld [vmem:[#allocation10 + $0x4dc] sm:$0xf0] }
 0x565   : > { %3538 = vmatpush.bf16.msrb.mxu2 %v6161_v47  ;;  %3552 = vmatpush.bf16.msrb.mxu3 %v6673_v49  ;;  %v6870_v46 = vld [vmem:[#allocation10 + $0x758] sm:$0xf0]  ;;  %v6292_v47 = vld [vmem:[#allocation10 + $0x298] sm:$0xf] }
 0x566   : > { %v7733_v49 = vld [vmem:[#allocation10 + $0x2d4] sm:$0xf0]  ;;  %v6873_v48 = vor.u32 %v7869_v45, %v6870_v46  ;;  %v7661_v45 = vld [vmem:[#allocation10 + $0x9c] sm:$0xf] }
 0x567   : > { %v6293_v62 = vor.u32 %v7733_v49, %v6292_v47  ;;  %v6038_v46 = vld [vmem:[#allocation10 + $0xd8] sm:$0xf0]  ;;  %v5972_v47 = vld [vmem:[#allocation10 + $0x18] sm:$0xf] }
 0x568   : > { %3511 = vmatpush.bf16.msrb.mxu0 %v6093_v60  ;;  %3525 = vmatpush.bf16.msrb.mxu1 %v6605_v61  ;;  %v7853_v60 = vld [vmem:[#allocation10 + $0x69c] sm:$0xf]  ;;  %v6041_v59 = vor.u32 %v7661_v45, %v6038_v46  ;;  %v6748_v45 = vld [vmem:[#allocation10 + $0x620] sm:$0xf] }
 0x569   : > { %3539 = vmatpush.bf16.msrb.mxu2 %v6097_v3  ;;  %3553 = vmatpush.bf16.msrb.mxu3 %v6609_v57  ;;  %v6806_v61 = vld [vmem:[#allocation10 + $0x6d8] sm:$0xf0]  ;;  %v6228_v3 = vld [vmem:[#allocation10 + $0x218] sm:$0xf]  ;;  %v7846_v46 = vld [vmem:[#allocation10 + $0x65c] sm:$0xf0] }
 0x56a   : > { %v7717_v57 = vld [vmem:[#allocation10 + $0x254] sm:$0xf0]  ;;  %v6809_v8 = vor.u32 %v7853_v60, %v6806_v61  ;;  %v7645_v60 = vld [vmem:[#allocation10 + $0x1c] sm:$0xf] }
 0x56b   : > { %v5974_v61 = vld [vmem:[#allocation10 + $0x58] sm:$0xf0] }
 0x56c   : > { %3512 = vmatpush.bf16.msrb.mxu0 %v6029_v13  ;;  %3526 = vmatpush.bf16.msrb.mxu1 %v6541_v14  ;;  %v6742_v13 = vld [vmem:[#allocation10 + $0x658] sm:$0xf0]  ;;  %v6229_v14 = vor.u32 %v7717_v57, %v6228_v3  ;;  %v6428_v3 = vld [vmem:[#allocation10 + $0x3a0] sm:$0xf] }
 0x56d   : > { %3540 = vmatpush.bf16.msrb.mxu2 %v6033_v18  ;;  %3554 = vmatpush.bf16.msrb.mxu3 %v6545_v56  ;;  %v6233_v18 = vor.u32 %v7709_v11, %v6230_v5  ;;  %v6745_v56 = vor.u32 %v7837_v12, %v6742_v13  ;;  %v7766_v57 = vld [vmem:[#allocation10 + $0x3dc] sm:$0xf0]  ;;  %v6485_v11 = vor.u32 %v7781_v54, %v6484_v51  ;;  %v6430_v5 = vld [vmem:[#allocation10 + $0x3e0] sm:$0xf0] }
 0x56e   : > { %v7886_v12 = vld [vmem:[#allocation10 + $0x7a4] sm:$0xf]  ;;  %v6429_v16 = vor.u32 %v7766_v57, %v6428_v3  ;;  %v6433_v19 = vor.u32 %v7758_v0, %v6430_v5  ;;  %v6172_v51 = vld [vmem:[#allocation10 + $0x1a0] sm:$0xf] }
 0x56f   : > { %v6942_v13 = vld [vmem:[#allocation10 + $0x7e0] sm:$0xf0]  ;;  %v7702_v54 = vld [vmem:[#allocation10 + $0x1dc] sm:$0xf0] }
 0x570   : > { %3513 = vmatpush.bf16.msrb.mxu0 %v5965_v28  ;;  %3527 = vmatpush.bf16.msrb.mxu1 %v6477_v29  ;;  %v7685_v28 = vld [vmem:[#allocation10 + $0x154] sm:$0xf0]  ;;  %v6169_v29 = vor.u32 %v7693_v21, %v6166_v22  ;;  %v6945_v20 = vor.u32 %v7886_v12, %v6942_v13  ;;  %v6876_v21 = vld [vmem:[#allocation10 + $0x720] sm:$0xf]  ;;  %v7822_v3 = vld [vmem:[#allocation10 + $0x5a4] sm:$0xf] }
 0x571   : > { %3541 = vmatpush.bf16.msrb.mxu2 %v5969_v33  ;;  %3555 = vmatpush.bf16.msrb.mxu3 %v6481_v32  ;;  %v7677_v33 = vld [vmem:[#allocation10 + $0x11c] sm:$0xf]  ;;  %v6101_v36 = vor.u32 %v7685_v28, %v6100_v27  ;;  %v7878_v22 = vld [vmem:[#allocation10 + $0x75c] sm:$0xf0]  ;;  %v6686_v57 = vld [vmem:[#allocation10 + $0x5e0] sm:$0xf0] }
 0x572   : > { %v6102_v32 = vld [vmem:[#allocation10 + $0x158] sm:$0xf0]  ;;  %v6877_v28 = vor.u32 %v7878_v22, %v6876_v21  ;;  %v6108_v0 = vld [vmem:[#allocation10 + $0x120] sm:$0xf]  ;;  %v6689_v5 = vor.u32 %v7822_v3, %v6686_v57  ;;  %v7743_v3 = vld [vmem:[#allocation10 + $0x32c] sm:$0xf] }
 0x573   : > { %3514 = vmatmul.bf16.vlgmr.msrb.gmra.mxu0 %v8822_v55  ;;  %3528 = vmatmul.bf16.vlgmr.msrb.gmra.mxu1 %v8824_v58  ;;  %v6105_v41 = vor.u32 %v7677_v33, %v6102_v32  ;;  %v6812_v33 = vld [vmem:[#allocation10 + $0x6a0] sm:$0xf]  ;;  %v6374_v57 = vld [vmem:[#allocation10 + $0x368] sm:$0xf0] }
 0x574   : > { %3562 = vmatpush.bf16.msra.mxu0 %v6421_v34  ;;  %3576 = vmatpush.bf16.msra.mxu1 %v6933_v35  ;;  %v7805_v34 = vld [vmem:[#allocation10 + $0x51c] sm:$0xf]  ;;  %v7862_v32 = vld [vmem:[#allocation10 + $0x6dc] sm:$0xf0] }
 0x575   : > { %3590 = vmatpush.bf16.msra.mxu2 %v6425_v38  ;;  %3604 = vmatpush.bf16.msra.mxu3 %v6937_v39  ;;  %v6614_v35 = vld [vmem:[#allocation10 + $0x558] sm:$0xf0]  ;;  %v6036_v38 = vld [vmem:[#allocation10 + $0x98] sm:$0xf]  ;;  %v6620_v12 = vld [vmem:[#allocation10 + $0x520] sm:$0xf] }
 0x576   : > { %3542 = vmatmul.bf16.vlgmr.msrb.gmra.mxu2 %v8822_v55  ;;  %3556 = vmatmul.bf16.vlgmr.msrb.gmra.mxu3 %v8824_v58  ;;  %v7669_v39 = vld [vmem:[#allocation10 + $0xd4] sm:$0xf0]  ;;  %v6617_v42 = vor.u32 %v7805_v34, %v6614_v35  ;;  %v7726_v34 = vld [vmem:[#allocation10 + $0x2a4] sm:$0xf]  ;;  %v7814_v13 = vld [vmem:[#allocation10 + $0x55c] sm:$0xf0] }
 0x577   : > { %v6037_v49 = vor.u32 %v7669_v39, %v6036_v38  ;;  %v6302_v35 = vld [vmem:[#allocation10 + $0x2e0] sm:$0xf0]  ;;  %v6813_v39 = vor.u32 %v7862_v32, %v6812_v33  ;;  %v6492_v33 = vld [vmem:[#allocation10 + $0x420] sm:$0xf] }
 0x578   : > { %3563 = vmatpush.bf16.msra.mxu0 %v6357_v9  ;;  %3577 = vmatpush.bf16.msra.mxu1 %v6869_v1  ;;  %v7789_v9 = vld [vmem:[#allocation10 + $0x49c] sm:$0xf]  ;;  %v7782_v32 = vld [vmem:[#allocation10 + $0x45c] sm:$0xf0] }
 0x579   : > { %3591 = vmatpush.bf16.msra.mxu2 %v6361_v50  ;;  %3605 = vmatpush.bf16.msra.mxu3 %v6873_v48  ;;  %v6550_v1 = vld [vmem:[#allocation10 + $0x4d8] sm:$0xf0]  ;;  %v6549_v50 = vor.u32 %v7797_v44, %v6548_v43  ;;  %v7653_v48 = vld [vmem:[#allocation10 + $0x54] sm:$0xf0]  ;;  %v6305_v43 = vor.u32 %v7726_v34, %v6302_v35 }
 0x57a   : > { %v6553_v53 = vor.u32 %v7789_v9, %v6550_v1  ;;  %v5973_v10 = vor.u32 %v7653_v48, %v5972_v47  ;;  %v7710_v9 = vld [vmem:[#allocation10 + $0x224] sm:$0xf]  ;;  %v6749_v48 = vor.u32 %v7846_v46, %v6748_v45  ;;  %v7759_v45 = vld [vmem:[#allocation10 + $0x3ac] sm:$0xf] }
 0x57b   : > { %v6238_v1 = vld [vmem:[#allocation10 + $0x260] sm:$0xf0] }
 0x57c   : > { %3564 = vmatpush.bf16.msra.mxu0 %v6293_v62  ;;  %3578 = vmatpush.bf16.msra.mxu1 %v6805_v63  ;;  %v7773_v62 = vld [vmem:[#allocation10 + $0x41c] sm:$0xf]  ;;  %v7838_v47 = vld [vmem:[#allocation10 + $0x624] sm:$0xf] }
 0x57d   : > { %3592 = vmatpush.bf16.msra.mxu2 %v6297_v7  ;;  %3606 = vmatpush.bf16.msra.mxu3 %v6809_v8  ;;  %v6486_v63 = vld [vmem:[#allocation10 + $0x458] sm:$0xf0]  ;;  %v6940_v7 = vld [vmem:[#allocation10 + $0x7a0] sm:$0xf] }
 0x57e   : > { %v7894_v8 = vld [vmem:[#allocation10 + $0x7dc] sm:$0xf0] }
 0x57f   : > { %v6941_v17 = vor.u32 %v7894_v8, %v6940_v7  ;;  %v6173_v7 = vor.u32 %v7702_v54, %v6172_v51 }
 0x580   : > { %3565 = vmatpush.bf16.msra.mxu0 %v6229_v14  ;;  %3579 = vmatpush.bf16.msra.mxu1 %v6741_v15  ;;  %v5977_v14 = vor.u32 %v7645_v60, %v5974_v61  ;;  %v6489_v15 = vor.u32 %v7773_v62, %v6486_v63  ;;  %v6684_v60 = vld [vmem:[#allocation10 + $0x5a0] sm:$0xf]  ;;  %v7694_v62 = vld [vmem:[#allocation10 + $0x1a4] sm:$0xf] }
 0x581   : > { %3593 = vmatpush.bf16.msra.mxu2 %v6233_v18  ;;  %3607 = vmatpush.bf16.msra.mxu3 %v6745_v56  ;;  %v6364_v18 = vld [vmem:[#allocation10 + $0x320] sm:$0xf]  ;;  %v6174_v63 = vld [vmem:[#allocation10 + $0x1e0] sm:$0xf0] }
 0x582   : > { %v7750_v56 = vld [vmem:[#allocation10 + $0x35c] sm:$0xf0] }
 0x583   : > { %v6365_v27 = vor.u32 %v7750_v56, %v6364_v18  ;;  %v7830_v61 = vld [vmem:[#allocation10 + $0x5dc] sm:$0xf0]  ;;  %v6621_v56 = vor.u32 %v7814_v13, %v6620_v12  ;;  %v6377_v12 = vor.u32 %v7743_v3, %v6374_v57  ;;  %v6564_v3 = vld [vmem:[#allocation10 + $0x4a8] sm:$0xf] }
 0x584   : > { %3566 = vmatpush.bf16.msra.mxu0 %v6165_v25  ;;  %3580 = vmatpush.bf16.msra.mxu1 %v6677_v26  ;;  %v7870_v25 = vld [vmem:[#allocation10 + $0x724] sm:$0xf]  ;;  %v6685_v8 = vor.u32 %v7830_v61, %v6684_v60  ;;  %v7799_v57 = vld [vmem:[#allocation10 + $0x4e4] sm:$0xf0] }
 0x585   : > { %3594 = vmatpush.bf16.msra.mxu2 %v6169_v29  ;;  %3608 = vmatpush.bf16.msra.mxu3 %v6681_v30  ;;  %v6878_v26 = vld [vmem:[#allocation10 + $0x760] sm:$0xf0]  ;;  %v6300_v29 = vld [vmem:[#allocation10 + $0x2a0] sm:$0xf] }
 0x586   : > { %v7734_v30 = vld [vmem:[#allocation10 + $0x2dc] sm:$0xf0]  ;;  %v6881_v4 = vor.u32 %v7870_v25, %v6878_v26  ;;  %v7662_v25 = vld [vmem:[#allocation10 + $0xa4] sm:$0xf] }
 0x587   : > { %v6301_v38 = vor.u32 %v7734_v30, %v6300_v29  ;;  %v6046_v26 = vld [vmem:[#allocation10 + $0xe0] sm:$0xf0]  ;;  %v5980_v29 = vld [vmem:[#allocation10 + $0x20] sm:$0xf] }
 0x588   : > { %3567 = vmatpush.bf16.msra.mxu0 %v6101_v36  ;;  %3581 = vmatpush.bf16.msra.mxu1 %v6613_v37  ;;  %v7854_v36 = vld [vmem:[#allocation10 + $0x6a4] sm:$0xf]  ;;  %v6049_v34 = vor.u32 %v7662_v25, %v6046_v26  ;;  %v6756_v25 = vld [vmem:[#allocation10 + $0x628] sm:$0xf] }
 0x589   : > { %3595 = vmatpush.bf16.msra.mxu2 %v6105_v41  ;;  %3609 = vmatpush.bf16.msra.mxu3 %v6617_v42  ;;  %v6814_v37 = vld [vmem:[#allocation10 + $0x6e0] sm:$0xf0]  ;;  %v6236_v41 = vld [vmem:[#allocation10 + $0x220] sm:$0xf]  ;;  %v7847_v26 = vld [vmem:[#allocation10 + $0x664] sm:$0xf0] }
 0x58a   : > { %v7718_v42 = vld [vmem:[#allocation10 + $0x25c] sm:$0xf0]  ;;  %v6817_v44 = vor.u32 %v7854_v36, %v6814_v37  ;;  %v7646_v36 = vld [vmem:[#allocation10 + $0x24] sm:$0xf] }
 0x58b   : > { %v5982_v37 = vld [vmem:[#allocation10 + $0x60] sm:$0xf0] }
 0x58c   : > { %3568 = vmatpush.bf16.msra.mxu0 %v6037_v49  ;;  %3582 = vmatpush.bf16.msra.mxu1 %v6549_v50  ;;  %v6750_v49 = vld [vmem:[#allocation10 + $0x660] sm:$0xf0]  ;;  %v6237_v50 = vor.u32 %v7718_v42, %v6236_v41  ;;  %v6436_v41 = vld [vmem:[#allocation10 + $0x3a8] sm:$0xf] }
 0x58d   : > { %3596 = vmatpush.bf16.msra.mxu2 %v6041_v59  ;;  %3610 = vmatpush.bf16.msra.mxu3 %v6553_v53  ;;  %v6241_v59 = vor.u32 %v7710_v9, %v6238_v1  ;;  %v6753_v53 = vor.u32 %v7838_v47, %v6750_v49  ;;  %v7767_v42 = vld [vmem:[#allocation10 + $0x3e4] sm:$0xf0]  ;;  %v6493_v9 = vor.u32 %v7782_v32, %v6492_v33  ;;  %v6438_v1 = vld [vmem:[#allocation10 + $0x3e8] sm:$0xf0] }
 0x58e   : > { %v7887_v47 = vld [vmem:[#allocation10 + $0x7ac] sm:$0xf]  ;;  %v6437_v51 = vor.u32 %v7767_v42, %v6436_v41  ;;  %v6441_v60 = vor.u32 %v7759_v45, %v6438_v1  ;;  %v6180_v33 = vld [vmem:[#allocation10 + $0x1a8] sm:$0xf] }
 0x58f   : > { %v6950_v49 = vld [vmem:[#allocation10 + $0x7e8] sm:$0xf0]  ;;  %v7703_v32 = vld [vmem:[#allocation10 + $0x1e4] sm:$0xf0] }
 0x590   : > { %3569 = vmatpush.bf16.msra.mxu0 %v5973_v10  ;;  %3583 = vmatpush.bf16.msra.mxu1 %v6485_v11  ;;  %v7686_v10 = vld [vmem:[#allocation10 + $0x15c] sm:$0xf0]  ;;  %v6177_v11 = vor.u32 %v7694_v62, %v6174_v63  ;;  %v6953_v61 = vor.u32 %v7887_v47, %v6950_v49  ;;  %v6884_v62 = vld [vmem:[#allocation10 + $0x728] sm:$0xf]  ;;  %v7823_v41 = vld [vmem:[#allocation10 + $0x5ac] sm:$0xf] }
 0x591   : > { %3597 = vmatpush.bf16.msra.mxu2 %v5977_v14  ;;  %3611 = vmatpush.bf16.msra.mxu3 %v6489_v15  ;;  %v7678_v14 = vld [vmem:[#allocation10 + $0x124] sm:$0xf]  ;;  %v6109_v18 = vor.u32 %v7686_v10, %v6108_v0  ;;  %v7879_v63 = vld [vmem:[#allocation10 + $0x764] sm:$0xf0]  ;;  %v6694_v42 = vld [vmem:[#allocation10 + $0x5e8] sm:$0xf0] }
 0x592   : > { %v6110_v15 = vld [vmem:[#allocation10 + $0x160] sm:$0xf0]  ;;  %v6885_v10 = vor.u32 %v7879_v63, %v6884_v62  ;;  %v6116_v45 = vld [vmem:[#allocation10 + $0x128] sm:$0xf]  ;;  %v6697_v1 = vor.u32 %v7823_v41, %v6694_v42  ;;  %v7744_v41 = vld [vmem:[#allocation10 + $0x334] sm:$0xf] }
 0x593   : > { %3570 = vmatmul.bf16.vlgmr.msra.gmra.mxu0 %v8822_v55  ;;  %3584 = vmatmul.bf16.vlgmr.msra.gmra.mxu1 %v8824_v58  ;;  %v6113_v21 = vor.u32 %v7678_v14, %v6110_v15  ;;  %v6820_v14 = vld [vmem:[#allocation10 + $0x6a8] sm:$0xf]  ;;  %v6382_v42 = vld [vmem:[#allocation10 + $0x370] sm:$0xf0] }
 0x594   : > { %3618 = vmatpush.bf16.msrb.mxu0 %v6429_v16  ;;  %3632 = vmatpush.bf16.msrb.mxu1 %v6941_v17  ;;  %v7806_v16 = vld [vmem:[#allocation10 + $0x524] sm:$0xf]  ;;  %v7863_v15 = vld [vmem:[#allocation10 + $0x6e4] sm:$0xf0] }
 0x595   : > { %3646 = vmatpush.bf16.msrb.mxu2 %v6433_v19  ;;  %3660 = vmatpush.bf16.msrb.mxu3 %v6945_v20  ;;  %v6622_v17 = vld [vmem:[#allocation10 + $0x560] sm:$0xf0]  ;;  %v6044_v19 = vld [vmem:[#allocation10 + $0xa0] sm:$0xf]  ;;  %v6628_v47 = vld [vmem:[#allocation10 + $0x528] sm:$0xf] }
 0x596   : > { %3598 = vmatmul.bf16.vlgmr.msra.gmra.mxu2 %v8822_v55  ;;  %3612 = vmatmul.bf16.vlgmr.msra.gmra.mxu3 %v8824_v58  ;;  %v7670_v20 = vld [vmem:[#allocation10 + $0xdc] sm:$0xf0]  ;;  %v6625_v22 = vor.u32 %v7806_v16, %v6622_v17  ;;  %v7727_v16 = vld [vmem:[#allocation10 + $0x2ac] sm:$0xf]  ;;  %v7815_v49 = vld [vmem:[#allocation10 + $0x564] sm:$0xf0] }
 0x597   : > { %v6045_v30 = vor.u32 %v7670_v20, %v6044_v19  ;;  %v6310_v17 = vld [vmem:[#allocation10 + $0x2e8] sm:$0xf0]  ;;  %v6821_v20 = vor.u32 %v7863_v15, %v6820_v14  ;;  %v6500_v14 = vld [vmem:[#allocation10 + $0x428] sm:$0xf] }
 0x598   : > { %3619 = vmatpush.bf16.msrb.mxu0 %v6365_v27  ;;  %3633 = vmatpush.bf16.msrb.mxu1 %v6877_v28  ;;  %v7790_v27 = vld [vmem:[#allocation10 + $0x4a4] sm:$0xf]  ;;  %v7783_v15 = vld [vmem:[#allocation10 + $0x464] sm:$0xf0] }
 0x599   : > { %3647 = vmatpush.bf16.msrb.mxu2 %v6369_v31  ;;  %3661 = vmatpush.bf16.msrb.mxu3 %v6881_v4  ;;  %v6558_v28 = vld [vmem:[#allocation10 + $0x4e0] sm:$0xf0]  ;;  %v6557_v31 = vor.u32 %v7798_v24, %v6556_v23  ;;  %v7654_v4 = vld [vmem:[#allocation10 + $0x5c] sm:$0xf0]  ;;  %v6313_v23 = vor.u32 %v7727_v16, %v6310_v17 }
 0x59a   : > { %v6561_v35 = vor.u32 %v7790_v27, %v6558_v28  ;;  %v5981_v46 = vor.u32 %v7654_v4, %v5980_v29  ;;  %v7711_v27 = vld [vmem:[#allocation10 + $0x22c] sm:$0xf]  ;;  %v6757_v4 = vor.u32 %v7847_v26, %v6756_v25  ;;  %v7760_v25 = vld [vmem:[#allocation10 + $0x3b4] sm:$0xf] }
 0x59b   : > { %v6246_v28 = vld [vmem:[#allocation10 + $0x268] sm:$0xf0] }
 0x59c   : > { %3620 = vmatpush.bf16.msrb.mxu0 %v6301_v38  ;;  %3634 = vmatpush.bf16.msrb.mxu1 %v6813_v39  ;;  %v7774_v38 = vld [vmem:[#allocation10 + $0x424] sm:$0xf]  ;;  %v7839_v29 = vld [vmem:[#allocation10 + $0x62c] sm:$0xf] }
 0x59d   : > { %3648 = vmatpush.bf16.msrb.mxu2 %v6305_v43  ;;  %3662 = vmatpush.bf16.msrb.mxu3 %v6817_v44  ;;  %v6494_v39 = vld [vmem:[#allocation10 + $0x460] sm:$0xf0]  ;;  %v6948_v43 = vld [vmem:[#allocation10 + $0x7a8] sm:$0xf] }
 0x59e   : > { %v7895_v44 = vld [vmem:[#allocation10 + $0x7e4] sm:$0xf0] }
 0x59f   : > { %v6949_v54 = vor.u32 %v7895_v44, %v6948_v43  ;;  %v6181_v43 = vor.u32 %v7703_v32, %v6180_v33 }
 0x5a0   : > { %3621 = vmatpush.bf16.msrb.mxu0 %v6237_v50  ;;  %3635 = vmatpush.bf16.msrb.mxu1 %v6749_v48  ;;  %v5985_v50 = vor.u32 %v7646_v36, %v5982_v37  ;;  %v6497_v48 = vor.u32 %v7774_v38, %v6494_v39  ;;  %v6692_v36 = vld [vmem:[#allocation10 + $0x5a8] sm:$0xf]  ;;  %v7695_v38 = vld [vmem:[#allocation10 + $0x1ac] sm:$0xf] }
 0x5a1   : > { %3649 = vmatpush.bf16.msrb.mxu2 %v6241_v59  ;;  %3663 = vmatpush.bf16.msrb.mxu3 %v6753_v53  ;;  %v6372_v59 = vld [vmem:[#allocation10 + $0x328] sm:$0xf]  ;;  %v6182_v39 = vld [vmem:[#allocation10 + $0x1e8] sm:$0xf0] }
 0x5a2   : > { %v7751_v53 = vld [vmem:[#allocation10 + $0x364] sm:$0xf0] }
 0x5a3   : > { %v6373_v0 = vor.u32 %v7751_v53, %v6372_v59  ;;  %v7831_v37 = vld [vmem:[#allocation10 + $0x5e4] sm:$0xf0]  ;;  %v6629_v53 = vor.u32 %v7815_v49, %v6628_v47  ;;  %v6385_v47 = vor.u32 %v7744_v41, %v6382_v42 }
 0x5a4   : > { %3622 = vmatpush.bf16.msrb.mxu0 %v6173_v7  ;;  %3636 = vmatpush.bf16.msrb.mxu1 %v6685_v8  ;;  %v7871_v7 = vld [vmem:[#allocation10 + $0x72c] sm:$0xf]  ;;  %v6693_v44 = vor.u32 %v7831_v37, %v6692_v36 }
 0x5a5   : > { %3650 = vmatpush.bf16.msrb.mxu2 %v6177_v11  ;;  %3664 = vmatpush.bf16.msrb.mxu3 %v6689_v5  ;;  %v6886_v8 = vld [vmem:[#allocation10 + $0x768] sm:$0xf0]  ;;  %v6308_v11 = vld [vmem:[#allocation10 + $0x2a8] sm:$0xf] }
 0x5a6   : > { %v7735_v5 = vld [vmem:[#allocation10 + $0x2e4] sm:$0xf0]  ;;  %v6889_v13 = vor.u32 %v7871_v7, %v6886_v8  ;;  %v7663_v7 = vld [vmem:[#allocation10 + $0xac] sm:$0xf] }
 0x5a7   : > { %v6309_v19 = vor.u32 %v7735_v5, %v6308_v11  ;;  %v6054_v8 = vld [vmem:[#allocation10 + $0xe8] sm:$0xf0]  ;;  %v5988_v11 = vld [vmem:[#allocation10 + $0x28] sm:$0xf] }
 0x5a8   : > { %3623 = vmatpush.bf16.msrb.mxu0 %v6109_v18  ;;  %3637 = vmatpush.bf16.msrb.mxu1 %v6621_v56  ;;  %v7855_v18 = vld [vmem:[#allocation10 + $0x6ac] sm:$0xf]  ;;  %v6057_v16 = vor.u32 %v7663_v7, %v6054_v8 }
 0x5a9   : > { %3651 = vmatpush.bf16.msrb.mxu2 %v6113_v21  ;;  %3665 = vmatpush.bf16.msrb.mxu3 %v6625_v22  ;;  %v6822_v56 = vld [vmem:[#allocation10 + $0x6e8] sm:$0xf0]  ;;  %v6244_v21 = vld [vmem:[#allocation10 + $0x228] sm:$0xf] }
 0x5aa   : > { %v7719_v22 = vld [vmem:[#allocation10 + $0x264] sm:$0xf0]  ;;  %v6825_v24 = vor.u32 %v7855_v18, %v6822_v56  ;;  %v7647_v18 = vld [vmem:[#allocation10 + $0x2c] sm:$0xf] }
 0x5ab   : > { %v5990_v56 = vld [vmem:[#allocation10 + $0x68] sm:$0xf0] }
 0x5ac   : > { %3624 = vmatpush.bf16.msrb.mxu0 %v6045_v30  ;;  %3638 = vmatpush.bf16.msrb.mxu1 %v6557_v31  ;;  %v6758_v30 = vld [vmem:[#allocation10 + $0x668] sm:$0xf0]  ;;  %v6245_v31 = vor.u32 %v7719_v22, %v6244_v21  ;;  %v6444_v21 = vld [vmem:[#allocation10 + $0x3b0] sm:$0xf] }
 0x5ad   : > { %3652 = vmatpush.bf16.msrb.mxu2 %v6049_v34  ;;  %3666 = vmatpush.bf16.msrb.mxu3 %v6561_v35  ;;  %v6249_v34 = vor.u32 %v7711_v27, %v6246_v28  ;;  %v6761_v35 = vor.u32 %v7839_v29, %v6758_v30  ;;  %v7768_v22 = vld [vmem:[#allocation10 + $0x3ec] sm:$0xf0]  ;;  %v6501_v27 = vor.u32 %v7783_v15, %v6500_v14  ;;  %v6446_v28 = vld [vmem:[#allocation10 + $0x3f0] sm:$0xf0] }
 0x5ae   : > { %v7888_v29 = vld [vmem:[#allocation10 + $0x7b4] sm:$0xf]  ;;  %v6445_v33 = vor.u32 %v7768_v22, %v6444_v21  ;;  %v6449_v36 = vor.u32 %v7760_v25, %v6446_v28 }
 0x5af   : > { %v6958_v30 = vld [vmem:[#allocation10 + $0x7f0] sm:$0xf0] }
 0x5b0   : > { %3625 = vmatpush.bf16.msrb.mxu0 %v5981_v46  ;;  %3639 = vmatpush.bf16.msrb.mxu1 %v6493_v9  ;;  %v7687_v46 = vld [vmem:[#allocation10 + $0x164] sm:$0xf0]  ;;  %v6185_v9 = vor.u32 %v7695_v38, %v6182_v39  ;;  %v6961_v37 = vor.u32 %v7888_v29, %v6958_v30  ;;  %v6892_v38 = vld [vmem:[#allocation10 + $0x730] sm:$0xf]  ;;  %v7696_v21 = vld [vmem:[#allocation10 + $0x1b4] sm:$0xf] }
 0x5b1   : > { %3653 = vmatpush.bf16.msrb.mxu2 %v5985_v50  ;;  %3667 = vmatpush.bf16.msrb.mxu3 %v6497_v48  ;;  %v7679_v50 = vld [vmem:[#allocation10 + $0x12c] sm:$0xf]  ;;  %v6117_v59 = vor.u32 %v7687_v46, %v6116_v45  ;;  %v7880_v39 = vld [vmem:[#allocation10 + $0x76c] sm:$0xf0]  ;;  %v7824_v25 = vld [vmem:[#allocation10 + $0x5b4] sm:$0xf] }
 0x5b2   : > { %v6118_v48 = vld [vmem:[#allocation10 + $0x168] sm:$0xf0]  ;;  %v6893_v46 = vor.u32 %v7880_v39, %v6892_v38  ;;  %v7808_v38 = vld [vmem:[#allocation10 + $0x534] sm:$0xf] }
 0x5b3   : > { %3626 = vmatmul.bf16.vlgmr.msrb.gmra.mxu0 %v8822_v55  ;;  %3640 = vmatmul.bf16.vlgmr.msrb.gmra.mxu1 %v8824_v58  ;;  %v6121_v62 = vor.u32 %v7679_v50, %v6118_v48  ;;  %v6828_v50 = vld [vmem:[#allocation10 + $0x6b0] sm:$0xf]  ;;  %v6638_v39 = vld [vmem:[#allocation10 + $0x570] sm:$0xf0] }
 0x5b4   : > { %3674 = vmatpush.bf16.msra.mxu0 %v6437_v51  ;;  %3688 = vmatpush.bf16.msra.mxu1 %v6949_v54  ;;  %v7807_v51 = vld [vmem:[#allocation10 + $0x52c] sm:$0xf]  ;;  %v7864_v48 = vld [vmem:[#allocation10 + $0x6ec] sm:$0xf0] }
 0x5b5   : > { %3702 = vmatpush.bf16.msra.mxu2 %v6441_v60  ;;  %3716 = vmatpush.bf16.msra.mxu3 %v6953_v61  ;;  %v6630_v54 = vld [vmem:[#allocation10 + $0x568] sm:$0xf0]  ;;  %v6052_v60 = vld [vmem:[#allocation10 + $0xa8] sm:$0xf] }
 0x5b6   : > { %3654 = vmatmul.bf16.vlgmr.msrb.gmra.mxu2 %v8822_v55  ;;  %3668 = vmatmul.bf16.vlgmr.msrb.gmra.mxu3 %v8824_v58  ;;  %v7671_v61 = vld [vmem:[#allocation10 + $0xe4] sm:$0xf0]  ;;  %v6633_v63 = vor.u32 %v7807_v51, %v6630_v54  ;;  %v7728_v51 = vld [vmem:[#allocation10 + $0x2b4] sm:$0xf] }
 0x5b7   : > { %v6053_v5 = vor.u32 %v7671_v61, %v6052_v60  ;;  %v6318_v54 = vld [vmem:[#allocation10 + $0x2f0] sm:$0xf0] }
 0x5b8   : > { %3675 = vmatpush.bf16.msra.mxu0 %v6373_v0  ;;  %3689 = vmatpush.bf16.msra.mxu1 %v6885_v10  ;;  %v7791_v0 = vld [vmem:[#allocation10 + $0x4ac] sm:$0xf]  ;;  %v6321_v7 = vor.u32 %v7728_v51, %v6318_v54  ;;  %v7792_v51 = vld [vmem:[#allocation10 + $0x4b4] sm:$0xf] }
 0x5b9   : > { %3703 = vmatpush.bf16.msra.mxu2 %v6377_v12  ;;  %3717 = vmatpush.bf16.msra.mxu3 %v6889_v13  ;;  %v6566_v10 = vld [vmem:[#allocation10 + $0x4e8] sm:$0xf0]  ;;  %v6565_v12 = vor.u32 %v7799_v57, %v6564_v3  ;;  %v7655_v13 = vld [vmem:[#allocation10 + $0x64] sm:$0xf0]  ;;  %v6252_v3 = vld [vmem:[#allocation10 + $0x230] sm:$0xf] }
 0x5ba   : > { %v6569_v17 = vor.u32 %v7791_v0, %v6566_v10  ;;  %v5989_v26 = vor.u32 %v7655_v13, %v5988_v11  ;;  %v7720_v57 = vld [vmem:[#allocation10 + $0x26c] sm:$0xf0]  ;;  %v7712_v11 = vld [vmem:[#allocation10 + $0x234] sm:$0xf] }
 0x5bb   : > { %v6764_v0 = vld [vmem:[#allocation10 + $0x630] sm:$0xf]  ;;  %v6766_v13 = vld [vmem:[#allocation10 + $0x670] sm:$0xf0]  ;;  %v6253_v14 = vor.u32 %v7720_v57, %v6252_v3 }
 0x5bc   : > { %3676 = vmatpush.bf16.msra.mxu0 %v6309_v19  ;;  %3690 = vmatpush.bf16.msra.mxu1 %v6821_v20  ;;  %v7775_v19 = vld [vmem:[#allocation10 + $0x42c] sm:$0xf]  ;;  %v7848_v10 = vld [vmem:[#allocation10 + $0x66c] sm:$0xf0]  ;;  %v6574_v54 = vld [vmem:[#allocation10 + $0x4f0] sm:$0xf0] }
 0x5bd   : > { %3704 = vmatpush.bf16.msra.mxu2 %v6313_v23  ;;  %3718 = vmatpush.bf16.msra.mxu3 %v6825_v24  ;;  %v6502_v20 = vld [vmem:[#allocation10 + $0x468] sm:$0xf0]  ;;  %v6956_v23 = vld [vmem:[#allocation10 + $0x7b0] sm:$0xf]  ;;  %v6765_v15 = vor.u32 %v7848_v10, %v6764_v0  ;;  %v6577_v10 = vor.u32 %v7792_v51, %v6574_v54  ;;  %v6836_v51 = vld [vmem:[#allocation10 + $0x6b8] sm:$0xf] }
 0x5be   : > { %v7896_v24 = vld [vmem:[#allocation10 + $0x7ec] sm:$0xf0]  ;;  %v7865_v54 = vld [vmem:[#allocation10 + $0x6f4] sm:$0xf0] }
 0x5bf   : > { %v6957_v32 = vor.u32 %v7896_v24, %v6956_v23  ;;  %v6190_v24 = vld [vmem:[#allocation10 + $0x1f0] sm:$0xf0]  ;;  %v7656_v57 = vld [vmem:[#allocation10 + $0x6c] sm:$0xf0] }
 0x5c0   : > { %3677 = vmatpush.bf16.msra.mxu0 %v6245_v31  ;;  %3691 = vmatpush.bf16.msra.mxu1 %v6757_v4  ;;  %v5993_v31 = vor.u32 %v7647_v18, %v5990_v56  ;;  %v6505_v4 = vor.u32 %v7775_v19, %v6502_v20  ;;  %v6700_v19 = vld [vmem:[#allocation10 + $0x5b0] sm:$0xf] }
 0x5c1   : > { %3705 = vmatpush.bf16.msra.mxu2 %v6249_v34  ;;  %3719 = vmatpush.bf16.msra.mxu3 %v6761_v35  ;;  %v6380_v34 = vld [vmem:[#allocation10 + $0x330] sm:$0xf] }
 0x5c2   : > { %v7752_v35 = vld [vmem:[#allocation10 + $0x36c] sm:$0xf0] }
 0x5c3   : > { %v6381_v45 = vor.u32 %v7752_v35, %v6380_v34  ;;  %v7832_v20 = vld [vmem:[#allocation10 + $0x5ec] sm:$0xf0] }
 0x5c4   : > { %3678 = vmatpush.bf16.msra.mxu0 %v6181_v43  ;;  %3692 = vmatpush.bf16.msra.mxu1 %v6693_v44  ;;  %v7872_v43 = vld [vmem:[#allocation10 + $0x734] sm:$0xf]  ;;  %v6701_v30 = vor.u32 %v7832_v20, %v6700_v19  ;;  %v6636_v34 = vld [vmem:[#allocation10 + $0x530] sm:$0xf]  ;;  %v6454_v20 = vld [vmem:[#allocation10 + $0x3f8] sm:$0xf0] }
 0x5c5   : > { %3706 = vmatpush.bf16.msra.mxu2 %v6185_v9  ;;  %3720 = vmatpush.bf16.msra.mxu3 %v6697_v1  ;;  %v6894_v44 = vld [vmem:[#allocation10 + $0x770] sm:$0xf0]  ;;  %v6316_v9 = vld [vmem:[#allocation10 + $0x2b0] sm:$0xf] }
 0x5c6   : > { %v7736_v1 = vld [vmem:[#allocation10 + $0x2ec] sm:$0xf0]  ;;  %v6897_v49 = vor.u32 %v7872_v43, %v6894_v44 }
 0x5c7   : > { %v7816_v35 = vld [vmem:[#allocation10 + $0x56c] sm:$0xf0] }
 0x5c8   : > { %3679 = vmatpush.bf16.msra.mxu0 %v6117_v59  ;;  %3693 = vmatpush.bf16.msra.mxu1 %v6629_v53  ;;  %v7856_v59 = vld [vmem:[#allocation10 + $0x6b4] sm:$0xf]  ;;  %v6637_v42 = vor.u32 %v7816_v35, %v6636_v34  ;;  %v6060_v43 = vld [vmem:[#allocation10 + $0xb0] sm:$0xf] }
 0x5c9   : > { %3707 = vmatpush.bf16.msra.mxu2 %v6121_v62  ;;  %3721 = vmatpush.bf16.msra.mxu3 %v6633_v63  ;;  %v6830_v53 = vld [vmem:[#allocation10 + $0x6f0] sm:$0xf0]  ;;  %v6317_v62 = vor.u32 %v7736_v1, %v6316_v9  ;;  %v6829_v63 = vor.u32 %v7864_v48, %v6828_v50  ;;  %v7672_v44 = vld [vmem:[#allocation10 + $0xec] sm:$0xf0] }
 0x5ca   : > { %v6833_v8 = vor.u32 %v7856_v59, %v6830_v53  ;;  %v6572_v9 = vld [vmem:[#allocation10 + $0x4b0] sm:$0xf]  ;;  %v6062_v48 = vld [vmem:[#allocation10 + $0xf0] sm:$0xf0] }
 0x5cb   : > { %v7800_v1 = vld [vmem:[#allocation10 + $0x4ec] sm:$0xf0] }
 0x5cc   : > { %3680 = vmatpush.bf16.msra.mxu0 %v6053_v5  ;;  %3694 = vmatpush.bf16.msra.mxu1 %v6565_v12  ;;  %v6254_v5 = vld [vmem:[#allocation10 + $0x270] sm:$0xf0]  ;;  %v6573_v3 = vor.u32 %v7800_v1, %v6572_v9  ;;  %v6324_v9 = vld [vmem:[#allocation10 + $0x2b8] sm:$0xf] }
 0x5cd   : > { %3708 = vmatpush.bf16.msra.mxu2 %v6057_v16  ;;  %3722 = vmatpush.bf16.msra.mxu3 %v6569_v17  ;;  %v7840_v12 = vld [vmem:[#allocation10 + $0x634] sm:$0xf]  ;;  %v6188_v16 = vld [vmem:[#allocation10 + $0x1b0] sm:$0xf]  ;;  %v6257_v18 = vor.u32 %v7712_v11, %v6254_v5  ;;  %v7737_v1 = vld [vmem:[#allocation10 + $0x2f4] sm:$0xf0] }
 0x5ce   : > { %v7704_v17 = vld [vmem:[#allocation10 + $0x1ec] sm:$0xf0]  ;;  %v6769_v56 = vor.u32 %v7840_v12, %v6766_v13  ;;  %v7648_v11 = vld [vmem:[#allocation10 + $0x34] sm:$0xf] }
 0x5cf   : > { %v8850_v60 = vpop.f32.mrf.mxu0  ;;  %v8852_v61 = vpop.f32.mrf.mxu1  ;;  %v6189_v29 = vor.u32 %v7704_v17, %v6188_v16  ;;  %v5998_v5 = vld [vmem:[#allocation10 + $0x70] sm:$0xf0]  ;;  %v6964_v16 = vld [vmem:[#allocation10 + $0x7b8] sm:$0xf] }
 0x5d0   : > { %3681 = vmatpush.bf16.msra.mxu0 %v5989_v26  ;;  %3695 = vmatpush.bf16.msra.mxu1 %v6501_v27  ;;  %v6702_v26 = vld [vmem:[#allocation10 + $0x5f0] sm:$0xf0]  ;;  %v7897_v17 = vld [vmem:[#allocation10 + $0x7f4] sm:$0xf0] }
 0x5d1   : > { %3709 = vmatpush.bf16.msra.mxu2 %v5993_v31  ;;  %3723 = vmatpush.bf16.msra.mxu3 %v6505_v4  ;;  %v6124_v31 = vld [vmem:[#allocation10 + $0x130] sm:$0xf]  ;;  %v7776_v12 = vld [vmem:[#allocation10 + $0x434] sm:$0xf] }
 0x5d2   : > { %v7688_v4 = vld [vmem:[#allocation10 + $0x16c] sm:$0xf0]  ;;  %v6510_v13 = vld [vmem:[#allocation10 + $0x470] sm:$0xf0] }
 0x5d3   : > { %3682 = vmatmul.bf16.vlgmr.msra.gmra.mxu0 %v8822_v55  ;;  %3696 = vmatmul.bf16.vlgmr.msra.gmra.mxu1 %v8824_v58  ;;  %v6125_v41 = vor.u32 %v7688_v4, %v6124_v31 }
 0x5d4   : > { %3730 = vmatpush.bf16.msrb.mxu0 %v6445_v33  ;;  %3744 = vmatpush.bf16.msrb.mxu1 %v6957_v32  ;;  %v6193_v33 = vor.u32 %v7696_v21, %v6190_v24  ;;  %v6705_v32 = vor.u32 %v7824_v25, %v6702_v26  ;;  %v7889_v21 = vld [vmem:[#allocation10 + $0x7bc] sm:$0xf]  ;;  %v6001_v25 = vor.u32 %v7648_v11, %v5998_v5  ;;  %v6260_v11 = vld [vmem:[#allocation10 + $0x238] sm:$0xf] }
 0x5d5   : > { %3758 = vmatpush.bf16.msrb.mxu2 %v6449_v36  ;;  %3772 = vmatpush.bf16.msrb.mxu3 %v6961_v37  ;;  %v7680_v36 = vld [vmem:[#allocation10 + $0x134] sm:$0xf]  ;;  %v6966_v24 = vld [vmem:[#allocation10 + $0x7f8] sm:$0xf0]  ;;  %v6513_v26 = vor.u32 %v7776_v12, %v6510_v13  ;;  %v7721_v5 = vld [vmem:[#allocation10 + $0x274] sm:$0xf0] }
 0x5d6   : > { %3710 = vmatmul.bf16.vlgmr.msra.gmra.mxu2 %v8822_v55  ;;  %3724 = vmatmul.bf16.vlgmr.msra.gmra.mxu3 %v8824_v58  ;;  %v8854_v22 = vpop.f32.mrf.mxu2  ;;  %v8856_v23 = vpop.f32.mrf.mxu3  ;;  %v6126_v37 = vld [vmem:[#allocation10 + $0x170] sm:$0xf0]  ;;  %v6969_v35 = vor.u32 %v7889_v21, %v6966_v24  ;;  %v6261_v24 = vor.u32 %v7721_v5, %v6260_v11  ;;  %v6068_v11 = vld [vmem:[#allocation10 + $0xb8] sm:$0xf] }
 0x5d7   : > { %v8858_v27 = vpop.f32.mrf.mxu0  ;;  %v8860_v28 = vpop.f32.mrf.mxu1  ;;  %v7673_v5 = vld [vmem:[#allocation10 + $0xf4] sm:$0xf0] }
 0x5d8   : > { %3731 = vmatpush.bf16.msrb.mxu0 %v6381_v45  ;;  %3745 = vmatpush.bf16.msrb.mxu1 %v6893_v46  ;;  %v6129_v45 = vor.u32 %v7680_v36, %v6126_v37  ;;  %v6641_v46 = vor.u32 %v7808_v38, %v6638_v39  ;;  %v6900_v38 = vld [vmem:[#allocation10 + $0x738] sm:$0xf] }
 0x5d9   : > { %3759 = vmatpush.bf16.msrb.mxu2 %v6385_v47  ;;  %3773 = vmatpush.bf16.msrb.mxu3 %v6897_v49  ;;  %v7664_v47 = vld [vmem:[#allocation10 + $0xb4] sm:$0xf]  ;;  %v7881_v39 = vld [vmem:[#allocation10 + $0x774] sm:$0xf0] }
 0x5da   : > { %v6065_v0 = vor.u32 %v7664_v47, %v6062_v48 }
 0x5dc   : > { %3732 = vmatpush.bf16.msrb.mxu0 %v6317_v62  ;;  %3746 = vmatpush.bf16.msrb.mxu1 %v6829_v63  ;;  %v5996_v62 = vld [vmem:[#allocation10 + $0x30] sm:$0xf]  ;;  %v6061_v63 = vor.u32 %v7672_v44, %v6060_v43  ;;  %v7873_v43 = vld [vmem:[#allocation10 + $0x73c] sm:$0xf] }
 0x5dd   : > { %3760 = vmatpush.bf16.msrb.mxu2 %v6321_v7  ;;  %3774 = vmatpush.bf16.msrb.mxu3 %v6833_v8  ;;  %v6508_v7 = vld [vmem:[#allocation10 + $0x430] sm:$0xf]  ;;  %v6902_v44 = vld [vmem:[#allocation10 + $0x778] sm:$0xf0] }
 0x5de   : > { %v8862_v49 = vpop.f32.mrf.mxu2  ;;  %v8864_v50 = vpop.f32.mrf.mxu3  ;;  %v7784_v8 = vld [vmem:[#allocation10 + $0x46c] sm:$0xf0]  ;;  %v6905_v48 = vor.u32 %v7873_v43, %v6902_v44  ;;  %v6132_v44 = vld [vmem:[#allocation10 + $0x138] sm:$0xf] }
 0x5df   : > { %v8866_v59 = vpop.f32.mrf.mxu0  ;;  %v8868_v53 = vpop.f32.mrf.mxu1  ;;  %v6509_v19 = vor.u32 %v7784_v8, %v6508_v7  ;;  %v6325_v7 = vor.u32 %v7737_v1, %v6324_v9  ;;  %v6837_v8 = vor.u32 %v7865_v54, %v6836_v51  ;;  %v6644_v1 = vld [vmem:[#allocation10 + $0x538] sm:$0xf] }
 0x5e0   : > { %3733 = vmatpush.bf16.msrb.mxu0 %v6253_v14  ;;  %3747 = vmatpush.bf16.msrb.mxu1 %v6765_v15  ;;  %v6452_v14 = vld [vmem:[#allocation10 + $0x3b8] sm:$0xf] }
 0x5e1   : > { %3761 = vmatpush.bf16.msrb.mxu2 %v6257_v18  ;;  %3775 = vmatpush.bf16.msrb.mxu3 %v6769_v56  ;;  %v7769_v15 = vld [vmem:[#allocation10 + $0x3f4] sm:$0xf0]  ;;  %v7761_v18 = vld [vmem:[#allocation10 + $0x3bc] sm:$0xf]  ;;  %v5997_v56 = vor.u32 %v7656_v57, %v5996_v62 }
 0x5e2   : > { %v6457_v34 = vor.u32 %v7761_v18, %v6454_v20  ;;  %v7729_v62 = vld [vmem:[#allocation10 + $0x2bc] sm:$0xf] }
 0x5e3   : > { %v6838_v57 = vld [vmem:[#allocation10 + $0x6f8] sm:$0xf0] }
 0x5e4   : > { %3734 = vmatpush.bf16.msrb.mxu0 %v6189_v29  ;;  %3748 = vmatpush.bf16.msrb.mxu1 %v6701_v30  ;;  %v6453_v29 = vor.u32 %v7769_v15, %v6452_v14  ;;  %v6965_v30 = vor.u32 %v7897_v17, %v6964_v16  ;;  %v6772_v14 = vld [vmem:[#allocation10 + $0x638] sm:$0xf]  ;;  %v7713_v16 = vld [vmem:[#allocation10 + $0x23c] sm:$0xf] }
 0x5e5   : > { %3762 = vmatpush.bf16.msrb.mxu2 %v6193_v33  ;;  %3776 = vmatpush.bf16.msrb.mxu3 %v6705_v32  ;;  %v6388_v33 = vld [vmem:[#allocation10 + $0x338] sm:$0xf]  ;;  %v6262_v17 = vld [vmem:[#allocation10 + $0x278] sm:$0xf0] }
 0x5e6   : > { %v8870_v31 = vpop.f32.mrf.mxu2  ;;  %v8872_v4 = vpop.f32.mrf.mxu3  ;;  %v7753_v32 = vld [vmem:[#allocation10 + $0x374] sm:$0xf0]  ;;  %v7841_v18 = vld [vmem:[#allocation10 + $0x63c] sm:$0xf] }
 0x5e7   : > { %v8874_v36 = vpop.f32.mrf.mxu0  ;;  %v8876_v37 = vpop.f32.mrf.mxu1  ;;  %v7849_v15 = vld [vmem:[#allocation10 + $0x674] sm:$0xf0] }
 0x5e8   : > { %3735 = vmatpush.bf16.msrb.mxu0 %v6125_v41  ;;  %3749 = vmatpush.bf16.msrb.mxu1 %v6637_v42  ;;  %v7745_v41 = vld [vmem:[#allocation10 + $0x33c] sm:$0xf] }
 0x5e9   : > { %3763 = vmatpush.bf16.msrb.mxu2 %v6129_v45  ;;  %3777 = vmatpush.bf16.msrb.mxu3 %v6641_v46  ;;  %v6390_v42 = vld [vmem:[#allocation10 + $0x378] sm:$0xf0]  ;;  %v6389_v45 = vor.u32 %v7753_v32, %v6388_v33  ;;  %v6901_v46 = vor.u32 %v7881_v39, %v6900_v38  ;;  %v6708_v32 = vld [vmem:[#allocation10 + $0x5b8] sm:$0xf] }
 0x5ea   : > { %v6393_v47 = vor.u32 %v7745_v41, %v6390_v42  ;;  %v6198_v38 = vld [vmem:[#allocation10 + $0x1f8] sm:$0xf0] }
 0x5eb   : > { %v7825_v39 = vld [vmem:[#allocation10 + $0x5bc] sm:$0xf] }
 0x5ec   : > { %3736 = vmatpush.bf16.msrb.mxu0 %v6061_v63  ;;  %3750 = vmatpush.bf16.msrb.mxu1 %v6573_v3  ;;  %v6326_v63 = vld [vmem:[#allocation10 + $0x2f8] sm:$0xf0] }
 0x5ed   : > { %3764 = vmatpush.bf16.msrb.mxu2 %v6065_v0  ;;  %3778 = vmatpush.bf16.msrb.mxu3 %v6577_v10  ;;  %v7857_v3 = vld [vmem:[#allocation10 + $0x6bc] sm:$0xf]  ;;  %v6329_v12 = vor.u32 %v7729_v62, %v6326_v63 }
 0x5ee   : > { %v8882_v0 = vpop.f32.mrf.mxu2  ;;  %v8884_v10 = vpop.f32.mrf.mxu3  ;;  %v6841_v13 = vor.u32 %v7857_v3, %v6838_v57  ;;  %v6710_v41 = vld [vmem:[#allocation10 + $0x5f8] sm:$0xf0] }
 0x5ef   : > { %v6713_v9 = vor.u32 %v7825_v39, %v6710_v41  ;;  %v6134_v62 = vld [vmem:[#allocation10 + $0x178] sm:$0xf0] }
 0x5f0   : > { %3737 = vmatpush.bf16.msrb.mxu0 %v5997_v56  ;;  %3751 = vmatpush.bf16.msrb.mxu1 %v6509_v19  ;;  %v6774_v56 = vld [vmem:[#allocation10 + $0x678] sm:$0xf0]  ;;  %v3515_v19 = vpop.f32.mrf.mxu0  ;;  %v3529_v20 = vpop.f32.mrf.mxu1 }
 0x5f1   : > { %3765 = vmatpush.bf16.msrb.mxu2 %v6001_v25  ;;  %3779 = vmatpush.bf16.msrb.mxu3 %v6513_v26  ;;  %v8886_v21 = vadd.f32 %v3529_v20, %v3515_v19  ;;  %v6773_v25 = vor.u32 %v7849_v15, %v6772_v14  ;;  %v6196_v26 = vld [vmem:[#allocation10 + $0x1b8] sm:$0xf]  ;;  %v6777_v33 = vor.u32 %v7841_v18, %v6774_v56  ;;  %v7809_v63 = vld [vmem:[#allocation10 + $0x53c] sm:$0xf] }
 0x5f2   : > { %v6646_v3 = vld [vmem:[#allocation10 + $0x578] sm:$0xf0]  ;;  %v6580_v14 = vld [vmem:[#allocation10 + $0x4b8] sm:$0xf]  ;;  %v6069_v19 = vor.u32 %v7673_v5, %v6068_v11  ;;  %v7927_v11 = vld [vmem:[#allocation12 + $0xe4] sm:$0xf0] }
 0x5f3   : > { %3738 = vmatmul.bf16.vlgmr.msrb.gmra.mxu0 %v8822_v55  ;;  %3752 = vmatmul.bf16.vlgmr.msrb.gmra.mxu1 %v8824_v58  ;;  %v7801_v15 = vld [vmem:[#allocation10 + $0x4f4] sm:$0xf0]  ;;  %v7793_v18 = vld [vmem:[#allocation10 + $0x4bc] sm:$0xf] }
 0x5f4   : > { %3786 = vmatpush.bf16.msra.mxu0 %v6453_v29  ;;  %3800 = vmatpush.bf16.msra.mxu1 %v6965_v30  ;;  %v7705_v29 = vld [vmem:[#allocation10 + $0x1f4] sm:$0xf0]  ;;  %v6265_v30 = vor.u32 %v7713_v16, %v6262_v17  ;;  %v7665_v16 = vld [vmem:[#allocation10 + $0xbc] sm:$0xf]  ;;  %v6581_v20 = vor.u32 %v7801_v15, %v6580_v14  ;;  %v7020_v14 = vld [vmem:[#allocation12 + $0x40] sm:$0xf] }
 0x5f5   : > { %3814 = vmatpush.bf16.msra.mxu2 %v6457_v34  ;;  %3828 = vmatpush.bf16.msra.mxu3 %v6969_v35  ;;  %v7833_v34 = vld [vmem:[#allocation10 + $0x5f4] sm:$0xf0]  ;;  %v7697_v35 = vld [vmem:[#allocation10 + $0x1bc] sm:$0xf]  ;;  %v6197_v42 = vor.u32 %v7705_v29, %v6196_v26  ;;  %v8892_v26 = vadd.f32 %v8852_v61, %v8850_v60  ;;  %v7907_v15 = vld [vmem:[#allocation12 + $0x44] sm:$0xf0] }
 0x5f6   : > { %3766 = vmatmul.bf16.vlgmr.msrb.gmra.mxu2 %v8822_v55  ;;  %3780 = vmatmul.bf16.vlgmr.msrb.gmra.mxu3 %v8824_v58  ;;  %v6709_v43 = vor.u32 %v7833_v34, %v6708_v32  ;;  %v6070_v17 = vld [vmem:[#allocation10 + $0xf8] sm:$0xf0]  ;;  %v7785_v32 = vld [vmem:[#allocation10 + $0x474] sm:$0xf0] }
 0x5f7   : > { %v6582_v56 = vld [vmem:[#allocation10 + $0x4f8] sm:$0xf0]  ;;  %v6073_v29 = vor.u32 %v7665_v16, %v6070_v17 }
 0x5f8   : > { %3787 = vmatpush.bf16.msra.mxu0 %v6389_v45  ;;  %3801 = vmatpush.bf16.msra.mxu1 %v6901_v46  ;;  %v7689_v45 = vld [vmem:[#allocation10 + $0x174] sm:$0xf0]  ;;  %v6201_v46 = vor.u32 %v7697_v35, %v6198_v38  ;;  %v7649_v34 = vld [vmem:[#allocation10 + $0x3c] sm:$0xf]  ;;  %v8896_v35 = vadd.f32 %v8860_v28, %v8858_v27  ;;  %v7036_v27 = vld [vmem:[#allocation12 + $0x60] sm:$0xf] }
 0x5f9   : > { %3815 = vmatpush.bf16.msra.mxu2 %v6393_v47  ;;  %3829 = vmatpush.bf16.msra.mxu3 %v6905_v48  ;;  %v7817_v47 = vld [vmem:[#allocation10 + $0x574] sm:$0xf0]  ;;  %v7681_v48 = vld [vmem:[#allocation10 + $0x13c] sm:$0xf]  ;;  %v3543_v51 = vpop.f32.mrf.mxu2  ;;  %v3557_v54 = vpop.f32.mrf.mxu3  ;;  %v7911_v28 = vld [vmem:[#allocation12 + $0x64] sm:$0xf0] }
 0x5fa   : > { %v8888_v57 = vadd.f32 %v3557_v54, %v3543_v51  ;;  %v6006_v38 = vld [vmem:[#allocation10 + $0x78] sm:$0xf0]  ;;  %v8902_v51 = vadd.f32 %v8856_v23, %v8854_v22  ;;  %v7028_v22 = vld [vmem:[#allocation12 + $0x50] sm:$0xf]  ;;  %v7909_v23 = vld [vmem:[#allocation12 + $0x54] sm:$0xf0] }
 0x5fb   : > { %v7777_v39 = vld [vmem:[#allocation10 + $0x43c] sm:$0xf] }
 0x5fc   : > { %3788 = vmatpush.bf16.msra.mxu0 %v6325_v7  ;;  %3802 = vmatpush.bf16.msra.mxu1 %v6837_v8  ;;  %v6133_v7 = vor.u32 %v7689_v45, %v6132_v44  ;;  %v6645_v8 = vor.u32 %v7817_v47, %v6644_v1  ;;  %v6518_v41 = vld [vmem:[#allocation10 + $0x478] sm:$0xf0]  ;;  %v6970_v44 = vmul.f32 -1.442695, %v8892_v26  ;;  %v6009_v45 = vor.u32 %v7649_v34, %v6006_v38  ;;  %v7108_v47 = vld [vmem:[#allocation12 + $0xf0] sm:$0xf] }
 0x5fd   : > { %3816 = vmatpush.bf16.msra.mxu2 %v6329_v12  ;;  %3830 = vmatpush.bf16.msra.mxu3 %v6841_v13  ;;  %v6137_v12 = vor.u32 %v7681_v48, %v6134_v62  ;;  %v6649_v13 = vor.u32 %v7809_v63, %v6646_v3  ;;  %v7929_v48 = vld [vmem:[#allocation12 + $0xf4] sm:$0xf0]  ;;  %v8904_v62 = vpop.f32.mrf.mxu0  ;;  %v8906_v63 = vpop.f32.mrf.mxu1  ;;  %v8910_v3 = vadd.f32 %v8864_v50, %v8862_v49  ;;  %v6971_v5 = vmul.f32 -1.442695, %v8902_v51 }
 0x5fe   : > { %v7109_v54 = vor.u32 %v7929_v48, %v7108_v47  ;;  %8152 = vpow2.f32 %v6970_v44  ;;  %v7029_v50 = vor.u32 %v7909_v23, %v7028_v22 }
 0x5ff   : > { %v6979_v49 = vmul.f32 -1.442695, %v8910_v3 }
 0x600   : > { %3789 = vmatpush.bf16.msra.mxu0 %v6261_v24  ;;  %3803 = vmatpush.bf16.msra.mxu1 %v6773_v25  ;;  %v6004_v24 = vld [vmem:[#allocation10 + $0x38] sm:$0xf] }
 0x601   : > { %3817 = vmatpush.bf16.msra.mxu2 %v6265_v30  ;;  %3831 = vmatpush.bf16.msra.mxu3 %v6777_v33  ;;  %v7657_v25 = vld [vmem:[#allocation10 + $0x74] sm:$0xf0]  ;;  %v6585_v30 = vor.u32 %v7793_v18, %v6582_v56  ;;  %v8918_v17 = vpop.f32.mrf.mxu2  ;;  %v8920_v18 = vpop.f32.mrf.mxu3 }
 0x602   : > { %v6516_v33 = vld [vmem:[#allocation10 + $0x438] sm:$0xf]  ;;  %v6005_v60 = vor.u32 %v7657_v25, %v6004_v24 }
 0x603   : > { %v6517_v61 = vor.u32 %v7785_v32, %v6516_v33  ;;  %v7925_v24 = vld [vmem:[#allocation12 + $0xd4] sm:$0xf0]  ;;  %v7084_v33 = vld [vmem:[#allocation12 + $0xc0] sm:$0xf]  ;;  %v7923_v32 = vld [vmem:[#allocation12 + $0xc4] sm:$0xf0] }
 0x604   : > { %3790 = vmatpush.bf16.msra.mxu0 %v6197_v42  ;;  %3804 = vmatpush.bf16.msra.mxu1 %v6709_v43  ;;  %v7044_v42 = vld [vmem:[#allocation12 + $0x70] sm:$0xf]  ;;  %v7913_v43 = vld [vmem:[#allocation12 + $0x74] sm:$0xf0] }
 0x605   : > { %3818 = vmatpush.bf16.msra.mxu2 %v6201_v46  ;;  %3832 = vmatpush.bf16.msra.mxu3 %v6713_v9  ;;  %v6521_v46 = vor.u32 %v7777_v39, %v6518_v41  ;;  %v6978_v9 = vmul.f32 -1.442695, %v8896_v35  ;;  %v7045_v1 = vor.u32 %v7913_v43, %v7044_v42  ;;  %v7085_v42 = vor.u32 %v7923_v32, %v7084_v33  ;;  %v7004_v43 = vld [vmem:[#allocation12 + $0x20] sm:$0xf]  ;;  %v7060_v33 = vld [vmem:[#allocation12 + $0x90] sm:$0xf] }
 0x606   : > { %v7917_v32 = vld [vmem:[#allocation12 + $0x94] sm:$0xf0] }
 0x607   : > { %8154 = vpow2.f32 %v6978_v9  ;;  %v7921_v9 = vld [vmem:[#allocation12 + $0xb4] sm:$0xf0] }
 0x608   : > { %3791 = vmatpush.bf16.msra.mxu0 %v6133_v7  ;;  %3805 = vmatpush.bf16.msra.mxu1 %v6645_v8  ;;  %v7037_v7 = vor.u32 %v7911_v28, %v7036_v27  ;;  %v7100_v8 = vld [vmem:[#allocation12 + $0xe0] sm:$0xf]  ;;  %8156 = vpow2.f32 %v6971_v5  ;;  %v8934_v27 = vadd.f32 %v8868_v53, %v8866_v59 }
 0x609   : > { %3819 = vmatpush.bf16.msra.mxu2 %v6137_v12  ;;  %3833 = vmatpush.bf16.msra.mxu3 %v6649_v13  ;;  %v7101_v12 = vor.u32 %v7927_v11, %v7100_v8  ;;  %v8153_v13 = vpop.eup %8152  ;;  %8158 = vpow2.f32 %v6979_v49  ;;  %v6996_v8 = vld [vmem:[#allocation12 + $0x10] sm:$0xf]  ;;  %v7901_v11 = vld [vmem:[#allocation12 + $0x14] sm:$0xf0]  ;;  %v7919_v49 = vld [vmem:[#allocation12 + $0xa4] sm:$0xf0] }
 0x60c   : > { %3792 = vmatpush.bf16.msra.mxu0 %v6069_v19  ;;  %3806 = vmatpush.bf16.msra.mxu1 %v6581_v20  ;;  %v7092_v20 = vld [vmem:[#allocation12 + $0xd0] sm:$0xf] }
 0x60d   : > { %3820 = vmatpush.bf16.msra.mxu2 %v6073_v29  ;;  %3834 = vmatpush.bf16.msra.mxu3 %v6585_v30  ;;  %v8155_v16 = vpop.eup %8154  ;;  %v7012_v29 = vld [vmem:[#allocation12 + $0x30] sm:$0xf]  ;;  %v7905_v30 = vld [vmem:[#allocation12 + $0x34] sm:$0xf0]  ;;  %v7093_v38 = vor.u32 %v7925_v24, %v7092_v20 }
 0x60e   : > { %v8924_v25 = vadd.f32 1.0, %v8155_v16  ;;  %v8157_v39 = vpop.eup %8156  ;;  %v7013_v41 = vor.u32 %v7905_v30, %v7012_v29  ;;  %v7945_v16 = vld [vmem:[#allocation12 + $0x174] sm:$0xf0] }
 0x610   : > { %3793 = vmatpush.bf16.msra.mxu0 %v6005_v60  ;;  %3807 = vmatpush.bf16.msra.mxu1 %v6517_v61  ;;  %v3571_v56 = vpop.f32.mrf.mxu0  ;;  %v3585_v19 = vpop.f32.mrf.mxu1  ;;  %v7903_v60 = vld [vmem:[#allocation12 + $0x24] sm:$0xf0]  ;;  %vm4031_vm5 = vweird.f32 %v8924_v25 }
 0x611   : > { %3821 = vmatpush.bf16.msra.mxu2 %v6009_v45  ;;  %3835 = vmatpush.bf16.msra.mxu3 %v6521_v46  ;;  %v8926_v34 = vadd.f32 %v3585_v19, %v3571_v56  ;;  %v8159_v61 = vpop.eup %8158  ;;  %v7076_v46 = vld [vmem:[#allocation12 + $0xb0] sm:$0xf]  ;;  %v6988_v19 = vld [vmem:[#allocation12] sm:$0xf] }
 0x612   : > { %v8940_v22 = vadd.f32 1.0, %v8159_v61  ;;  %v7077_v23 = vor.u32 %v7921_v9, %v7076_v46  ;;  %v7164_v61 = vld [vmem:[#allocation12 + $0x160] sm:$0xf]  ;;  %v7061_v9 = vor.u32 %v7917_v32, %v7060_v33 }
 0x613   : > { %3794 = vmatmul.bf16.vlgmr.msra.gmra.mxu0 %v8822_v55  ;;  %3808 = vmatmul.bf16.vlgmr.msra.gmra.mxu1 %v8824_v58 }
 0x614   : > { %4954 = vmatpush.bf16.msrb.mxu0 %v7045_v1  ;;  %4968 = vmatpush.bf16.msrb.mxu1 %v7109_v54  ;;  %v8930_v1 = vadd.f32 1.0, %v8157_v39  ;;  %vm4046_vm13 = vweird.f32 %v8940_v22 }
 0x615   : > { %3822 = vmatmul.bf16.vlgmr.msra.gmra.mxu2 %v8822_v55  ;;  %3836 = vmatmul.bf16.vlgmr.msra.gmra.mxu3 %v8824_v58  ;;  %v8922_v55 = vadd.f32 1.0, %v8153_v13  ;;  %v7021_v58 = vor.u32 %v7907_v15, %v7020_v14  ;;  %v8951_v13 = vadd.f32 %v8876_v37, %v8874_v36  ;;  %v6997_v14 = vor.u32 %v7901_v11, %v6996_v8  ;;  %v7172_v15 = vld [vmem:[#allocation12 + $0x170] sm:$0xf]  ;;  %v7052_v8 = vld [vmem:[#allocation12 + $0x80] sm:$0xf] }
 0x616   : > { %v7173_v20 = vor.u32 %v7945_v16, %v7172_v15  ;;  %v3932_v46 = vand.u32 2147483648, %v8930_v1  ;;  %v7915_v11 = vld [vmem:[#allocation12 + $0x84] sm:$0xf0]  ;;  %v3930_v16 = vand.u32 2147483647, %v8930_v1  ;;  %vm3926_vm9 = vweird.f32 %v8930_v1 }
 0x617   : > { %8160 = vrcp.f32 %v8922_v55  ;;  %v3917_v53 = vand.u32 2147483648, %v8922_v55  ;;  %v3915_v29 = vand.u32 2147483647, %v8922_v55  ;;  %vm3911_vm4 = vweird.f32 %v8922_v55 }
 0x618   : > { %4955 = vmatpush.bf16.msrb.mxu0 %v7037_v7  ;;  %4969 = vmatpush.bf16.msrb.mxu1 %v7101_v12  ;;  %8162 = vrcp.f32 %v8924_v25  ;;  %v3573_v47 = vpop.f32.mrf.mxu0  ;;  %v3587_v48 = vpop.f32.mrf.mxu1  ;;  %v7005_v7 = vor.u32 %v7903_v60, %v7004_v43  ;;  %v7068_v12 = vld [vmem:[#allocation12 + $0xa0] sm:$0xf]  ;;  %v6980_v43 = vmul.f32 -1.442695, %v8951_v13  ;;  %vm9042_vm10 = vcmp.eq.f32.partialorder %v3930_v16, 8.507059e+37 }
 0x619   : > { %v3599_v44 = vpop.f32.mrf.mxu2  ;;  %v3613_v45 = vpop.f32.mrf.mxu3  ;;  %v8938_v54 = vadd.f32 %v3587_v48, %v3573_v47  ;;  %8164 = vrcp.f32 %v8930_v1  ;;  %v7069_v56 = vor.u32 %v7919_v49, %v7068_v12  ;;  %4982 = vmatpush.bf16.msrb.mxu2 %v7173_v20  ;;  %v8971_v49 = vadd.f32 %v8872_v4, %v8870_v31  ;;  %v7340_v16 = vld [vmem:[#allocation12 + $0x2c0] sm:$0xf] }
 0x61a   : > { %v8936_v28 = vadd.f32 %v3613_v45, %v3599_v44  ;;  %8166 = vrcp.f32 %v8940_v22  ;;  %v7943_v44 = vld [vmem:[#allocation12 + $0x164] sm:$0xf0]  ;;  %v8979_v20 = vor.u32 1.1754944e-38, %v3932_v46  ;;  %v4037_v31 = vand.u32 2147483648, %v8924_v25 }
 0x61b   : > { %v7165_v48 = vor.u32 %v7943_v44, %v7164_v61  ;;  %v8984_v4 = vadd.f32 %v8884_v10, %v8882_v0  ;;  %v7993_v0 = vld [vmem:[#allocation12 + $0x2f4] sm:$0xf0]  ;;  %v7228_v10 = vld [vmem:[#allocation12 + $0x1e0] sm:$0xf]  ;;  %vm8993_vm0 = vcmp.eq.f32.partialorder %v3915_v29, 8.507059e+37 }
 0x61c   : > { %4956 = vmatpush.bf16.msrb.mxu0 %v7029_v50  ;;  %4970 = vmatpush.bf16.msrb.mxu1 %v7093_v38  ;;  %v6972_v50 = vmul.f32 -1.442695, %v8934_v27  ;;  %v8959_v38 = vor.u32 1.1754944e-38, %v3917_v53  ;;  %v7236_v53 = vld [vmem:[#allocation12 + $0x1f0] sm:$0xf] }
 0x61d   : > { %v8942_v5 = vpop.eup %8160  ;;  %4983 = vmatpush.bf16.msrb.mxu2 %v7165_v48  ;;  %v7959_v48 = vld [vmem:[#allocation12 + $0x1e4] sm:$0xf0]  ;;  %v6981_v29 = vmul.f32 -1.442695, %v8984_v4 }
 0x61e   : > { %v8944_v59 = vpop.eup %8162  ;;  %v3907_v24 = vmul.f32 %v8942_v5, %v8922_v55  ;;  %8168 = vpow2.f32 %v6972_v50  ;;  %v7961_v50 = vld [vmem:[#allocation12 + $0x1f4] sm:$0xf0]  ;;  %vm3912_vm1 = vweird.f32 %v8942_v5 }
 0x61f   : > { %v4027_v36 = vmul.f32 %v8944_v59, %v8924_v25  ;;  %v8964_v45 = vpop.eup %8164  ;;  %8170 = vpow2.f32 %v6980_v43  ;;  %v7237_v33 = vor.u32 %v7961_v50, %v7236_v53  ;;  %v7148_v53 = vld [vmem:[#allocation12 + $0x140] sm:$0xf]  ;;  %vm4032_vm3 = vweird.f32 %v8944_v59  ;;  %vm9014_vm6 = vmor %vm3911_vm4, %vm3912_vm1 }
 0x620   : > { %4957 = vmatpush.bf16.msrb.mxu0 %v7021_v58  ;;  %4971 = vmatpush.bf16.msrb.mxu1 %v7085_v42  ;;  %v7899_v58 = vld [vmem:[#allocation12 + $0x4] sm:$0xf0]  ;;  %v7977_v42 = vld [vmem:[#allocation12 + $0x274] sm:$0xf0]  ;;  %v8967_v12 = vpop.eup %8166  ;;  %v8975_v15 = vmul.f32 %v8964_v45, %v8930_v1  ;;  %vm9023_vm7 = vmor %vm4031_vm5, %vm4032_vm3  ;;  %vm3927_vm8 = vweird.f32 %v8964_v45 }
 0x621   : > { %v3601_v37 = vpop.f32.mrf.mxu2  ;;  %v3615_v30 = vpop.f32.mrf.mxu3  ;;  %v6989_v60 = vor.u32 %v7899_v58, %v6988_v19  ;;  %v7975_v19 = vld [vmem:[#allocation12 + $0x264] sm:$0xf0]  ;;  %4996 = vmatpush.bf16.msrb.mxu3 %v7237_v33  ;;  %vm9056_vm11 = vmor %vm3926_vm9, %vm3927_vm8  ;;  %vm4047_vm12 = vweird.f32 %v8967_v12 }
 0x622   : > { %v8961_v39 = vadd.f32 %v3615_v30, %v3601_v37  ;;  %v8989_v30 = vmul.f32 %v8967_v12, %v8940_v22  ;;  %v3923_v44 = vsub.f32 1.0, %v8975_v15  ;;  %v7991_v33 = vld [vmem:[#allocation12 + $0x2e4] sm:$0xf0]  ;;  %vm9082_vm14 = vmor %vm4046_vm13, %vm4047_vm12 }
 0x624   : > { %4958 = vmatpush.bf16.msrb.mxu0 %v7013_v41  ;;  %4972 = vmatpush.bf16.msrb.mxu1 %v7077_v23  ;;  %v7300_v41 = vld [vmem:[#allocation12 + $0x270] sm:$0xf]  ;;  %v4028_v23 = vsub.f32 1.0, %v4027_v36  ;;  %v8169_v58 = vpop.eup %8168  ;;  %v4043_v15 = vsub.f32 1.0, %v8989_v30  ;;  %v4038_v30 = vor.u32 1.1754944e-38, %v4037_v31  ;;  %v3924_v55 = vmul.f32 %v8964_v45, %v3923_v44 }
 0x625   : > { %v7301_v47 = vor.u32 %v7977_v42, %v7300_v41  ;;  %v7156_v36 = vld [vmem:[#allocation12 + $0x150] sm:$0xf]  ;;  %v7941_v41 = vld [vmem:[#allocation12 + $0x154] sm:$0xf0]  ;;  %v8998_v46 = vadd.f32 1.0, %v8169_v58  ;;  %v8171_v50 = vpop.eup %8170 }
 0x626   : > { %v7364_v42 = vld [vmem:[#allocation12 + $0x2f0] sm:$0xf]  ;;  %v4029_v43 = vmul.f32 %v8944_v59, %v4028_v23  ;;  %v7356_v58 = vld [vmem:[#allocation12 + $0x2e0] sm:$0xf] }
 0x627   : > { %v7357_v44 = vor.u32 %v7991_v33, %v7356_v58  ;;  %v7969_v58 = vld [vmem:[#allocation12 + $0x234] sm:$0xf0]  ;;  %v7132_v33 = vld [vmem:[#allocation12 + $0x120] sm:$0xf]  ;;  %vm3941_vm1 = vweird.f32 %v8998_v46 }
 0x628   : > { %4959 = vmatpush.bf16.msrb.mxu0 %v7005_v7  ;;  %4973 = vmatpush.bf16.msrb.mxu1 %v7069_v56  ;;  %v3908_v7 = vsub.f32 1.0, %v3907_v24  ;;  %v4035_v56 = vand.u32 2147483647, %v8924_v25  ;;  %v7053_v24 = vor.u32 %v7915_v11, %v7052_v8  ;;  %v7229_v8 = vor.u32 %v7959_v48, %v7228_v10  ;;  %v7973_v11 = vld [vmem:[#allocation12 + $0x254] sm:$0xf0] }
 0x629   : > { %v9029_v10 = vadd.f32 1.0, %v8171_v50  ;;  %v4044_v50 = vmul.f32 %v8967_v12, %v4043_v15  ;;  %v9050_v15 = vadd.f32 %v8964_v45, %v3924_v55  ;;  %v7987_v25 = vld [vmem:[#allocation12 + $0x2c4] sm:$0xf0] }
 0x62a   : > { %v3909_v37 = vmul.f32 %v8942_v5, %v3908_v7  ;;  %v7284_v7 = vld [vmem:[#allocation12 + $0x250] sm:$0xf]  ;;  %vm9001_vm2 = vcmp.eq.f32.partialorder %v4035_v56, 8.507059e+37  ;;  %4997 = vmatpush.bf16.msrb.mxu3 %v7229_v8 }
 0x62b   : > { %v7285_v56 = vor.u32 %v7973_v11, %v7284_v7  ;;  %v7971_v7 = vld [vmem:[#allocation12 + $0x244] sm:$0xf0]  ;;  %v7140_v8 = vld [vmem:[#allocation12 + $0x130] sm:$0xf]  ;;  %v7937_v11 = vld [vmem:[#allocation12 + $0x134] sm:$0xf0]  ;;  %vm4061_vm5 = vweird.f32 %v9029_v10 }
 0x62c   : > { %4960 = vmatpush.bf16.msrb.mxu0 %v6997_v14  ;;  %v7292_v14 = vld [vmem:[#allocation12 + $0x260] sm:$0xf]  ;;  %4974 = vmatpush.bf16.msrb.mxu1 %v7061_v9  ;;  %v7157_v9 = vor.u32 %v7941_v41, %v7156_v36  ;;  %v7957_v41 = vld [vmem:[#allocation12 + $0x1d4] sm:$0xf0] }
 0x62d   : > { %v7293_v32 = vor.u32 %v7975_v19, %v7292_v14  ;;  %v3910_v14 = vadd.f32 %v8942_v5, %v3909_v37  ;;  %v7939_v19 = vld [vmem:[#allocation12 + $0x144] sm:$0xf0] }
 0x62e   : > { %4984 = vmatpush.bf16.msrb.mxu2 %v7157_v9  ;;  %v7149_v36 = vor.u32 %v7939_v19, %v7148_v53  ;;  %v7989_v19 = vld [vmem:[#allocation12 + $0x2d4] sm:$0xf0] }
 0x630   : > { %4961 = vmatpush.bf16.msrb.mxu0 %v6989_v60  ;;  %v6973_v60 = vmul.f32 -1.442695, %v8971_v49  ;;  %4975 = vmatpush.bf16.msrb.mxu1 %v7053_v24  ;;  %v4030_v24 = vadd.f32 %v8944_v59, %v4029_v43  ;;  %v3627_v31 = vpop.f32.mrf.mxu0  ;;  %v3641_v9 = vpop.f32.mrf.mxu1  ;;  %v7212_v43 = vld [vmem:[#allocation12 + $0x1c0] sm:$0xf] }
 0x632   : > { %8172 = vpow2.f32 %v6973_v60  ;;  %v3914_v60 = vsel %vm9014_vm6, %v8942_v5, %v3910_v14  ;;  %4985 = vmatpush.bf16.msrb.mxu2 %v7149_v36  ;;  %v4034_v53 = vsel %vm9023_vm7, %v8944_v59, %v4030_v24  ;;  %v7268_v14 = vld [vmem:[#allocation12 + $0x230] sm:$0xf]  ;;  %v7141_v36 = vor.u32 %v7937_v11, %v7140_v8  ;;  %v7260_v8 = vld [vmem:[#allocation12 + $0x220] sm:$0xf]  ;;  %v7949_v5 = vld [vmem:[#allocation12 + $0x194] sm:$0xf0] }
 0x633   : > { %8174 = vrcp.f32 %v8998_v46  ;;  %v3919_v59 = vsel %vm8993_vm0, %v8959_v38, %v3914_v60  ;;  %v4039_v38 = vsel %vm9001_vm2, %v4038_v30, %v4034_v53  ;;  %v4045_v60 = vadd.f32 %v8967_v12, %v4044_v50  ;;  %v7124_v50 = vld [vmem:[#allocation12 + $0x110] sm:$0xf] }
 0x634   : > { %5010 = vmatpush.bf16.msra.mxu0 %v7301_v47  ;;  %v7365_v47 = vor.u32 %v7993_v0, %v7364_v42  ;;  %v4052_v0 = vand.u32 2147483648, %v8940_v22  ;;  %8176 = vpow2.f32 %v6981_v29  ;;  %v7955_v29 = vld [vmem:[#allocation12 + $0x1c4] sm:$0xf0]  ;;  %v7269_v1 = vor.u32 %v7969_v58, %v7268_v14 }
 0x635   : > { %v7213_v55 = vor.u32 %v7955_v29, %v7212_v43  ;;  %8178 = vrcp.f32 %v9029_v10  ;;  %v3642_v30 = vadd.f32 %v3641_v9, %v3627_v31  ;;  %v7341_v53 = vor.u32 %v7987_v25, %v7340_v16  ;;  %v7951_v16 = vld [vmem:[#allocation12 + $0x1a4] sm:$0xf0] }
 0x636   : > { %5024 = vmatpush.bf16.msra.mxu1 %v7365_v47  ;;  %v7276_v47 = vld [vmem:[#allocation12 + $0x240] sm:$0xf]  ;;  %4986 = vmatpush.bf16.msrb.mxu2 %v7141_v36  ;;  %v4146_v29 = vmul.f32 %v3919_v59, %v8892_v26  ;;  %v3929_v14 = vsel %vm9056_vm11, %v8964_v45, %v9050_v15  ;;  %v4053_v58 = vor.u32 1.1754944e-38, %v4052_v0  ;;  %v7332_v36 = vld [vmem:[#allocation12 + $0x2b0] sm:$0xf] }
 0x637   : > { %v7277_v24 = vor.u32 %v7971_v7, %v7276_v47  ;;  %v7953_v7 = vld [vmem:[#allocation12 + $0x1b4] sm:$0xf0]  ;;  %v7196_v15 = vld [vmem:[#allocation12 + $0x1a0] sm:$0xf]  ;;  %v7912_v26 = vld [vmem:[#allocation12 + $0x74] sm:$0xf] }
 0x638   : > { %5011 = vmatpush.bf16.msra.mxu0 %v7293_v32  ;;  %v7220_v32 = vld [vmem:[#allocation12 + $0x1d0] sm:$0xf]  ;;  %v3629_v31 = vpop.f32.mrf.mxu0  ;;  %v3643_v9 = vpop.f32.mrf.mxu1 }
 0x639   : > { %v7221_v48 = vor.u32 %v7957_v41, %v7220_v32  ;;  %v7935_v32 = vld [vmem:[#allocation12 + $0x124] sm:$0xf0]  ;;  %v8173_v41 = vpop.eup %8172  ;;  %v3655_v11 = vpop.f32.mrf.mxu2  ;;  %v3644_v0 = vadd.f32 %v3643_v9, %v3629_v31  ;;  %v7965_v31 = vld [vmem:[#allocation12 + $0x214] sm:$0xf0] }
 0x63a   : > { %5025 = vmatpush.bf16.msra.mxu1 %v7357_v44  ;;  %v9063_v47 = vpop.eup %8174  ;;  %v7133_v44 = vor.u32 %v7935_v32, %v7132_v33  ;;  %v3669_v43 = vpop.f32.mrf.mxu3  ;;  %v7985_v33 = vld [vmem:[#allocation12 + $0x2b4] sm:$0xf0]  ;;  %v4154_v32 = vmul.f32 %v4039_v38, %v8896_v35  ;;  %v4049_v35 = vsel %vm9082_vm14, %v8967_v12, %v4045_v60  ;;  %v3934_v12 = vsel %vm9042_vm10, %v8979_v20, %v3929_v14  ;;  %v7244_v14 = vld [vmem:[#allocation12 + $0x200] sm:$0xf] }
 0x63b   : > { %4998 = vmatpush.bf16.msrb.mxu3 %v7221_v48  ;;  %v7204_v48 = vld [vmem:[#allocation12 + $0x1b0] sm:$0xf]  ;;  %v8177_v23 = vpop.eup %8176  ;;  %v9088_v45 = vmul.f32 %v9063_v47, %v8998_v46  ;;  %v7333_v42 = vor.u32 %v7985_v33, %v7332_v36  ;;  %v9552_v60 = vand.u32 2147483647, %v8940_v22  ;;  %v3670_v22 = vadd.f32 %v3669_v43, %v3655_v11  ;;  %v7963_v36 = vld [vmem:[#allocation12 + $0x204] sm:$0xf0] }
 0x63c   : > { %5012 = vmatpush.bf16.msra.mxu0 %v7285_v56  ;;  %v7348_v56 = vld [vmem:[#allocation12 + $0x2d0] sm:$0xf]  ;;  %v7205_v59 = vor.u32 %v7953_v7, %v7204_v48  ;;  %4987 = vmatpush.bf16.msrb.mxu2 %v7133_v44  ;;  %v4170_v25 = vmul.f32 %v4154_v32, %v3644_v0  ;;  %v7116_v48 = vld [vmem:[#allocation12 + $0x100] sm:$0xf]  ;;  %v7931_v7 = vld [vmem:[#allocation12 + $0x104] sm:$0xf0]  ;;  %v9095_v9 = vpop.eup %8178  ;;  %v7197_v44 = vor.u32 %v7951_v16, %v7196_v15  ;;  %vm3942_vm2 = vweird.f32 %v9063_v47 }
 0x63d   : > { %v7349_v61 = vor.u32 %v7989_v19, %v7348_v56  ;;  %v7967_v56 = vld [vmem:[#allocation12 + $0x224] sm:$0xf0]  ;;  %v7933_v19 = vld [vmem:[#allocation12 + $0x114] sm:$0xf0]  ;;  %vm4051_vm15 = vcmp.eq.f32.partialorder %v9552_v60, 8.507059e+37  ;;  %v3938_v20 = vsub.f32 1.0, %v9088_v45  ;;  %v4057_v33 = vmul.f32 %v9095_v9, %v9029_v10  ;;  %vm9160_vm4 = vmor %vm3941_vm1, %vm3942_vm2 }
 0x63e   : > { %v7261_v37 = vor.u32 %v7967_v56, %v7260_v8  ;;  %v7125_v38 = vor.u32 %v7933_v19, %v7124_v50  ;;  %v7324_v8 = vld [vmem:[#allocation12 + $0x2a0] sm:$0xf]  ;;  %v7188_v50 = vld [vmem:[#allocation12 + $0x190] sm:$0xf]  ;;  %v8009_v43 = vld [vmem:[#allocation12 + $0x374] sm:$0xf0]  ;;  %vm4062_vm3 = vweird.f32 %v9095_v9 }
 0x63f   : > { %5026 = vmatpush.bf16.msra.mxu1 %v7349_v61  ;;  %4999 = vmatpush.bf16.msrb.mxu3 %v7213_v55  ;;  %v7252_v61 = vld [vmem:[#allocation12 + $0x210] sm:$0xf]  ;;  %v4162_v55 = vmul.f32 %v4146_v29, %v3642_v30  ;;  %v4054_v30 = vsel %vm4051_vm15, %v4053_v58, %v4049_v35  ;;  %v7117_v29 = vor.u32 %v7931_v7, %v7116_v48  ;;  %v7046_v15 = vld [vmem:[#allocation12 + $0x78] sm:$0xf0]  ;;  %v7981_v35 = vld [vmem:[#allocation12 + $0x294] sm:$0xf0] }
 0x640   : > { %5013 = vmatpush.bf16.msra.mxu0 %v7277_v24  ;;  %v9075_v24 = vadd.f32 1.0, %v8173_v41  ;;  %v9093_v41 = vadd.f32 1.0, %v8177_v23  ;;  %v7983_v23 = vld [vmem:[#allocation12 + $0x2a4] sm:$0xf0]  ;;  %4988 = vmatpush.bf16.msrb.mxu2 %v7125_v38  ;;  %v7253_v19 = vor.u32 %v7965_v31, %v7252_v61  ;;  %v4147_v58 = vmul.f32 %v3934_v12, %v8902_v51  ;;  %v7428_v11 = vld [vmem:[#allocation12 + $0x370] sm:$0xf]  ;;  %vm9172_vm6 = vmor %vm4061_vm5, %vm4062_vm3 }
 0x641   : > { %v9108_v56 = vpack.c.bf16 %v4170_v25, %v4162_v55  ;;  %v7325_v32 = vor.u32 %v7983_v23, %v7324_v8  ;;  %v4155_v45 = vmul.f32 %v4054_v30, %v8910_v3  ;;  %v7429_v51 = vor.u32 %v8009_v43, %v7428_v11  ;;  %v7316_v16 = vld [vmem:[#allocation12 + $0x290] sm:$0xf]  ;;  %v7180_v38 = vld [vmem:[#allocation12 + $0x180] sm:$0xf]  ;;  %v7947_v61 = vld [vmem:[#allocation12 + $0x184] sm:$0xf0] }
 0x642   : > { %8180 = vrcp.f32 %v9075_v24  ;;  %v7245_v31 = vor.u32 %v7963_v36, %v7244_v14  ;;  %v7420_v48 = vld [vmem:[#allocation12 + $0x360] sm:$0xf]  ;;  %v8007_v3 = vld [vmem:[#allocation12 + $0x364] sm:$0xf0]  ;;  %v4058_v60 = vsub.f32 1.0, %v4057_v33  ;;  %v7317_v8 = vor.u32 %v7981_v35, %v7316_v16 }
 0x643   : > { %5027 = vmatpush.bf16.msra.mxu1 %v7341_v53  ;;  %5000 = vmatpush.bf16.msrb.mxu3 %v7205_v59  ;;  %v9106_v53 = vadd.f32 %v8906_v63, %v8904_v62  ;;  %8182 = vrcp.f32 %v9093_v41  ;;  %v3657_v62 = vpop.f32.mrf.mxu2  ;;  %v3671_v63 = vpop.f32.mrf.mxu3  ;;  %v7189_v59 = vor.u32 %v7949_v5, %v7188_v50  ;;  %v7910_v23 = vld [vmem:[#allocation12 + $0x64] sm:$0xf]  ;;  %v7038_v30 = vld [vmem:[#allocation12 + $0x68] sm:$0xf0]  ;;  %v7181_v5 = vor.u32 %v7947_v61, %v7180_v38  ;;  %v7492_v14 = vld [vmem:[#allocation12 + $0x3f0] sm:$0xf] }
 0x644   : > { %5014 = vmatpush.bf16.msra.mxu0 %v7269_v1  ;;  %v3947_v1 = vand.u32 2147483648, %v8998_v46  ;;  %v3672_v0 = vadd.f32 %v3671_v63, %v3657_v62  ;;  %4989 = vmatpush.bf16.msrb.mxu2 %v7117_v29  ;;  %v7979_v29 = vld [vmem:[#allocation12 + $0x284] sm:$0xf0]  ;;  %v7928_v33 = vld [vmem:[#allocation12 + $0xf4] sm:$0xf]  ;;  %v9133_v11 = vadd.f32 %v8920_v18, %v8918_v17  ;;  %vm3956_vm7 = vweird.f32 %v9075_v24 }
 0x645   : > { %4962 = vmatmul.bf16.vlgmr.msrb.gmra.mxu0 %v9108_v56  ;;  %v6982_v55 = vmul.f32 -1.442695, %v9106_v53  ;;  %v7110_v62 = vld [vmem:[#allocation12 + $0xf8] sm:$0xf0]  ;;  %v8023_v16 = vld [vmem:[#allocation12 + $0x3e4] sm:$0xf0]  ;;  %vm4076_vm13 = vweird.f32 %v9093_v41 }
 0x646   : > { %v4171_v25 = vmul.f32 %v4155_v45, %v3672_v0  ;;  %v9121_v12 = vor.u32 1.1754944e-38, %v3947_v1  ;;  %v3939_v1 = vmul.f32 %v9063_v47, %v3938_v20  ;;  %v8005_v45 = vld [vmem:[#allocation12 + $0x354] sm:$0xf0]  ;;  %v4059_v20 = vmul.f32 %v9095_v9, %v4058_v60  ;;  %v7908_v61 = vld [vmem:[#allocation12 + $0x54] sm:$0xf] }
 0x647   : > { %5028 = vmatpush.bf16.msra.mxu1 %v7333_v42  ;;  %5001 = vmatpush.bf16.msrb.mxu3 %v7197_v44  ;;  %v4163_v42 = vmul.f32 %v4147_v58, %v3670_v22  ;;  %v7049_v44 = vor.u32 %v7912_v26, %v7046_v15  ;;  %v7421_v22 = vor.u32 %v8007_v3, %v7420_v48  ;;  %v8025_v58 = vld [vmem:[#allocation12 + $0x3f4] sm:$0xf0]  ;;  %v7412_v26 = vld [vmem:[#allocation12 + $0x350] sm:$0xf]  ;;  %v6975_v0 = vmul.f32 -1.442695, %v8888_v57 }
 0x648   : > { %5015 = vmatpush.bf16.msra.mxu0 %v7261_v37  ;;  %v6974_v37 = vmul.f32 -1.442695, %v8886_v21  ;;  %v9119_v7 = vpop.eup %8180  ;;  %5038 = vmatpush.bf16.msra.mxu2 %v7429_v51  ;;  %v7493_v43 = vor.u32 %v8025_v58, %v7492_v14  ;;  %v7484_v15 = vld [vmem:[#allocation12 + $0x3e0] sm:$0xf]  ;;  %v9553_v35 = vand.u32 2147483647, %v8998_v46  ;;  %v7413_v38 = vor.u32 %v8005_v45, %v7412_v26 }
 0x649   : > { %v9123_v50 = vpack.c.bf16 %v4171_v25, %v4163_v42  ;;  %v9125_v36 = vpop.eup %8182  ;;  %v3952_v63 = vmul.f32 %v9119_v7, %v9075_v24  ;;  %v7030_v42 = vld [vmem:[#allocation12 + $0x58] sm:$0xf0]  ;;  %v7926_v25 = vld [vmem:[#allocation12 + $0xe4] sm:$0xf]  ;;  %v7102_v48 = vld [vmem:[#allocation12 + $0xe8] sm:$0xf0]  ;;  %vm3957_vm8 = vweird.f32 %v9119_v7 }
 0x64a   : > { %8184 = vpow2.f32 %v6974_v37  ;;  %vm9140_vm0 = vcmp.eq.f32.partialorder %v9553_v35, 8.507059e+37  ;;  %v4072_v18 = vmul.f32 %v9125_v36, %v9093_v41  ;;  %v7113_v37 = vor.u32 %v7928_v33, %v7110_v62  ;;  %v7404_v3 = vld [vmem:[#allocation12 + $0x340] sm:$0xf]  ;;  %v8003_v60 = vld [vmem:[#allocation12 + $0x344] sm:$0xf0]  ;;  %vm9206_vm11 = vmor %vm3956_vm7, %vm3957_vm8 }
 0x64b   : > { %5029 = vmatpush.bf16.msra.mxu1 %v7325_v32  ;;  %5002 = vmatpush.bf16.msrb.mxu3 %v7189_v59  ;;  %v3960_v32 = vand.u32 2147483647, %v9075_v24  ;;  %v7041_v59 = vor.u32 %v7910_v23, %v7038_v30  ;;  %8186 = vpow2.f32 %v6982_v55  ;;  %v3962_v23 = vand.u32 2147483648, %v9075_v24  ;;  %v7906_v62 = vld [vmem:[#allocation12 + $0x44] sm:$0xf] }
 0x64c   : > { %5016 = vmatpush.bf16.msra.mxu0 %v7253_v19  ;;  %v7308_v19 = vld [vmem:[#allocation12 + $0x280] sm:$0xf]  ;;  %4976 = vmatmul.bf16.vlgmr.msrb.gmra.mxu1 %v9123_v50  ;;  %v4065_v30 = vand.u32 2147483647, %v9029_v10  ;;  %v6983_v55 = vmul.f32 -1.442695, %v9133_v11  ;;  %v7105_v58 = vor.u32 %v7926_v25, %v7102_v48  ;;  %v7405_v33 = vor.u32 %v8003_v60, %v7404_v3 }
 0x64d   : > { %v7309_v51 = vor.u32 %v7979_v29, %v7308_v19  ;;  %5039 = vmatpush.bf16.msra.mxu2 %v7421_v22  ;;  %v9152_v22 = vadd.f32 %v9095_v9, %v4059_v20  ;;  %v7033_v19 = vor.u32 %v7908_v61, %v7030_v42  ;;  %v4067_v14 = vand.u32 2147483648, %v9029_v10  ;;  %v8021_v26 = vld [vmem:[#allocation12 + $0x3d4] sm:$0xf0]  ;;  %v7924_v46 = vld [vmem:[#allocation12 + $0xd4] sm:$0xf] }
 0x64e   : > { %8188 = vpow2.f32 %v6975_v0  ;;  %v7904_v61 = vld [vmem:[#allocation12 + $0x34] sm:$0xf]  ;;  %v7014_v48 = vld [vmem:[#allocation12 + $0x38] sm:$0xf0]  ;;  %v7468_v3 = vld [vmem:[#allocation12 + $0x3c0] sm:$0xf]  ;;  %vm4077_vm12 = vweird.f32 %v9125_v36 }
 0x64f   : > { %5030 = vmatpush.bf16.msra.mxu1 %v7317_v8  ;;  %5003 = vmatpush.bf16.msrb.mxu3 %v7181_v5  ;;  %v3953_v8 = vsub.f32 1.0, %v3952_v63  ;;  %v7022_v63 = vld [vmem:[#allocation12 + $0x48] sm:$0xf0]  ;;  %8190 = vpow2.f32 %v6983_v55  ;;  %v8019_v60 = vld [vmem:[#allocation12 + $0x3c4] sm:$0xf0]  ;;  %vm9190_vm9 = vcmp.eq.f32.partialorder %v3960_v32, 8.507059e+37  ;;  %vm9226_vm14 = vmor %vm4076_vm13, %vm4077_vm12 }
 0x650   : > { %5017 = vmatpush.bf16.msra.mxu0 %v7245_v31  ;;  %v7485_v31 = vor.u32 %v8023_v16, %v7484_v15  ;;  %v8185_v5 = vpop.eup %8184  ;;  %v3683_v10 = vpop.f32.mrf.mxu0  ;;  %v7094_v16 = vld [vmem:[#allocation12 + $0xd8] sm:$0xf0]  ;;  %vm4066_vm10 = vcmp.eq.f32.partialorder %v4065_v30, 8.507059e+37  ;;  %v7086_v55 = vld [vmem:[#allocation12 + $0xc8] sm:$0xf0]  ;;  %v3963_v32 = vor.u32 1.1754944e-38, %v3962_v23  ;;  %v7017_v30 = vor.u32 %v7904_v61, %v7014_v48 }
 0x651   : > { %5040 = vmatpush.bf16.msra.mxu2 %v7413_v38  ;;  %v3954_v20 = vmul.f32 %v9119_v7, %v3953_v8  ;;  %v3697_v0 = vpop.f32.mrf.mxu1  ;;  %v8187_v35 = vpop.eup %8186  ;;  %v8001_v38 = vld [vmem:[#allocation12 + $0x334] sm:$0xf0]  ;;  %v7097_v25 = vor.u32 %v7924_v46, %v7094_v16  ;;  %v4068_v8 = vor.u32 1.1754944e-38, %v4067_v14  ;;  %v4080_v29 = vand.u32 2147483647, %v9093_v41 }
 0x652   : > { %v7388_v14 = vld [vmem:[#allocation12 + $0x320] sm:$0xf]  ;;  %v7006_v46 = vld [vmem:[#allocation12 + $0x28] sm:$0xf0]  ;;  %v3698_v24 = vadd.f32 %v3697_v0, %v3683_v10  ;;  %v7460_v16 = vld [vmem:[#allocation12 + $0x3b0] sm:$0xf] }
 0x653   : > { %5052 = vmatpush.bf16.msra.mxu3 %v7493_v43  ;;  %5031 = vmatpush.bf16.msra.mxu1 %v7309_v51  ;;  %v7476_v43 = vld [vmem:[#allocation12 + $0x3d0] sm:$0xf]  ;;  %v9176_v51 = vadd.f32 1.0, %v8185_v5  ;;  %v7469_v5 = vor.u32 %v8019_v60, %v7468_v3  ;;  %v7997_v3 = vld [vmem:[#allocation12 + $0x314] sm:$0xf0]  ;;  %vm4081_vm15 = vcmp.eq.f32.partialorder %v4080_v29, 8.507059e+37 }
 0x654   : > { %5066 = vmatpush.bf16.msrb.mxu0 %v7049_v44  ;;  %v3940_v44 = vadd.f32 %v9063_v47, %v3939_v1  ;;  %v4073_v1 = vsub.f32 1.0, %v4072_v18  ;;  %v7477_v15 = vor.u32 %v8021_v26, %v7476_v43  ;;  %v7025_v18 = vor.u32 %v7906_v62, %v7022_v63  ;;  %v8189_v17 = vpop.eup %8188  ;;  %v7902_v26 = vld [vmem:[#allocation12 + $0x24] sm:$0xf]  ;;  %v7380_v48 = vld [vmem:[#allocation12 + $0x310] sm:$0xf] }
 0x655   : > { %5041 = vmatpush.bf16.msra.mxu2 %v7405_v33  ;;  %8192 = vrcp.f32 %v9176_v51  ;;  %v7999_v33 = vld [vmem:[#allocation12 + $0x324] sm:$0xf0] }
 0x656   : > { %v3944_v45 = vsel %vm9160_vm4, %v9063_v47, %v3940_v44  ;;  %v4064_v47 = vsel %vm9172_vm6, %v9095_v9, %v9152_v22  ;;  %v4074_v42 = vmul.f32 %v9125_v36, %v4073_v1  ;;  %v7922_v22 = vld [vmem:[#allocation12 + $0xc4] sm:$0xf]  ;;  %v7389_v43 = vor.u32 %v7999_v33, %v7388_v14  ;;  %v7070_v14 = vld [vmem:[#allocation12 + $0xa8] sm:$0xf0] }
 0x657   : > { %5080 = vmatpush.bf16.msrb.mxu1 %v7113_v37  ;;  %5053 = vmatpush.bf16.msra.mxu3 %v7485_v31  ;;  %v7396_v37 = vld [vmem:[#allocation12 + $0x330] sm:$0xf]  ;;  %v3949_v9 = vsel %vm9140_vm0, %v9121_v12, %v3944_v45  ;;  %v9199_v12 = vadd.f32 1.0, %v8187_v35  ;;  %v4069_v1 = vsel %vm4066_vm10, %v4068_v8, %v4064_v47  ;;  %v7089_v23 = vor.u32 %v7922_v22, %v7086_v55  ;;  %v8191_v45 = vpop.eup %8190  ;;  %v8017_v35 = vld [vmem:[#allocation12 + $0x3b4] sm:$0xf0] }
 0x658   : > { %5067 = vmatpush.bf16.msrb.mxu0 %v7041_v59  ;;  %v7397_v31 = vor.u32 %v8001_v38, %v7396_v37  ;;  %v4075_v63 = vadd.f32 %v9125_v36, %v4074_v42  ;;  %v7920_v47 = vld [vmem:[#allocation12 + $0xb4] sm:$0xf]  ;;  %v9218_v37 = vadd.f32 1.0, %v8189_v17  ;;  %v3685_v38 = vpop.f32.mrf.mxu0  ;;  %v7461_v61 = vor.u32 %v8017_v35, %v7460_v16  ;;  %v7078_v42 = vld [vmem:[#allocation12 + $0xb8] sm:$0xf0] }
 0x659   : > { %v3711_v59 = vpop.f32.mrf.mxu2  ;;  %8194 = vrcp.f32 %v9199_v12  ;;  %v4156_v10 = vmul.f32 %v4069_v1, %v8951_v13  ;;  %v7381_v8 = vor.u32 %v7997_v3, %v7380_v48  ;;  %v6998_v22 = vld [vmem:[#allocation12 + $0x18] sm:$0xf0]  ;;  %v7452_v17 = vld [vmem:[#allocation12 + $0x3a0] sm:$0xf]  ;;  %v8015_v1 = vld [vmem:[#allocation12 + $0x3a4] sm:$0xf0]  ;;  %vm3971_vm0 = vweird.f32 %v9176_v51 }
 0x65a   : > { %5042 = vmatpush.bf16.msra.mxu2 %v7397_v31  ;;  %v7009_v31 = vor.u32 %v7902_v26, %v7006_v46  ;;  %v4079_v13 = vsel %vm9226_vm14, %v9125_v36, %v4075_v63  ;;  %8196 = vrcp.f32 %v9218_v37  ;;  %v7453_v36 = vor.u32 %v8015_v1, %v7452_v17  ;;  %v7995_v26 = vld [vmem:[#allocation12 + $0x304] sm:$0xf0]  ;;  %v7898_v46 = vld [vmem:[#allocation12 + $0x4] sm:$0xf]  ;;  %v7174_v16 = vld [vmem:[#allocation12 + $0x178] sm:$0xf0] }
 0x65b   : > { %5081 = vmatpush.bf16.msrb.mxu1 %v7105_v58  ;;  %5054 = vmatpush.bf16.msra.mxu3 %v7477_v15  ;;  %v4082_v58 = vand.u32 2147483648, %v9093_v41  ;;  %v3725_v15 = vpop.f32.mrf.mxu3  ;;  %v9230_v60 = vpop.eup %8192  ;;  %v7081_v41 = vor.u32 %v7920_v47, %v7078_v42  ;;  %v7916_v42 = vld [vmem:[#allocation12 + $0x94] sm:$0xf]  ;;  %v6976_v3 = vmul.f32 -1.442695, %v8926_v34  ;;  %vm4091_vm5 = vweird.f32 %v9199_v12 }
 0x65c   : > { %5068 = vmatpush.bf16.msrb.mxu0 %v7033_v19  ;;  %v9195_v19 = vadd.f32 %v9119_v7, %v3954_v20  ;;  %v4148_v20 = vmul.f32 %v3949_v9, %v8934_v27  ;;  %v3699_v27 = vpop.f32.mrf.mxu1  ;;  %v9235_v9 = vadd.f32 1.0, %v8191_v45  ;;  %v9242_v62 = vmul.f32 %v9230_v60, %v9176_v51 }
 0x65d   : > { %v3726_v44 = vadd.f32 %v3725_v15, %v3711_v59  ;;  %vm3972_vm1 = vweird.f32 %v9230_v60  ;;  %vm3986_vm7 = vweird.f32 %v9218_v37 }
 0x65e   : > { %5043 = vmatpush.bf16.msra.mxu2 %v7389_v43  ;;  %v4164_v55 = vmul.f32 %v4148_v20, %v3698_v24  ;;  %v7372_v43 = vld [vmem:[#allocation12 + $0x300] sm:$0xf]  ;;  %v6990_v20 = vld [vmem:[#allocation12 + $0x8] sm:$0xf0]  ;;  %v7944_v24 = vld [vmem:[#allocation12 + $0x174] sm:$0xf]  ;;  %8198 = vrcp.f32 %v9235_v9  ;;  %vm4106_vm13 = vweird.f32 %v9235_v9 }
 0x65f   : > { %5082 = vmatpush.bf16.msrb.mxu1 %v7097_v25  ;;  %5055 = vmatpush.bf16.msra.mxu3 %v7469_v5  ;;  %v4083_v25 = vor.u32 1.1754944e-38, %v4082_v58  ;;  %v7900_v5 = vld [vmem:[#allocation12 + $0x14] sm:$0xf]  ;;  %v7918_v58 = vld [vmem:[#allocation12 + $0xa4] sm:$0xf]  ;;  %v9246_v45 = vpop.eup %8194  ;;  %v3968_v0 = vsub.f32 1.0, %v9242_v62  ;;  %8200 = vpow2.f32 %v6976_v3  ;;  %vm9290_vm4 = vmor %vm3971_vm0, %vm3972_vm1 }
 0x660   : > { %5069 = vmatpush.bf16.msrb.mxu0 %v7025_v18  ;;  %v3959_v18 = vsel %vm9206_vm11, %v9119_v7, %v9195_v19  ;;  %v3700_v7 = vadd.f32 %v3699_v27, %v3685_v38  ;;  %v7073_v29 = vor.u32 %v7918_v58, %v7070_v14  ;;  %v7444_v38 = vld [vmem:[#allocation12 + $0x390] sm:$0xf]  ;;  %v9255_v48 = vpop.eup %8196  ;;  %v7914_v58 = vld [vmem:[#allocation12 + $0x84] sm:$0xf]  ;;  %v7238_v62 = vld [vmem:[#allocation12 + $0x1f8] sm:$0xf0]  ;;  %vm4092_vm2 = vweird.f32 %v9246_v45 }
 0x661   : > { %v4084_v33 = vsel %vm4081_vm15, %v4083_v25, %v4079_v13  ;;  %v3713_v35 = vpop.f32.mrf.mxu2  ;;  %v4087_v25 = vmul.f32 %v9246_v45, %v9199_v12  ;;  %vm9301_vm6 = vmor %vm4091_vm5, %vm4092_vm2  ;;  %vm3987_vm8 = vweird.f32 %v9255_v48 }
 0x662   : > { %v4172_v19 = vmul.f32 %v4156_v10, %v3700_v7  ;;  %5044 = vmatpush.bf16.msra.mxu2 %v7381_v8  ;;  %v4157_v59 = vmul.f32 %v4084_v33, %v8984_v4  ;;  %v7062_v10 = vld [vmem:[#allocation12 + $0x98] sm:$0xf0]  ;;  %v6993_v7 = vor.u32 %v7898_v46, %v6990_v20  ;;  %v7166_v8 = vld [vmem:[#allocation12 + $0x168] sm:$0xf0]  ;;  %v7940_v46 = vld [vmem:[#allocation12 + $0x154] sm:$0xf] }
 0x663   : > { %5083 = vmatpush.bf16.msrb.mxu1 %v7089_v23  ;;  %5056 = vmatpush.bf16.msra.mxu3 %v7461_v61  ;;  %v7001_v23 = vor.u32 %v7900_v5, %v6998_v22  ;;  %v3727_v47 = vpop.f32.mrf.mxu3  ;;  %v8013_v61 = vld [vmem:[#allocation12 + $0x394] sm:$0xf0]  ;;  %v7065_v4 = vor.u32 %v7916_v42, %v7062_v10  ;;  %v6984_v5 = vmul.f32 -1.442695, %v8938_v54  ;;  %v4088_v33 = vsub.f32 1.0, %v4087_v25  ;;  %vm9330_vm12 = vmor %vm3986_vm7, %vm3987_vm8 }
 0x664   : > { %5070 = vmatpush.bf16.msrb.mxu0 %v7017_v30  ;;  %v3964_v30 = vsel %vm9190_vm9, %v3963_v32, %v3959_v18  ;;  %v9244_v63 = vpack.c.bf16 %v4172_v19, %v4164_v55  ;;  %v7373_v32 = vor.u32 %v7995_v26, %v7372_v43  ;;  %v7177_v18 = vor.u32 %v7944_v24, %v7174_v16  ;;  %v7436_v55 = vld [vmem:[#allocation12 + $0x380] sm:$0xf]  ;;  %v8011_v19 = vld [vmem:[#allocation12 + $0x384] sm:$0xf0]  ;;  %v9261_v14 = vpop.eup %8198  ;;  %v7230_v20 = vld [vmem:[#allocation12 + $0x1e8] sm:$0xf0] }
 0x665   : > { %v4149_v27 = vmul.f32 %v3964_v30, %v8971_v49  ;;  %v3728_v15 = vadd.f32 %v3727_v47, %v3713_v35  ;;  %v7437_v1 = vor.u32 %v8011_v19, %v7436_v55  ;;  %v7054_v30 = vld [vmem:[#allocation12 + $0x88] sm:$0xf0]  ;;  %v3969_v24 = vmul.f32 %v9230_v60, %v3968_v0  ;;  %v8201_v3 = vpop.eup %8200 }
 0x666   : > { %4990 = vmatmul.bf16.vlgmr.msrb.gmra.mxu2 %v9244_v63  ;;  %v7057_v43 = vor.u32 %v7914_v58, %v7054_v30  ;;  %v4102_v16 = vmul.f32 %v9261_v14, %v9235_v9  ;;  %8202 = vpow2.f32 %v6984_v5  ;;  %v4089_v47 = vmul.f32 %v9246_v45, %v4088_v33  ;;  %v7142_v58 = vld [vmem:[#allocation12 + $0x138] sm:$0xf0] }
 0x667   : > { %5084 = vmatpush.bf16.msrb.mxu1 %v7081_v41  ;;  %5057 = vmatpush.bf16.msra.mxu3 %v7453_v36  ;;  %v4165_v13 = vmul.f32 %v4149_v27, %v3726_v44  ;;  %v4173_v49 = vmul.f32 %v4157_v59, %v3728_v15  ;;  %v7942_v41 = vld [vmem:[#allocation12 + $0x164] sm:$0xf]  ;;  %v7960_v36 = vld [vmem:[#allocation12 + $0x1f4] sm:$0xf]  ;;  %v7158_v44 = vld [vmem:[#allocation12 + $0x158] sm:$0xf0]  ;;  %v3970_v10 = vadd.f32 %v9230_v60, %v3969_v24  ;;  %vm4107_vm11 = vweird.f32 %v9261_v14 }
 0x668   : > { %5071 = vmatpush.bf16.msrb.mxu0 %v7009_v31  ;;  %v7445_v31 = vor.u32 %v8013_v61, %v7444_v38  ;;  %5045 = vmatpush.bf16.msra.mxu2 %v7373_v32  ;;  %v7169_v22 = vor.u32 %v7942_v41, %v7166_v8  ;;  %v7241_v26 = vor.u32 %v7960_v36, %v7238_v62  ;;  %v7958_v32 = vld [vmem:[#allocation12 + $0x1e4] sm:$0xf]  ;;  %v7150_v38 = vld [vmem:[#allocation12 + $0x148] sm:$0xf0]  ;;  %v3975_v27 = vand.u32 2147483647, %v9176_v51  ;;  %vm9345_vm14 = vmor %vm4106_vm13, %vm4107_vm11 }
 0x669   : > { %v9259_v17 = vpack.c.bf16 %v4173_v49, %v4165_v13  ;;  %v7233_v35 = vor.u32 %v7958_v32, %v7230_v20  ;;  %v6977_v15 = vmul.f32 -1.442695, %v8936_v28  ;;  %v6985_v61 = vmul.f32 -1.442695, %v8961_v39  ;;  %v7954_v62 = vld [vmem:[#allocation12 + $0x1c4] sm:$0xf] }
 0x66a   : > { %v3977_v0 = vand.u32 2147483648, %v9176_v51  ;;  %v4103_v25 = vsub.f32 1.0, %v4102_v16  ;;  %v3990_v13 = vand.u32 2147483647, %v9218_v37  ;;  %v4090_v49 = vadd.f32 %v9246_v45, %v4089_v47  ;;  %v7934_v16 = vld [vmem:[#allocation12 + $0x124] sm:$0xf] }
 0x66b   : > { %5085 = vmatpush.bf16.msrb.mxu1 %v7073_v29  ;;  %5058 = vmatpush.bf16.msra.mxu3 %v7445_v31  ;;  %v7161_v29 = vor.u32 %v7940_v46, %v7158_v44  ;;  %v7222_v31 = vld [vmem:[#allocation12 + $0x1d8] sm:$0xf0]  ;;  %vm9280_vm3 = vcmp.eq.f32.partialorder %v3975_v27, 8.507059e+37  ;;  %8204 = vpow2.f32 %v6977_v15  ;;  %v4095_v36 = vand.u32 2147483647, %v9199_v12 }
 0x66c   : > { %5072 = vmatpush.bf16.msrb.mxu0 %v7001_v23  ;;  %5094 = vmatpush.bf16.msrb.mxu2 %v7177_v18  ;;  %v3982_v23 = vmul.f32 %v9255_v48, %v9218_v37  ;;  %v7938_v18 = vld [vmem:[#allocation12 + $0x144] sm:$0xf]  ;;  %v8203_v41 = vpop.eup %8202  ;;  %8206 = vpow2.f32 %v6985_v61  ;;  %v9306_v46 = vadd.f32 1.0, %v8201_v3  ;;  %v3978_v44 = vor.u32 1.1754944e-38, %v3977_v0  ;;  %v7952_v15 = vld [vmem:[#allocation12 + $0x1b4] sm:$0xf] }
 0x66d   : > { %5004 = vmatmul.bf16.vlgmr.msrb.gmra.mxu3 %v9259_v17  ;;  %v7153_v42 = vor.u32 %v7938_v18, %v7150_v38  ;;  %v3992_v20 = vand.u32 2147483648, %v9218_v37  ;;  %vm9319_vm9 = vcmp.eq.f32.partialorder %v3990_v13, 8.507059e+37  ;;  %vm4096_vm10 = vcmp.eq.f32.partialorder %v4095_v36, 8.507059e+37  ;;  %v7206_v61 = vld [vmem:[#allocation12 + $0x1b8] sm:$0xf0] }
 0x66e   : > { %v3983_v59 = vsub.f32 1.0, %v3982_v23  ;;  %v7214_v23 = vld [vmem:[#allocation12 + $0x1c8] sm:$0xf0]  ;;  %8208 = vrcp.f32 %v9306_v46  ;;  %v4112_v0 = vand.u32 2147483648, %v9235_v9  ;;  %v7209_v3 = vor.u32 %v7952_v15, %v7206_v61  ;;  %v7932_v8 = vld [vmem:[#allocation12 + $0x114] sm:$0xf] }
 0x66f   : > { %5086 = vmatpush.bf16.msrb.mxu1 %v7065_v4  ;;  %5059 = vmatpush.bf16.msra.mxu3 %v7437_v1  ;;  %v7936_v1 = vld [vmem:[#allocation12 + $0x134] sm:$0xf]  ;;  %v4110_v37 = vand.u32 2147483647, %v9235_v9  ;;  %v3993_v9 = vor.u32 1.1754944e-38, %v3992_v20  ;;  %vm4001_vm2 = vweird.f32 %v9306_v46 }
 0x670   : > { %5073 = vmatpush.bf16.msrb.mxu0 %v6993_v7  ;;  %5095 = vmatpush.bf16.msrb.mxu2 %v7169_v22  ;;  %v7956_v7 = vld [vmem:[#allocation12 + $0x1d4] sm:$0xf]  ;;  %v3984_v5 = vmul.f32 %v9255_v48, %v3983_v59  ;;  %v4097_v22 = vand.u32 2147483648, %v9199_v12  ;;  %v3739_v55 = vpop.f32.mrf.mxu0  ;;  %v3753_v19 = vpop.f32.mrf.mxu1  ;;  %v7145_v33 = vor.u32 %v7936_v1, %v7142_v58  ;;  %v7217_v12 = vor.u32 %v7954_v62, %v7214_v23  ;;  %v7302_v1 = vld [vmem:[#allocation12 + $0x278] sm:$0xf0] }
 0x671   : > { %v7225_v4 = vor.u32 %v7956_v7, %v7222_v31  ;;  %v8205_v38 = vpop.eup %8204  ;;  %v4113_v62 = vor.u32 1.1754944e-38, %v4112_v0  ;;  %vm4111_vm15 = vcmp.eq.f32.partialorder %v4110_v37, 8.507059e+37  ;;  %v7948_v18 = vld [vmem:[#allocation12 + $0x194] sm:$0xf] }
 0x672   : > { %v3985_v32 = vadd.f32 %v9255_v48, %v3984_v5  ;;  %v4098_v24 = vor.u32 1.1754944e-38, %v4097_v22  ;;  %v7126_v5 = vld [vmem:[#allocation12 + $0x118] sm:$0xf0] }
 0x673   : > { %5108 = vmatpush.bf16.msrb.mxu3 %v7241_v26  ;;  %5087 = vmatpush.bf16.msrb.mxu1 %v7057_v43  ;;  %v3974_v43 = vsel %vm9290_vm4, %v9230_v60, %v3970_v10  ;;  %v4104_v26 = vmul.f32 %v9261_v14, %v4103_v25  ;;  %v9312_v60 = vadd.f32 1.0, %v8203_v41  ;;  %v3754_v25 = vadd.f32 %v3753_v19, %v3739_v55 }
 0x674   : > { %5096 = vmatpush.bf16.msrb.mxu2 %v7161_v29  ;;  %v4094_v29 = vsel %vm9301_vm6, %v9246_v45, %v4090_v49  ;;  %v3979_v47 = vsel %vm9280_vm3, %v3978_v44, %v3974_v43  ;;  %v3989_v49 = vsel %vm9330_vm12, %v9255_v48, %v3985_v32  ;;  %v7976_v48 = vld [vmem:[#allocation12 + $0x274] sm:$0xf]  ;;  %v7129_v58 = vor.u32 %v7932_v8, %v7126_v5  ;;  %v7118_v32 = vld [vmem:[#allocation12 + $0x108] sm:$0xf0] }
 0x675   : > { %v4099_v27 = vsel %vm4096_vm10, %v4098_v24, %v4094_v29  ;;  %v4105_v59 = vadd.f32 %v9261_v14, %v4104_v26  ;;  %8210 = vrcp.f32 %v9312_v60  ;;  %v4150_v13 = vmul.f32 %v3979_v47, %v8886_v21  ;;  %v7930_v29 = vld [vmem:[#allocation12 + $0x104] sm:$0xf] }
 0x676   : > { %v4158_v22 = vmul.f32 %v4099_v27, %v9106_v53  ;;  %v9349_v21 = vadd.f32 1.0, %v8205_v38  ;;  %v7950_v53 = vld [vmem:[#allocation12 + $0x1a4] sm:$0xf]  ;;  %v7305_v44 = vor.u32 %v7976_v48, %v7302_v1  ;;  %v7121_v47 = vor.u32 %v7930_v29, %v7118_v32  ;;  %v7190_v38 = vld [vmem:[#allocation12 + $0x198] sm:$0xf0] }
 0x677   : > { %5109 = vmatpush.bf16.msrb.mxu3 %v7233_v35  ;;  %v7134_v35 = vld [vmem:[#allocation12 + $0x128] sm:$0xf0]  ;;  %v4109_v30 = vsel %vm9345_vm14, %v9261_v14, %v4105_v59  ;;  %v4166_v23 = vmul.f32 %v4150_v13, %v3754_v25  ;;  %v7972_v13 = vld [vmem:[#allocation12 + $0x254] sm:$0xf]  ;;  %v7350_v29 = vld [vmem:[#allocation12 + $0x2d8] sm:$0xf0]  ;;  %vm4121_vm5 = vweird.f32 %v9312_v60 }
 0x678   : > { %5097 = vmatpush.bf16.msrb.mxu2 %v7153_v42  ;;  %v7137_v45 = vor.u32 %v7934_v16, %v7134_v35  ;;  %v8207_v42 = vpop.eup %8206  ;;  %v3755_v41 = vpop.f32.mrf.mxu1  ;;  %v4114_v14 = vsel %vm4111_vm15, %v4113_v62, %v4109_v30  ;;  %8212 = vrcp.f32 %v9349_v21  ;;  %v7974_v16 = vld [vmem:[#allocation12 + $0x264] sm:$0xf]  ;;  %v7294_v35 = vld [vmem:[#allocation12 + $0x268] sm:$0xf0]  ;;  %v7968_v32 = vld [vmem:[#allocation12 + $0x234] sm:$0xf]  ;;  %vm4016_vm10 = vweird.f32 %v9349_v21 }
 0x679   : > { %v3767_v7 = vpop.f32.mrf.mxu2  ;;  %v3781_v31 = vpop.f32.mrf.mxu3  ;;  %v9354_v36 = vadd.f32 1.0, %v8207_v42  ;;  %v7193_v42 = vor.u32 %v7948_v18, %v7190_v38  ;;  %v4159_v10 = vmul.f32 %v4114_v14, %v9133_v11  ;;  %v7970_v30 = vld [vmem:[#allocation12 + $0x244] sm:$0xf]  ;;  %v7270_v14 = vld [vmem:[#allocation12 + $0x238] sm:$0xf0] }
 0x67a   : > { %v9356_v26 = vpop.eup %8208 }
 0x67b   : > { %5110 = vmatpush.bf16.msrb.mxu3 %v7225_v4  ;;  %v3741_v4 = vpop.f32.mrf.mxu0  ;;  %v9360_v20 = vpop.eup %8210  ;;  %8214 = vrcp.f32 %v9354_v36  ;;  %v3997_v59 = vmul.f32 %v9356_v26, %v9306_v46  ;;  %vm4002_vm0 = vweird.f32 %v9356_v26  ;;  %vm4136_vm12 = vweird.f32 %v9354_v36 }
 0x67c   : > { %5098 = vmatpush.bf16.msrb.mxu2 %v7145_v33  ;;  %v3756_v19 = vadd.f32 %v3755_v41, %v3741_v4  ;;  %v7198_v33 = vld [vmem:[#allocation12 + $0x1a8] sm:$0xf0]  ;;  %v4117_v0 = vmul.f32 %v9360_v20, %v9312_v60  ;;  %v7946_v4 = vld [vmem:[#allocation12 + $0x184] sm:$0xf]  ;;  %vm4122_vm1 = vweird.f32 %v9360_v20  ;;  %vm9396_vm3 = vmor %vm4001_vm2, %vm4002_vm0 }
 0x67d   : > { %v7201_v51 = vor.u32 %v7950_v53, %v7198_v33  ;;  %v7182_v41 = vld [vmem:[#allocation12 + $0x188] sm:$0xf0]  ;;  %v3998_v5 = vsub.f32 1.0, %v3997_v59  ;;  %v7273_v59 = vor.u32 %v7968_v32, %v7270_v14  ;;  %vm9412_vm6 = vmor %vm4121_vm5, %vm4122_vm1  ;;  %v4140_v14 = vand.u32 2147483647, %v9354_v36 }
 0x67e   : > { %v4174_v43 = vmul.f32 %v4158_v22, %v3756_v19  ;;  %v9373_v8 = vpop.eup %8212  ;;  %v7185_v22 = vor.u32 %v7946_v4, %v7182_v41  ;;  %v4118_v19 = vsub.f32 1.0, %v4117_v0  ;;  %v7278_v53 = vld [vmem:[#allocation12 + $0x248] sm:$0xf0]  ;;  %v7398_v32 = vld [vmem:[#allocation12 + $0x338] sm:$0xf0] }
 0x67f   : > { %5111 = vmatpush.bf16.msrb.mxu3 %v7217_v12  ;;  %v3994_v12 = vsel %vm9319_vm9, %v3993_v9, %v3989_v49  ;;  %v7358_v9 = vld [vmem:[#allocation12 + $0x2e8] sm:$0xf0]  ;;  %v4012_v33 = vmul.f32 %v9373_v8, %v9349_v21  ;;  %v3999_v62 = vmul.f32 %v9356_v26, %v3998_v5  ;;  %v4020_v5 = vand.u32 2147483647, %v9349_v21 }
 0x680   : > { %5099 = vmatpush.bf16.msrb.mxu2 %v7137_v45  ;;  %v9363_v24 = vpack.c.bf16 %v4174_v43, %v4166_v23  ;;  %v3782_v45 = vadd.f32 %v3781_v31, %v3767_v7  ;;  %v4151_v27 = vmul.f32 %v3994_v12, %v8888_v57  ;;  %v7297_v7 = vor.u32 %v7974_v16, %v7294_v35  ;;  %v7992_v31 = vld [vmem:[#allocation12 + $0x2f4] sm:$0xf]  ;;  %v7286_v57 = vld [vmem:[#allocation12 + $0x258] sm:$0xf0] }
 0x681   : > { %v3769_v15 = vpop.f32.mrf.mxu2  ;;  %v3783_v61 = vpop.f32.mrf.mxu3  ;;  %v7289_v1 = vor.u32 %v7972_v13, %v7286_v57  ;;  %v7281_v12 = vor.u32 %v7970_v30, %v7278_v53  ;;  %v4005_v16 = vand.u32 2147483647, %v9306_v46  ;;  %v4007_v35 = vand.u32 2147483648, %v9306_v46 }
 0x682   : > { %5018 = vmatmul.bf16.vlgmr.msra.gmra.mxu0 %v9363_v24  ;;  %v3784_v25 = vadd.f32 %v3783_v61, %v3769_v15  ;;  %v4167_v49 = vmul.f32 %v4151_v27, %v3782_v45  ;;  %v9375_v55 = vpop.eup %8214  ;;  %v4000_v45 = vadd.f32 %v9356_v26, %v3999_v62  ;;  %v7986_v15 = vld [vmem:[#allocation12 + $0x2c4] sm:$0xf]  ;;  %v7342_v61 = vld [vmem:[#allocation12 + $0x2c8] sm:$0xf0]  ;;  %v4125_v46 = vand.u32 2147483647, %v9312_v60 }
 0x683   : > { %5112 = vmatpush.bf16.msrb.mxu3 %v7209_v3  ;;  %5122 = vmatpush.bf16.msra.mxu0 %v7305_v44  ;;  %v7366_v3 = vld [vmem:[#allocation12 + $0x2f8] sm:$0xf0]  ;;  %v4132_v23 = vmul.f32 %v9375_v55, %v9354_v36  ;;  %v7988_v44 = vld [vmem:[#allocation12 + $0x2d4] sm:$0xf]  ;;  %vm9400_vm4 = vcmp.eq.f32.partialorder %v4005_v16, 8.507059e+37  ;;  %v7345_v41 = vor.u32 %v7986_v15, %v7342_v61  ;;  %vm4017_vm7 = vweird.f32 %v9373_v8 }
 0x684   : > { %5100 = vmatpush.bf16.msrb.mxu2 %v7129_v58  ;;  %v4175_v37 = vmul.f32 %v4159_v10, %v3784_v25  ;;  %v7369_v11 = vor.u32 %v7992_v31, %v7366_v3  ;;  %v7990_v58 = vld [vmem:[#allocation12 + $0x2e4] sm:$0xf]  ;;  %v7353_v38 = vor.u32 %v7988_v44, %v7350_v29  ;;  %v4004_v57 = vsel %vm9396_vm3, %v9356_v26, %v4000_v45  ;;  %v7326_v29 = vld [vmem:[#allocation12 + $0x2a8] sm:$0xf0]  ;;  %vm9433_vm11 = vmor %vm4016_vm10, %vm4017_vm7 }
 0x685   : > { %v7361_v43 = vor.u32 %v7990_v58, %v7358_v9  ;;  %v4133_v18 = vsub.f32 1.0, %v4132_v23  ;;  %v7966_v25 = vld [vmem:[#allocation12 + $0x224] sm:$0xf]  ;;  %v7964_v58 = vld [vmem:[#allocation12 + $0x214] sm:$0xf]  ;;  %vm4126_vm8 = vcmp.eq.f32.partialorder %v4125_v46, 8.507059e+37  ;;  %vm4137_vm9 = vweird.f32 %v9375_v55 }
 0x686   : > { %v9377_v48 = vpack.c.bf16 %v4175_v37, %v4167_v49  ;;  %v4008_v49 = vor.u32 1.1754944e-38, %v4007_v35  ;;  %v7254_v9 = vld [vmem:[#allocation12 + $0x218] sm:$0xf0]  ;;  %v4142_v62 = vand.u32 2147483648, %v9354_v36  ;;  %v7982_v44 = vld [vmem:[#allocation12 + $0x2a4] sm:$0xf]  ;;  %vm9443_vm13 = vmor %vm4136_vm12, %vm4137_vm9 }
 0x687   : > { %5113 = vmatpush.bf16.msrb.mxu3 %v7201_v51  ;;  %5123 = vmatpush.bf16.msra.mxu0 %v7297_v7  ;;  %v4119_v51 = vmul.f32 %v9360_v20, %v4118_v19  ;;  %v7262_v7 = vld [vmem:[#allocation12 + $0x228] sm:$0xf0]  ;;  %v4134_v4 = vmul.f32 %v9375_v55, %v4133_v18  ;;  %v4022_v19 = vand.u32 2147483648, %v9349_v21  ;;  %v7962_v35 = vld [vmem:[#allocation12 + $0x204] sm:$0xf]  ;;  %vm4021_vm14 = vcmp.eq.f32.partialorder %v4020_v5, 8.507059e+37 }
 0x688   : > { %5101 = vmatpush.bf16.msrb.mxu2 %v7121_v47  ;;  %5032 = vmatmul.bf16.vlgmr.msra.gmra.mxu1 %v9377_v48  ;;  %v4013_v47 = vsub.f32 1.0, %v4012_v33  ;;  %v7265_v26 = vor.u32 %v7966_v25, %v7262_v7  ;;  %v4009_v30 = vsel %vm9400_vm4, %v4008_v49, %v4004_v57  ;;  %v7430_v15 = vld [vmem:[#allocation12 + $0x378] sm:$0xf0]  ;;  %v7980_v7 = vld [vmem:[#allocation12 + $0x294] sm:$0xf]  ;;  %vm4141_vm15 = vcmp.eq.f32.partialorder %v4140_v14, 8.507059e+37 }
 0x689   : > { %5136 = vmatpush.bf16.msra.mxu1 %v7369_v11  ;;  %v4120_v27 = vadd.f32 %v9360_v20, %v4119_v51  ;;  %v7984_v11 = vld [vmem:[#allocation12 + $0x2b4] sm:$0xf]  ;;  %v4152_v45 = vmul.f32 %v4009_v30, %v8926_v34  ;;  %v4023_v61 = vor.u32 1.1754944e-38, %v4022_v19  ;;  %v8006_v46 = vld [vmem:[#allocation12 + $0x364] sm:$0xf] }
 0x68a   : > { %v4014_v13 = vmul.f32 %v9373_v8, %v4013_v47  ;;  %v7246_v47 = vld [vmem:[#allocation12 + $0x208] sm:$0xf0]  ;;  %v8024_v19 = vld [vmem:[#allocation12 + $0x3f4] sm:$0xf] }
 0x68b   : > { %5114 = vmatpush.bf16.msrb.mxu3 %v7193_v42  ;;  %5124 = vmatpush.bf16.msra.mxu0 %v7289_v1  ;;  %v4127_v42 = vand.u32 2147483648, %v9312_v60  ;;  %v4124_v60 = vsel %vm9412_vm6, %v9360_v20, %v4120_v27  ;;  %v4135_v20 = vadd.f32 %v9375_v55, %v4134_v4  ;;  %v7249_v25 = vor.u32 %v7962_v35, %v7246_v47  ;;  %v7422_v57 = vld [vmem:[#allocation12 + $0x368] sm:$0xf0]  ;;  %v7998_v47 = vld [vmem:[#allocation12 + $0x324] sm:$0xf] }
 0x68c   : > { %v7470_v35 = vld [vmem:[#allocation12 + $0x3c8] sm:$0xf0] }
 0x68d   : > { %5137 = vmatpush.bf16.msra.mxu1 %v7361_v43  ;;  %v4128_v1 = vor.u32 1.1754944e-38, %v4127_v42  ;;  %v4139_v34 = vsel %vm9443_vm13, %v9375_v55, %v4135_v20  ;;  %v4143_v42 = vor.u32 1.1754944e-38, %v4142_v62 }
 0x68f   : > { %5115 = vmatpush.bf16.msrb.mxu3 %v7185_v22  ;;  %5125 = vmatpush.bf16.msra.mxu0 %v7281_v12  ;;  %v7334_v22 = vld [vmem:[#allocation12 + $0x2b8] sm:$0xf0]  ;;  %v4129_v53 = vsel %vm4126_vm8, %v4128_v1, %v4124_v60  ;;  %v7257_v12 = vor.u32 %v7964_v58, %v7254_v9  ;;  %v7310_v60 = vld [vmem:[#allocation12 + $0x288] sm:$0xf0]  ;;  %v8004_v58 = vld [vmem:[#allocation12 + $0x354] sm:$0xf] }
 0x690   : > { %v3795_v10 = vpop.f32.mrf.mxu0  ;;  %v3809_v0 = vpop.f32.mrf.mxu1  ;;  %v7337_v33 = vor.u32 %v7984_v11, %v7334_v22  ;;  %v4160_v18 = vmul.f32 %v4129_v53, %v8938_v54  ;;  %v7329_v54 = vor.u32 %v7982_v44, %v7326_v29  ;;  %v7425_v22 = vor.u32 %v8006_v46, %v7422_v57  ;;  %v7494_v1 = vld [vmem:[#allocation12 + $0x3f8] sm:$0xf0]  ;;  %v8020_v44 = vld [vmem:[#allocation12 + $0x3d4] sm:$0xf] }
 0x691   : > { %5138 = vmatpush.bf16.msra.mxu1 %v7353_v38  ;;  %v3810_v23 = vadd.f32 %v3809_v0, %v3795_v10  ;;  %v7414_v9 = vld [vmem:[#allocation12 + $0x358] sm:$0xf0]  ;;  %v7497_v20 = vor.u32 %v8024_v19, %v7494_v1 }
 0x692   : > { %5074 = vmatmul.bf16.vlgmr.msrb.gmra.mxu0 %v9108_v56  ;;  %v4015_v56 = vadd.f32 %v9373_v8, %v4014_v13  ;;  %v4144_v13 = vsel %vm4141_vm15, %v4143_v42, %v4139_v34  ;;  %v7417_v62 = vor.u32 %v8004_v58, %v7414_v9  ;;  %v7478_v29 = vld [vmem:[#allocation12 + $0x3d8] sm:$0xf0]  ;;  %v8014_v34 = vld [vmem:[#allocation12 + $0x3a4] sm:$0xf] }
 0x693   : > { %5126 = vmatpush.bf16.msra.mxu0 %v7273_v59  ;;  %v8008_v59 = vld [vmem:[#allocation12 + $0x374] sm:$0xf]  ;;  %v4168_v10 = vmul.f32 %v4152_v45, %v3810_v23  ;;  %v7486_v23 = vld [vmem:[#allocation12 + $0x3e8] sm:$0xf0]  ;;  %v7481_v14 = vor.u32 %v8020_v44, %v7478_v29  ;;  %v7994_v42 = vld [vmem:[#allocation12 + $0x304] sm:$0xf] }
 0x694   : > { %v4019_v36 = vsel %vm9433_vm11, %v9373_v8, %v4015_v56  ;;  %v7433_v31 = vor.u32 %v8008_v59, %v7430_v15  ;;  %v7390_v45 = vld [vmem:[#allocation12 + $0x328] sm:$0xf0]  ;;  %v7462_v59 = vld [vmem:[#allocation12 + $0x3b8] sm:$0xf0]  ;;  %v7996_v15 = vld [vmem:[#allocation12 + $0x314] sm:$0xf] }
 0x695   : > { %5139 = vmatpush.bf16.msra.mxu1 %v7345_v41  ;;  %v4024_v3 = vsel %vm4021_vm14, %v4023_v61, %v4019_v36  ;;  %v7978_v41 = vld [vmem:[#allocation12 + $0x284] sm:$0xf]  ;;  %v7393_v38 = vor.u32 %v7998_v47, %v7390_v45 }
 0x696   : > { %v4153_v5 = vmul.f32 %v4024_v3, %v8936_v28  ;;  %v7313_v53 = vor.u32 %v7978_v41, %v7310_v60  ;;  %v8022_v28 = vld [vmem:[#allocation12 + $0x3e4] sm:$0xf]  ;;  %v7438_v3 = vld [vmem:[#allocation12 + $0x388] sm:$0xf0] }
 0x697   : > { %5127 = vmatpush.bf16.msra.mxu0 %v7265_v26  ;;  %v4161_v26 = vmul.f32 %v4144_v13, %v8961_v39  ;;  %v8002_v39 = vld [vmem:[#allocation12 + $0x344] sm:$0xf] }
 0x698   : > { %v3823_v43 = vpop.f32.mrf.mxu2  ;;  %v3837_v51 = vpop.f32.mrf.mxu3  ;;  %5088 = vmatmul.bf16.vlgmr.msrb.gmra.mxu1 %v9123_v50  ;;  %v7318_v50 = vld [vmem:[#allocation12 + $0x298] sm:$0xf0] }
 0x699   : > { %v3797_v21 = vpop.f32.mrf.mxu0  ;;  %v3811_v16 = vpop.f32.mrf.mxu1  ;;  %5140 = vmatpush.bf16.msra.mxu1 %v7337_v33  ;;  %v3838_v49 = vadd.f32 %v3837_v51, %v3823_v43  ;;  %v7321_v55 = vor.u32 %v7980_v7, %v7318_v50  ;;  %v7406_v43 = vld [vmem:[#allocation12 + $0x348] sm:$0xf0]  ;;  %v7489_v51 = vor.u32 %v8022_v28, %v7486_v23  ;;  %v7446_v7 = vld [vmem:[#allocation12 + $0x398] sm:$0xf0] }
 0x69a   : > { %v3812_v27 = vadd.f32 %v3811_v16, %v3797_v21  ;;  %v8018_v16 = vld [vmem:[#allocation12 + $0x3c4] sm:$0xf] }
 0x69b   : > { %5128 = vmatpush.bf16.msra.mxu0 %v7257_v12  ;;  %v4169_v30 = vmul.f32 %v4153_v5, %v3838_v49  ;;  %v7409_v12 = vor.u32 %v8002_v39, %v7406_v43 }
 0x69c   : > { %v4176_v0 = vmul.f32 %v4160_v18, %v3812_v27  ;;  %v7473_v18 = vor.u32 %v8018_v16, %v7470_v35  ;;  %v8016_v27 = vld [vmem:[#allocation12 + $0x3b4] sm:$0xf] }
 0x69d   : > { %5141 = vmatpush.bf16.msra.mxu1 %v7329_v54  ;;  %v7465_v36 = vor.u32 %v8016_v27, %v7462_v59  ;;  %v7454_v54 = vld [vmem:[#allocation12 + $0x3a8] sm:$0xf0] }
 0x69e   : > { %v9454_v8 = vpack.c.bf16 %v4176_v0, %v4168_v10  ;;  %v7374_v10 = vld [vmem:[#allocation12 + $0x308] sm:$0xf0]  ;;  %v7457_v0 = vor.u32 %v8014_v34, %v7454_v54 }
 0x69f   : > { %5129 = vmatpush.bf16.msra.mxu0 %v7249_v25  ;;  %v8012_v25 = vld [vmem:[#allocation12 + $0x394] sm:$0xf] }
 0x6a0   : > { %v3825_v37 = vpop.f32.mrf.mxu2  ;;  %v3839_v4 = vpop.f32.mrf.mxu3  ;;  %5046 = vmatmul.bf16.vlgmr.msra.gmra.mxu2 %v9454_v8  ;;  %v7449_v50 = vor.u32 %v8012_v25, %v7446_v7 }
 0x6a1   : > { %v3840_v11 = vadd.f32 %v3839_v4, %v3825_v37  ;;  %5150 = vmatpush.bf16.msra.mxu2 %v7433_v31  ;;  %5142 = vmatpush.bf16.msra.mxu1 %v7321_v55  ;;  %v8010_v31 = vld [vmem:[#allocation12 + $0x384] sm:$0xf] }
 0x6a2   : > { %5130 = vmatmul.bf16.vlgmr.msra.gmra.mxu0 %v9363_v24  ;;  %v8000_v24 = vld [vmem:[#allocation12 + $0x334] sm:$0xf]  ;;  %v7441_v13 = vor.u32 %v8010_v31, %v7438_v3 }
 0x6a3   : > { %v4177_v56 = vmul.f32 %v4161_v26, %v3840_v11  ;;  %v7401_v21 = vor.u32 %v8000_v24, %v7398_v32 }
 0x6a5   : > { %v4185_v33 = vpack.c.bf16 %v4177_v56, %v4169_v30  ;;  %5151 = vmatpush.bf16.msra.mxu2 %v7425_v22  ;;  %5143 = vmatpush.bf16.msra.mxu1 %v7313_v53 }
 0x6a7   : > { %5060 = vmatmul.bf16.vlgmr.msra.gmra.mxu3 %v4185_v33 }
 0x6a8   : > { %5164 = vmatpush.bf16.msra.mxu3 %v7497_v20  ;;  %5144 = vmatmul.bf16.vlgmr.msra.gmra.mxu1 %v9377_v48  ;;  %v7382_v48 = vld [vmem:[#allocation12 + $0x318] sm:$0xf0] }
 0x6a9   : > { %5152 = vmatpush.bf16.msra.mxu2 %v7417_v62  ;;  %v7385_v61 = vor.u32 %v7996_v15, %v7382_v48 }
 0x6ac   : > { %5165 = vmatpush.bf16.msra.mxu3 %v7489_v51 }
 0x6ad   : > { %5153 = vmatpush.bf16.msra.mxu2 %v7409_v12 }
 0x6b0   : > { %5166 = vmatpush.bf16.msra.mxu3 %v7481_v14  ;;  %5102 = vmatmul.bf16.vlgmr.msrb.gmra.mxu2 %v9244_v63  ;;  %v7377_v63 = vor.u32 %v7994_v42, %v7374_v10 }
 0x6b1   : > { %5154 = vmatpush.bf16.msra.mxu2 %v7401_v21 }
 0x6b4   : > { %5167 = vmatpush.bf16.msra.mxu3 %v7473_v18 }
 0x6b5   : > { %5155 = vmatpush.bf16.msra.mxu2 %v7393_v38 }
 0x6b7   : > { %5116 = vmatmul.bf16.vlgmr.msrb.gmra.mxu3 %v9259_v17 }
 0x6b8   : > { %5168 = vmatpush.bf16.msra.mxu3 %v7465_v36 }
 0x6b9   : > { %5156 = vmatpush.bf16.msra.mxu2 %v7385_v61 }
 0x6bc   : > { %5169 = vmatpush.bf16.msra.mxu3 %v7457_v0 }
 0x6bd   : > { %5157 = vmatpush.bf16.msra.mxu2 %v7377_v63 }
 0x6c0   : > { %5170 = vmatpush.bf16.msra.mxu3 %v7449_v50  ;;  %5158 = vmatmul.bf16.vlgmr.msra.gmra.mxu2 %v9454_v8 }
 0x6c2   : > { %v4963_v46 = vpop.f32.mrf.mxu0 }
 0x6c4   : > { %5171 = vmatpush.bf16.msra.mxu3 %v7441_v13 }
 0x6c7   : > { %5172 = vmatmul.bf16.vlgmr.msra.gmra.mxu3 %v4185_v33 }
 0x6c9   : > { %v4977_v57 = vpop.f32.mrf.mxu1 }
 0x6ca   : > { %v4965_v17 = vpop.f32.mrf.mxu0  ;;  %v4978_v5 = vadd.f32 %v4977_v57, %v4963_v46 }
 0x6d1   : > { %v4979_v55 = vpop.f32.mrf.mxu1 }
 0x6d2   : > { %v4980_v9 = vadd.f32 %v4979_v55, %v4965_v17 }
 0x6e9   : > { %v4991_v49 = vpop.f32.mrf.mxu2 }
 0x6ea   : > { %v4992_v26 = vadd.f32 %v4991_v49, %v4978_v5 }
 0x6f0   : > { %v5005_v37 = vpop.f32.mrf.mxu3 }
 0x6f1   : > { %v4993_v41 = vpop.f32.mrf.mxu2  ;;  %v5006_v19 = vadd.f32 %v5005_v37, %v4992_v26 }
 0x6f2   : > { %v4994_v56 = vadd.f32 %v4993_v41, %v4980_v9 }
 0x6f8   : > { %v5007_v11 = vpop.f32.mrf.mxu3 }
 0x6f9   : > { %v5008_v33 = vadd.f32 %v5007_v11, %v4994_v56 }
 0x6ff   : > { %v5019_v4 = vpop.f32.mrf.mxu0 }
 0x700   : > { %v5020_v8 = vadd.f32 %v5019_v4, %v5006_v19 }
 0x705   : > { %v5033_v60 = vpop.f32.mrf.mxu1 }
 0x706   : > { %v5034_v30 = vadd.f32 %v5033_v60, %v5020_v8 }
 0x707   : > { %v5021_v22 = vpop.f32.mrf.mxu0 }
 0x708   : > { %v5022_v39 = vadd.f32 %v5021_v22, %v5008_v33 }
 0x70d   : > { %v5035_v58 = vpop.f32.mrf.mxu1 }
 0x70e   : > { %v5036_v51 = vadd.f32 %v5035_v58, %v5022_v39 }
 0x70f   : > { %v5075_v23 = vpop.f32.mrf.mxu0 }
 0x715   : > { %v5089_v12 = vpop.f32.mrf.mxu1 }
 0x716   : > { %v5090_v47 = vadd.f32 %v5089_v12, %v5075_v23 }
 0x717   : > { %v5077_v21 = vpop.f32.mrf.mxu0 }
 0x71d   : > { %v5091_v16 = vpop.f32.mrf.mxu1 }
 0x71e   : > { %v5092_v59 = vadd.f32 %v5091_v16, %v5077_v21 }
 0x71f   : > { %v5131_v38 = vpop.f32.mrf.mxu0 }
 0x723   : > { %v5047_v1 = vpop.f32.mrf.mxu2 }
 0x724   : > { %v5048_v53 = vadd.f32 %v5047_v1, %v5034_v30 }
 0x725   : > { %v5145_v48 = vpop.f32.mrf.mxu1 }
 0x727   : > { %v5133_v42 = vpop.f32.mrf.mxu0 }
 0x72a   : > { %v5061_v20 = vpop.f32.mrf.mxu3 }
 0x72b   : > { %v5062_v62 = vadd.f32 %v5061_v20, %v5048_v53  ;;  %v5049_v28 = vpop.f32.mrf.mxu2 }
 0x72c   : > { %v5050_v44 = vadd.f32 %v5049_v28, %v5036_v51 }
 0x72d   : > { %v5178_v43 = vadd.f32 %v5062_v62, %v8794_v40  ;;  %v5147_v7 = vpop.f32.mrf.mxu1 }
 0x72f   : > { %5182 = vst [vmem:[%s9467_s29] sm:$0xff] %v5178_v43 }
 0x732   : > { %v5063_v29 = vpop.f32.mrf.mxu3 }
 0x733   : > { %v5064_v24 = vadd.f32 %v5063_v29, %v5050_v44  ;;  %v5103_v32 = vpop.f32.mrf.mxu2 }
 0x734   : > { %v5104_v45 = vadd.f32 %v5103_v32, %v5090_v47 }
 0x735   : > { %v5180_v14 = vadd.f32 %v5064_v24, %v8804_v2 }
 0x737   : > { %5184 = vst [vmem:[%s9467_s29 + $0x10] sm:$0xff] %v5180_v14 }
 0x73a   : > { %v5117_v35 = vpop.f32.mrf.mxu3 }
 0x73b   : > { %v5105_v40 = vpop.f32.mrf.mxu2  ;;  %v5118_v18 = vadd.f32 %v5117_v35, %v5104_v45 }
 0x73c   : > { %v5106_v61 = vadd.f32 %v5105_v40, %v5092_v59 }
 0x73d   : > { %v5132_v15 = vadd.f32 %v5131_v38, %v5118_v18 }
 0x73f   : > { %v5146_v2 = vadd.f32 %v5145_v48, %v5132_v15 }
 0x742   : > { %v5119_v27 = vpop.f32.mrf.mxu3 }
 0x743   : > { %v5159_v36 = vpop.f32.mrf.mxu2  ;;  %v5120_v34 = vadd.f32 %v5119_v27, %v5106_v61 }
 0x744   : > { %v5160_v54 = vadd.f32 %v5159_v36, %v5146_v2 }
 0x745   : > { %v5134_v0 = vadd.f32 %v5133_v42, %v5120_v34 }
 0x747   : > { %v5148_v31 = vadd.f32 %v5147_v7, %v5134_v0 }
 0x74a   : > { %v5173_v10 = vpop.f32.mrf.mxu3 }
 0x74b   : > { %v5174_v63 = vadd.f32 %v5173_v10, %v5160_v54  ;;  %v5161_v50 = vpop.f32.mrf.mxu2 }
 0x74c   : > { %v5162_v3 = vadd.f32 %v5161_v50, %v5148_v31 }
 0x74d   : > { %v5179_v25 = vadd.f32 %v5174_v63, %v8797_v52 }
 0x74f   : > { %5183 = vst [vmem:[%s9467_s29 + $0x8] sm:$0xff] %v5179_v25 }
 0x752   : > { %v5175_v13 = vpop.f32.mrf.mxu3 }
 0x753   : > { %v5176_v46 = vadd.f32 %v5175_v13, %v5162_v3 }
 0x755   : > { %v5181_v57 = vadd.f32 %v5176_v46, %v8807_v6 }
 0x757   : > { %5185 = vst [vmem:[%s9467_s29 + $0x18] sm:$0xff] %v5181_v57 }
 0x758   : > { %8397 = shalt.err (!%p8394_p12)
}
 0x759   : > { %s8460_s30 = smov 256   ;;  %s8461_s29 = smov 16  }
 0x75a   : > { %8045 = dma.vmem_to_hbm [thread:$0]  (%p8606_p3), %s5210_s23, 512, %s5212_s28, %s5187_s21, %s8460_s30, %s8460_s30, %s8461_s29  }
 0x75b PF: > { %s9588_s2 = sld [smem:[#allocation18_spill]]  ;;  %p9590_p13 = scmp.ge.s32.totalorder %s8444_s20, 2 }
 0x75d   : > { %p8065_p0 = pnand %p9590_p13, %p8557_p6 }
 0x75f   : > { %p8066_p5 = pneg %p8065_p0 }
 0x761   : > { %s5232_s15 = sand.u32 1, %s9588_s2  }
 0x762   : > { %s5233_s5 = scalar_lea.sflag [#allocation6], %s5232_s15 }
 0x763   : > { %8427 = dma.done.wait (%p8066_p5), %s5233_s5, 512  }
 0x764   : > { %8429 = vsyncadd (%p8066_p5), %s5233_s5, 4294966784  ;;  %p27_p7 = scmp.ge.s32.totalorder %s8596_s25, 4   ;;  %s9591_s17 = smov %s8436_s18 }
 0x765   : > { %s9592_s18 = smov %s8440_s19  ;;  %s9593_s19 = smov %s8612_s13 }
 0x766   : > { %s9594_s20 = smov %s8596_s25  ;;  %29 = sbr.rel (!%p27_p7) target bundleno = 11 (0xb), region = 141 }
 0x76b   :  { %5255 = vsyncpa [#allocation5], 1 }
 0x76c   :  { %5257 = vsyncpa [#allocation5 + $0x1], 1 }
 0x76d   :  { %5258 = vsyncpa [#allocation8], 1 }
 0x76e   :  { %5259 = vsyncpa [#allocation11], 1 }
 0x76f   :  { %5260 = vsyncpa [#allocation6], 1 }
 0x770   :  { %5262 = vsyncpa [#allocation6 + $0x1], 1 }

</bundles_post_ra>
